<compile_context>
chip_gen: v7x
topology: tpu7x:2x2x1
jax: 0.10.0
libtpu: 0.0.40
codegen_flags: <defaults>
</compile_context>

<pallas_src>
import functools

import jax
import jax.numpy as jnp
from jax.experimental import pallas as pl
from jax.experimental.pallas import tpu as pltpu

EPS = 1e-5
EXPANSION = 4
LANE = 128                       # pad all channel dims to the TPU lane width
VMEM_LIMIT = 32 * 1024 * 1024    # explicit scoped-VMEM budget (safe on v5e/v6e/v7x)


# ------------------------------ small helpers ------------------------------ #

def _round_up(x, m):
    return (x + m - 1) // m * m


def _pick_tm(m):
    """Row-tile size: 256 rows when possible (256x1152 bf16 block ~0.6 MiB)."""
    if m >= 256:
        return 256
    return max(8, _round_up(m, 8))


def _pad_rows(a, rows):
    if a.shape[0] == rows:
        return a
    return jnp.pad(a, ((0, rows - a.shape[0]),) + ((0, 0),) * (a.ndim - 1))


def _pad_cols(a, cols):
    if a.shape[-1] == cols:
        return a
    pad = [(0, 0)] * (a.ndim - 1) + [(0, cols - a.shape[-1])]
    return jnp.pad(a, pad)


def _has_projection(in_planes, planes, stride):
    return stride != 1 or in_planes != EXPANSION * planes


# ----------------------------- Pallas kernels ------------------------------ #

def _conv_bn_stats_kernel(x_ref, w_ref, scale_ref, shift_ref,
                          y_ref, s1_ref, s2_ref,
                          *, fuse_in_bn, m_valid, tm):
    """One M-tile of:
       [optional: normalize+ReLU the producer's raw pre-BN output] ->
       matmul (bf16 MXU inputs, f32 accumulation) ->
       write raw conv output + per-tile BN partials (sum, sum-of-squares).
    """
    x = x_ref[...]
    if fuse_in_bn:
        # BN + ReLU of the previous stage's raw output, in f32 (v5e-friendly).
        x = jnp.maximum(x * scale_ref[...] + shift_ref[...], 0.0)
    y = jnp.dot(x.astype(jnp.bfloat16), w_ref[...],
                preferred_element_type=jnp.float32)
    y_ref[...] = y

    # Per-tile BN partial statistics (rows padded beyond the true M are masked).
    ym = y
    if m_valid is not None:
        row = (jax.lax.broadcasted_iota(jnp.int32, (tm, 1), 0)
               + pl.program_id(0) * tm)
        ym = jnp.where(row < m_valid, y, 0.0)
    s1_ref[...] = jnp.sum(ym, axis=0, keepdims=True)[None]        # (1, 1, C)
    s2_ref[...] = jnp.sum(ym * ym, axis=0, keepdims=True)[None]   # (1, 1, C)


def _bn_add_relu_kernel(y3_ref, sc_ref, a3_ref, b3_ref, asc_ref, bsc_ref, o_ref):
    """bn3(y3) + bn_s(shortcut) (identity: scale=1, shift=0) -> add -> ReLU."""
    main = y3_ref[...] * a3_ref[...] + b3_ref[...]
    short = sc_ref[...] * asc_ref[...] + bsc_ref[...]
    o_ref[...] = jnp.maximum(main + short, 0.0)


# ----------------------------- kernel wrappers ------------------------------ #

def conv_bn_stats(x2d, w, in_scale, in_shift, m_valid, tm):
    """Tiled matmul over M with fused input-BN and per-tile BN stat partials."""
    mp, k = x2d.shape
    cout = w.shape[1]
    nm = mp // tm
    fuse_in_bn = in_scale is not None
    if not fuse_in_bn:
        in_scale = jnp.ones((1, k), jnp.float32)
        in_shift = jnp.zeros((1, k), jnp.float32)

    kernel = functools.partial(
        _conv_bn_stats_kernel, fuse_in_bn=fuse_in_bn, tm=tm,
        m_valid=(m_valid if m_valid != mp else None))

    y, s1, s2 = pl.pallas_call(
        kernel,
        grid=(nm,),
        in_specs=[
            pl.BlockSpec((tm, k), lambda i: (i, 0)),       # activation tile
            pl.BlockSpec((k, cout), lambda i: (0, 0)),     # weights stay resident
            pl.BlockSpec((1, k), lambda i: (0, 0)),        # input BN scale
            pl.BlockSpec((1, k), lambda i: (0, 0)),        # input BN shift
        ],
        out_specs=(
            pl.BlockSpec((tm, cout), lambda i: (i, 0)),        # raw conv out
            pl.BlockSpec((1, 1, cout), lambda i: (i, 0, 0)),   # per-tile sum
            pl.BlockSpec((1, 1, cout), lambda i: (i, 0, 0)),   # per-tile sumsq
        ),
        out_shape=(
            jax.ShapeDtypeStruct((mp, cout), jnp.float32),
            jax.ShapeDtypeStruct((nm, 1, cout), jnp.float32),
            jax.ShapeDtypeStruct((nm, 1, cout), jnp.float32),
        ),
        compiler_params=pltpu.CompilerParams(
            dimension_semantics=("parallel",),      # shards across v7x's 2 TCs
            vmem_limit_bytes=VMEM_LIMIT),
    )(x2d, w, in_scale, in_shift)
    return y, s1, s2


def bn_add_relu(y3, shortcut, a3, b3, asc, bsc, tm):
    mp, c = y3.shape
    nm = mp // tm
    tile = pl.BlockSpec((tm, c), lambda i: (i, 0))
    vec = pl.BlockSpec((1, c), lambda i: (0, 0))
    return pl.pallas_call(
        _bn_add_relu_kernel,
        grid=(nm,),
        in_specs=[tile, tile, vec, vec, vec, vec],
        out_specs=tile,
        out_shape=jax.ShapeDtypeStruct((mp, c), jnp.float32),
        compiler_params=pltpu.CompilerParams(
            dimension_semantics=("parallel",),
            vmem_limit_bytes=VMEM_LIMIT),
    )(y3, shortcut, a3, b3, asc, bsc)


def bn_scale_shift(s1, s2, m_valid, gamma, beta):
    """Reduce per-tile (sum, sumsq) partials -> per-channel scale/shift (f32)."""
    c = gamma.shape[0]
    mean = jnp.sum(s1, axis=0)[0] / m_valid                # (C,)
    ex2 = jnp.sum(s2, axis=0)[0] / m_valid                 # (C,)
    var = jnp.maximum(ex2 - mean * mean, 0.0)
    scale = gamma * jax.lax.rsqrt(var + EPS)
    shift = beta - mean * scale
    return scale.reshape(1, c), shift.reshape(1, c)


# ------------------------------ JAX glue ----------------------------------- #

def _im2col_3x3(x, stride):
    """(N,H,W,C) -> (N*Ho*Wo, 9*C), patch element order = (kh, kw, c)."""
    n, h, w, c = x.shape
    xp = jnp.pad(x, ((0, 0), (1, 1), (1, 1), (0, 0)))
    ho = (h + 2 - 3) // stride + 1
    wo = (w + 2 - 3) // stride + 1
    cols = []
    for kh in range(3):
        for kw in range(3):
            patch = jax.lax.slice(
                xp, (0, kh, kw, 0),
                (n, kh + (ho - 1) * stride + 1, kw + (wo - 1) * stride + 1, c),
                (1, stride, stride, 1))
            cols.append(patch)
    col = jnp.stack(cols, axis=3)                   # (N, Ho, Wo, 9, C)
    return col.reshape(n * ho * wo, 9 * c), ho, wo


def prepare_params(params, in_planes, planes, stride):
    """Pad channels to multiples of 128 (lane-dense MXU tiles), cast weights to
    bf16.  gamma pads with 1, beta with 0 so padded channels stay exactly 0."""
    c4 = EXPANSION * planes
    cin_p = _round_up(in_planes, LANE)
    cp = _round_up(planes, LANE)
    c4p = _round_up(c4, LANE)

    def pad_w(wm, rows, cols):
        return _pad_cols(_pad_rows(wm, rows), cols).astype(jnp.bfloat16)

    def pad_g(v, n):
        return jnp.pad(v, (0, n - v.shape[0]), constant_values=1.0).astype(jnp.float32)

    def pad_b(v, n):
        return jnp.pad(v, (0, n - v.shape[0])).astype(jnp.float32)

    w2 = jnp.pad(params["w2"],
                 ((0, 0), (0, 0), (0, cp - planes), (0, cp - planes)))
    out = dict(
        w1=pad_w(params["w1"], cin_p, cp),
        w2=w2.reshape(9 * cp, cp).astype(jnp.bfloat16),    # (kh, kw, cin) rows
        w3=pad_w(params["w3"], cp, c4p),
        g1=pad_g(params["g1"], cp), b1=pad_b(params["b1"], cp),
        g2=pad_g(params["g2"], cp), b2=pad_b(params["b2"], cp),
        g3=pad_g(params["g3"], c4p), b3=pad_b(params["b3"], c4p),
    )
    if _has_projection(in_planes, planes, stride):
        out.update(ws=pad_w(params["ws"], cin_p, c4p),
                   gs=pad_g(params["gs"], c4p), bs=pad_b(params["bs"], c4p))
    return out


@functools.partial(jax.jit, static_argnums=(2, 3, 4))
def bottleneck_forward(x_nchw, params, in_planes, planes, stride):
    c4 = EXPANSION * planes
    cin_p = _round_up(in_planes, LANE)
    cp = _round_up(planes, LANE)
    c4p = _round_up(c4, LANE)
    pp = prepare_params(params, in_planes, planes, stride)

    # NCHW -> NHWC (module boundary; kept so the PyTorch interface is preserved)
    x = jnp.transpose(x_nchw, (0, 2, 3, 1)).astype(jnp.float32)
    n, h, w, _ = x.shape
    x_p = _pad_cols(x, cin_p)                               # zero channel pad

    # ---- conv1 (1x1): matmul + bn1 partial stats --------------------------
    m1 = n * h * w
    tm1 = _pick_tm(m1)
    m1p = _round_up(m1, tm1)
    x1 = _pad_rows(x_p.reshape(m1, cin_p).astype(jnp.bfloat16), m1p)
    y1, s1a, s1b = conv_bn_stats(x1, pp["w1"], None, None, m1, tm1)
    scale1, shift1 = bn_scale_shift(s1a, s1b, m1, pp["g1"], pp["b1"])

    # ---- conv2 (3x3, stride, pad=1) ----------------------------------------
    # normalize+relu(out1) fuses with the pad/patch gather into one XLA pass;
    # the im2col matrix is kept in bf16 (half the HBM bytes of f32).
    out1 = jnp.maximum(y1[:m1] * scale1 + shift1, 0.0).astype(jnp.bfloat16)
    col, ho, wo = _im2col_3x3(out1.reshape(n, h, w, cp), stride)
    m2 = n * ho * wo
    tm2 = _pick_tm(m2)
    m2p = _round_up(m2, tm2)
    col = _pad_rows(col, m2p)
    y2, s2a, s2b = conv_bn_stats(col, pp["w2"], None, None, m2, tm2)
    scale2, shift2 = bn_scale_shift(s2a, s2b, m2, pp["g2"], pp["b2"])

    # ---- conv3 (1x1): bn2 + relu fused as the input transform -------------
    y3, s3a, s3b = conv_bn_stats(y2, pp["w3"], scale2, shift2, m2, tm2)
    scale3, shift3 = bn_scale_shift(s3a, s3b, m2, pp["g3"], pp["b3"])

    # ---- shortcut ----------------------------------------------------------
    if _has_projection(in_planes, planes, stride):
        xs = x_p[:, ::stride, ::stride, :].reshape(m2, cin_p)
        xs = _pad_rows(xs.astype(jnp.bfloat16), m2p)
        ys, ssa, ssb = conv_bn_stats(xs, pp["ws"], None, None, m2, tm2)
        scale_s, shift_s = bn_scale_shift(ssa, ssb, m2, pp["gs"], pp["bs"])
        shortcut = ys                                        # raw conv out, f32
    else:
        # identity: in_planes == 4*planes and stride == 1  =>  cin_p == c4p
        shortcut = _pad_rows(x_p.reshape(m1, cin_p), m2p)    # f32
        scale_s = jnp.ones((1, c4p), jnp.float32)
        shift_s = jnp.zeros((1, c4p), jnp.float32)

    # ---- bn3 + shortcut-BN + residual add + ReLU ---------------------------
    out = bn_add_relu(y3, shortcut, scale3, shift3, scale_s, shift_s, tm2)
    out = out[:m2, :c4].reshape(n, ho, wo, c4)
    return jnp.transpose(out, (0, 3, 1, 2))                  # back to NCHW


# ------------------------- deterministic parameters ------------------------ #

def init_params(key, in_planes, planes, stride):
    c4 = EXPANSION * planes
    ks = jax.random.split(key, 12)

    def wgt(k, shape):
        return 0.1 * jax.random.normal(k, shape, jnp.float32)

    p = dict(
        w1=wgt(ks[0], (in_planes, planes)),
        g1=1.0 + 0.1 * jax.random.normal(ks[1], (planes,), jnp.float32),
        b1=0.1 * jax.random.normal(ks[2], (planes,), jnp.float32),
        w2=wgt(ks[3], (3, 3, planes, planes)),          # HWIO
        g2=1.0 + 0.1 * jax.random.normal(ks[4], (planes,), jnp.float32),
        b2=0.1 * jax.random.normal(ks[5], (planes,), jnp.float32),
        w3=wgt(ks[6], (planes, c4)),
        g3=1.0 + 0.1 * jax.random.normal(ks[7], (c4,), jnp.float32),
        b3=0.1 * jax.random.normal(ks[8], (c4,), jnp.float32),
    )
    if _has_projection(in_planes, planes, stride):
        p.update(
            ws=wgt(ks[9], (in_planes, c4)),
            gs=1.0 + 0.1 * jax.random.normal(ks[10], (c4,), jnp.float32),
            bs=0.1 * jax.random.normal(ks[11], (c4,), jnp.float32),
        )
    return p


# ------------------------ pure-JAX reference check ------------------------- #

def _q(t):
    # Model the kernels' bf16 MXU inputs (accumulation stays f32).
    return t.astype(jnp.bfloat16).astype(jnp.float32)


def _conv_ref(x, w, stride, padding):
    return jax.lax.conv_general_dilated(
        _q(x), _q(w), (stride, stride), padding,
        dimension_numbers=("NHWC", "HWIO", "NHWC"))


def _bn_ref(y, g, b):
    mean = jnp.mean(y, axis=(0, 1, 2))
    var = jnp.mean(jnp.square(y - mean), axis=(0, 1, 2))
    return (y - mean) * jax.lax.rsqrt(var + EPS) * g + b


def bottleneck_ref(x_nchw, params, in_planes, planes, stride):
    c4 = EXPANSION * planes
    x = jnp.transpose(x_nchw, (0, 2, 3, 1)).astype(jnp.float32)
    w1 = params["w1"].reshape(1, 1, in_planes, planes)
    out = jnp.maximum(_bn_ref(_conv_ref(x, w1, 1, "VALID"),
                              params["g1"], params["b1"]), 0.0)
    out = jnp.maximum(_bn_ref(_conv_ref(out, params["w2"], stride,
                                        [(1, 1), (1, 1)]),
                              params["g2"], params["b2"]), 0.0)
    w3 = params["w3"].reshape(1, 1, planes, c4)
    out = _bn_ref(_conv_ref(out, w3, 1, "VALID"), params["g3"], params["b3"])
    if _has_projection(in_planes, planes, stride):
        ws = params["ws"].reshape(1, 1, in_planes, c4)
        sc = _bn_ref(_conv_ref(x, ws, stride, "VALID"),
                     params["gs"], params["bs"])
    else:
        sc = x
    out = jnp.maximum(out + sc, 0.0)
    return jnp.transpose(out, (0, 3, 1, 2))


# ----------------------------------- main ----------------------------------- #

if __name__ == "__main__":
    key = jax.random.PRNGKey(0)
    configs = [
        # (N, in_planes, H, W, planes, stride)
        (2, 4, 16, 16, 4, 1),   # projection shortcut (channel expansion)
        (2, 4, 16, 16, 4, 2),   # projection shortcut + stride 2
        (2, 16, 8, 8, 4, 1),    # identity shortcut
    ]
    for idx, (N, cin, H, W, planes, stride) in enumerate(configs):
        kx, kp = jax.random.split(jax.random.fold_in(key, idx))
        x = jax.random.normal(kx, (N, cin, H, W), jnp.float32)
        params = init_params(kp, cin, planes, stride)

        out = bottleneck_forward(x, params, cin, planes, stride)
        out = jax.block_until_ready(out)

        ref = bottleneck_ref(x, params, cin, planes, stride)
        assert out.shape == ref.shape, (out.shape, ref.shape)
        max_err = float(jnp.max(jnp.abs(out - ref)))
        # Both paths use bf16 MXU inputs with f32 accumulation; typical max |err|
        # is ~1e-5.  The loose bound only covers rare bf16 rounding-boundary
        # divergence between the kernel path and the independent XLA reference.
        if not bool(jnp.allclose(out, ref, atol=2e-2, rtol=2e-2)):
            raise SystemExit(f"mismatch in config {idx}: max abs err = {max_err}")

    print("KERNEL_OK")
</pallas_src>

<mosaic_0001>
module attributes {stable_mosaic.version = 11 : i64} {
  func.func @_conv_bn_stats_kernel(%arg0: i32, %arg1: memref<256x128xbf16, #tpu.memory_space<vmem>>, %arg2: memref<128x128xbf16, #tpu.memory_space<vmem>>, %arg3: memref<1x128xf32, #tpu.memory_space<vmem>>, %arg4: memref<1x128xf32, #tpu.memory_space<vmem>>, %arg5: memref<256x128xf32, #tpu.memory_space<vmem>>, %arg6: memref<1x1x128xf32, #tpu.memory_space<vmem>>, %arg7: memref<1x1x128xf32, #tpu.memory_space<vmem>>) attributes {dimension_semantics = [#tpu.dimension_semantics<parallel>], iteration_bounds = array<i64: 2>, scalar_prefetch = 0 : i64, scratch_operands = 0 : i64, tpu.core_type = #tpu.core_type<tc>, window_params = [{transform_indices = @transform_0, window_bounds = array<i64: 256, 128>}, {pipeline_mode = #tpu.pipeline_mode<synchronous>, transform_indices = @transform_1, window_bounds = array<i64: 128, 128>}, {pipeline_mode = #tpu.pipeline_mode<synchronous>, transform_indices = @transform_2, window_bounds = array<i64: 1, 128>}, {pipeline_mode = #tpu.pipeline_mode<synchronous>, transform_indices = @transform_3, window_bounds = array<i64: 1, 128>}, {transform_indices = @transform_4, window_bounds = array<i64: 256, 128>}, {transform_indices = @transform_5, window_bounds = array<i64: 1, 1, 128>}, {transform_indices = @transform_6, window_bounds = array<i64: 1, 1, 128>}]} {
    %c0 = arith.constant 0 : index
    %c0_0 = arith.constant 0 : index
    %0 = vector.load %arg1[%c0, %c0_0] : memref<256x128xbf16, #tpu.memory_space<vmem>>, vector<256x128xbf16>
    %c0_1 = arith.constant 0 : index
    %c0_2 = arith.constant 0 : index
    %1 = vector.load %arg2[%c0_1, %c0_2] : memref<128x128xbf16, #tpu.memory_space<vmem>>, vector<128x128xbf16>
    %cst = arith.constant dense<0.000000e+00> : vector<256x128xf32>
    %2 = tpu.matmul %0, %1, %cst {dimension_numbers = #tpu.dot_dimension_numbers<[1], [0], [0], [1], [0, 0, 1, 1], [], []>} : vector<256x128xbf16>, vector<128x128xbf16>, vector<256x128xf32> -> vector<256x128xf32>
    %c0_3 = arith.constant 0 : index
    %c0_4 = arith.constant 0 : index
    %3 = vector.load %arg5[%c0_3, %c0_4] : memref<256x128xf32, #tpu.memory_space<vmem>>, vector<256x128xf32>
    tpu.vector_store %arg5[%c0_3, %c0_4], %2 {strides = array<i32>} : memref<256x128xf32, #tpu.memory_space<vmem>>, vector<256x128xf32>,
    %cst_5 = arith.constant dense<0.000000e+00> : vector<128xf32>
    %4 = vector.multi_reduction <add>, %2, %cst_5 [0] : vector<256x128xf32> to vector<128xf32>
    %5 = vector.shape_cast %4 : vector<128xf32> to vector<1x128xf32>
    %6 = vector.shape_cast %5 : vector<1x128xf32> to vector<1x1x128xf32>
    %c0_6 = arith.constant 0 : index
    %c0_7 = arith.constant 0 : index
    %c0_8 = arith.constant 0 : index
    %7 = vector.load %arg6[%c0_6, %c0_7, %c0_8] : memref<1x1x128xf32, #tpu.memory_space<vmem>>, vector<1x1x128xf32>
    tpu.vector_store %arg6[%c0_6, %c0_7, %c0_8], %6 {strides = array<i32>} : memref<1x1x128xf32, #tpu.memory_space<vmem>>, vector<1x1x128xf32>,
    %8 = arith.mulf %2, %2 : vector<256x128xf32>
    %cst_9 = arith.constant dense<0.000000e+00> : vector<128xf32>
    %9 = vector.multi_reduction <add>, %8, %cst_9 [0] : vector<256x128xf32> to vector<128xf32>
    %10 = vector.shape_cast %9 : vector<128xf32> to vector<1x128xf32>
    %11 = vector.shape_cast %10 : vector<1x128xf32> to vector<1x1x128xf32>
    %c0_10 = arith.constant 0 : index
    %c0_11 = arith.constant 0 : index
    %c0_12 = arith.constant 0 : index
    %12 = vector.load %arg7[%c0_10, %c0_11, %c0_12] : memref<1x1x128xf32, #tpu.memory_space<vmem>>, vector<1x1x128xf32>
    tpu.vector_store %arg7[%c0_10, %c0_11, %c0_12], %11 {strides = array<i32>} : memref<1x1x128xf32, #tpu.memory_space<vmem>>, vector<1x1x128xf32>,
    return
  }
  func.func @transform_0(%arg0: i32) -> (i32, i32) {
    %c0_i32 = arith.constant 0 : i32
    %c0_i32_0 = arith.constant 0 : i32
    return %arg0, %c0_i32 : i32, i32
  }
  func.func @transform_1(%arg0: i32) -> (i32, i32) {
    %c0_i32 = arith.constant 0 : i32
    %c0_i32_0 = arith.constant 0 : i32
    %c0_i32_1 = arith.constant 0 : i32
    return %c0_i32, %c0_i32_0 : i32, i32
  }
  func.func @transform_2(%arg0: i32) -> (i32, i32) {
    %c0_i32 = arith.constant 0 : i32
    %c0_i32_0 = arith.constant 0 : i32
    %c0_i32_1 = arith.constant 0 : i32
    return %c0_i32, %c0_i32_0 : i32, i32
  }
  func.func @transform_3(%arg0: i32) -> (i32, i32) {
    %c0_i32 = arith.constant 0 : i32
    %c0_i32_0 = arith.constant 0 : i32
    %c0_i32_1 = arith.constant 0 : i32
    return %c0_i32, %c0_i32_0 : i32, i32
  }
  func.func @transform_4(%arg0: i32) -> (i32, i32) {
    %c0_i32 = arith.constant 0 : i32
    %c0_i32_0 = arith.constant 0 : i32
    return %arg0, %c0_i32 : i32, i32
  }
  func.func @transform_5(%arg0: i32) -> (i32, i32, i32) {
    %c0_i32 = arith.constant 0 : i32
    %c0_i32_0 = arith.constant 0 : i32
    %c0_i32_1 = arith.constant 0 : i32
    return %arg0, %c0_i32, %c0_i32_0 : i32, i32, i32
  }
  func.func @transform_6(%arg0: i32) -> (i32, i32, i32) {
    %c0_i32 = arith.constant 0 : i32
    %c0_i32_0 = arith.constant 0 : i32
    %c0_i32_1 = arith.constant 0 : i32
    return %arg0, %c0_i32, %c0_i32_0 : i32, i32, i32
  }
}

module attributes {stable_mosaic.version = 11 : i64} {
  func.func @_conv_bn_stats_kernel(%arg0: i32, %arg1: memref<256x1152xbf16, #tpu.memory_space<vmem>>, %arg2: memref<1152x128xbf16, #tpu.memory_space<vmem>>, %arg3: memref<1x1152xf32, #tpu.memory_space<vmem>>, %arg4: memref<1x1152xf32, #tpu.memory_space<vmem>>, %arg5: memref<256x128xf32, #tpu.memory_space<vmem>>, %arg6: memref<1x1x128xf32, #tpu.memory_space<vmem>>, %arg7: memref<1x1x128xf32, #tpu.memory_space<vmem>>) attributes {dimension_semantics = [#tpu.dimension_semantics<parallel>], iteration_bounds = array<i64: 2>, scalar_prefetch = 0 : i64, scratch_operands = 0 : i64, tpu.core_type = #tpu.core_type<tc>, window_params = [{transform_indices = @transform_0, window_bounds = array<i64: 256, 1152>}, {pipeline_mode = #tpu.pipeline_mode<synchronous>, transform_indices = @transform_1, window_bounds = array<i64: 1152, 128>}, {pipeline_mode = #tpu.pipeline_mode<synchronous>, transform_indices = @transform_2, window_bounds = array<i64: 1, 1152>}, {pipeline_mode = #tpu.pipeline_mode<synchronous>, transform_indices = @transform_3, window_bounds = array<i64: 1, 1152>}, {transform_indices = @transform_4, window_bounds = array<i64: 256, 128>}, {transform_indices = @transform_5, window_bounds = array<i64: 1, 1, 128>}, {transform_indices = @transform_6, window_bounds = array<i64: 1, 1, 128>}]} {
    %c0 = arith.constant 0 : index
    %c0_0 = arith.constant 0 : index
    %0 = vector.load %arg1[%c0, %c0_0] : memref<256x1152xbf16, #tpu.memory_space<vmem>>, vector<256x1152xbf16>
    %c0_1 = arith.constant 0 : index
    %c0_2 = arith.constant 0 : index
    %1 = vector.load %arg2[%c0_1, %c0_2] : memref<1152x128xbf16, #tpu.memory_space<vmem>>, vector<1152x128xbf16>
    %cst = arith.constant dense<0.000000e+00> : vector<256x128xf32>
    %2 = tpu.matmul %0, %1, %cst {dimension_numbers = #tpu.dot_dimension_numbers<[1], [0], [0], [1], [0, 0, 1, 1], [], []>} : vector<256x1152xbf16>, vector<1152x128xbf16>, vector<256x128xf32> -> vector<256x128xf32>
    %c0_3 = arith.constant 0 : index
    %c0_4 = arith.constant 0 : index
    %3 = vector.load %arg5[%c0_3, %c0_4] : memref<256x128xf32, #tpu.memory_space<vmem>>, vector<256x128xf32>
    tpu.vector_store %arg5[%c0_3, %c0_4], %2 {strides = array<i32>} : memref<256x128xf32, #tpu.memory_space<vmem>>, vector<256x128xf32>,
    %cst_5 = arith.constant dense<0.000000e+00> : vector<128xf32>
    %4 = vector.multi_reduction <add>, %2, %cst_5 [0] : vector<256x128xf32> to vector<128xf32>
    %5 = vector.shape_cast %4 : vector<128xf32> to vector<1x128xf32>
    %6 = vector.shape_cast %5 : vector<1x128xf32> to vector<1x1x128xf32>
    %c0_6 = arith.constant 0 : index
    %c0_7 = arith.constant 0 : index
    %c0_8 = arith.constant 0 : index
    %7 = vector.load %arg6[%c0_6, %c0_7, %c0_8] : memref<1x1x128xf32, #tpu.memory_space<vmem>>, vector<1x1x128xf32>
    tpu.vector_store %arg6[%c0_6, %c0_7, %c0_8], %6 {strides = array<i32>} : memref<1x1x128xf32, #tpu.memory_space<vmem>>, vector<1x1x128xf32>,
    %8 = arith.mulf %2, %2 : vector<256x128xf32>
    %cst_9 = arith.constant dense<0.000000e+00> : vector<128xf32>
    %9 = vector.multi_reduction <add>, %8, %cst_9 [0] : vector<256x128xf32> to vector<128xf32>
    %10 = vector.shape_cast %9 : vector<128xf32> to vector<1x128xf32>
    %11 = vector.shape_cast %10 : vector<1x128xf32> to vector<1x1x128xf32>
    %c0_10 = arith.constant 0 : index
    %c0_11 = arith.constant 0 : index
    %c0_12 = arith.constant 0 : index
    %12 = vector.load %arg7[%c0_10, %c0_11, %c0_12] : memref<1x1x128xf32, #tpu.memory_space<vmem>>, vector<1x1x128xf32>
    tpu.vector_store %arg7[%c0_10, %c0_11, %c0_12], %11 {strides = array<i32>} : memref<1x1x128xf32, #tpu.memory_space<vmem>>, vector<1x1x128xf32>,
    return
  }
  func.func @transform_0(%arg0: i32) -> (i32, i32) {
    %c0_i32 = arith.constant 0 : i32
    %c0_i32_0 = arith.constant 0 : i32
    return %arg0, %c0_i32 : i32, i32
  }
  func.func @transform_1(%arg0: i32) -> (i32, i32) {
    %c0_i32 = arith.constant 0 : i32
    %c0_i32_0 = arith.constant 0 : i32
    %c0_i32_1 = arith.constant 0 : i32
    return %c0_i32, %c0_i32_0 : i32, i32
  }
  func.func @transform_2(%arg0: i32) -> (i32, i32) {
    %c0_i32 = arith.constant 0 : i32
    %c0_i32_0 = arith.constant 0 : i32
    %c0_i32_1 = arith.constant 0 : i32
    return %c0_i32, %c0_i32_0 : i32, i32
  }
  func.func @transform_3(%arg0: i32) -> (i32, i32) {
    %c0_i32 = arith.constant 0 : i32
    %c0_i32_0 = arith.constant 0 : i32
    %c0_i32_1 = arith.constant 0 : i32
    return %c0_i32, %c0_i32_0 : i32, i32
  }
  func.func @transform_4(%arg0: i32) -> (i32, i32) {
    %c0_i32 = arith.constant 0 : i32
    %c0_i32_0 = arith.constant 0 : i32
    return %arg0, %c0_i32 : i32, i32
  }
  func.func @transform_5(%arg0: i32) -> (i32, i32, i32) {
    %c0_i32 = arith.constant 0 : i32
    %c0_i32_0 = arith.constant 0 : i32
    %c0_i32_1 = arith.constant 0 : i32
    return %arg0, %c0_i32, %c0_i32_0 : i32, i32, i32
  }
  func.func @transform_6(%arg0: i32) -> (i32, i32, i32) {
    %c0_i32 = arith.constant 0 : i32
    %c0_i32_0 = arith.constant 0 : i32
    %c0_i32_1 = arith.constant 0 : i32
    return %arg0, %c0_i32, %c0_i32_0 : i32, i32, i32
  }
}

module attributes {stable_mosaic.version = 11 : i64} {
  func.func @_conv_bn_stats_kernel(%arg0: i32, %arg1: memref<256x128xf32, #tpu.memory_space<vmem>>, %arg2: memref<128x128xbf16, #tpu.memory_space<vmem>>, %arg3: memref<1x128xf32, #tpu.memory_space<vmem>>, %arg4: memref<1x128xf32, #tpu.memory_space<vmem>>, %arg5: memref<256x128xf32, #tpu.memory_space<vmem>>, %arg6: memref<1x1x128xf32, #tpu.memory_space<vmem>>, %arg7: memref<1x1x128xf32, #tpu.memory_space<vmem>>) attributes {dimension_semantics = [#tpu.dimension_semantics<parallel>], iteration_bounds = array<i64: 2>, scalar_prefetch = 0 : i64, scratch_operands = 0 : i64, tpu.core_type = #tpu.core_type<tc>, window_params = [{transform_indices = @transform_0, window_bounds = array<i64: 256, 128>}, {pipeline_mode = #tpu.pipeline_mode<synchronous>, transform_indices = @transform_1, window_bounds = array<i64: 128, 128>}, {pipeline_mode = #tpu.pipeline_mode<synchronous>, transform_indices = @transform_2, window_bounds = array<i64: 1, 128>}, {pipeline_mode = #tpu.pipeline_mode<synchronous>, transform_indices = @transform_3, window_bounds = array<i64: 1, 128>}, {transform_indices = @transform_4, window_bounds = array<i64: 256, 128>}, {transform_indices = @transform_5, window_bounds = array<i64: 1, 1, 128>}, {transform_indices = @transform_6, window_bounds = array<i64: 1, 1, 128>}]} {
    %c0 = arith.constant 0 : index
    %c0_0 = arith.constant 0 : index
    %0 = vector.load %arg1[%c0, %c0_0] : memref<256x128xf32, #tpu.memory_space<vmem>>, vector<256x128xf32>
    %c0_1 = arith.constant 0 : index
    %c0_2 = arith.constant 0 : index
    %1 = vector.load %arg3[%c0_1, %c0_2] : memref<1x128xf32, #tpu.memory_space<vmem>>, vector<1x128xf32>
    %2 = vector.broadcast %1 : vector<1x128xf32> to vector<256x128xf32>
    %3 = arith.mulf %0, %2 : vector<256x128xf32>
    %c0_3 = arith.constant 0 : index
    %c0_4 = arith.constant 0 : index
    %4 = vector.load %arg4[%c0_3, %c0_4] : memref<1x128xf32, #tpu.memory_space<vmem>>, vector<1x128xf32>
    %5 = vector.broadcast %4 : vector<1x128xf32> to vector<256x128xf32>
    %6 = arith.addf %3, %5 : vector<256x128xf32>
    %cst = arith.constant 0.000000e+00 : f32
    %7 = vector.broadcast %cst : f32 to vector<256x128xf32>
    %8 = arith.maximumf %6, %7 : vector<256x128xf32>
    %9 = arith.truncf %8 : vector<256x128xf32> to vector<256x128xbf16>
    %c0_5 = arith.constant 0 : index
    %c0_6 = arith.constant 0 : index
    %10 = vector.load %arg2[%c0_5, %c0_6] : memref<128x128xbf16, #tpu.memory_space<vmem>>, vector<128x128xbf16>
    %cst_7 = arith.constant dense<0.000000e+00> : vector<256x128xf32>
    %11 = tpu.matmul %9, %10, %cst_7 {dimension_numbers = #tpu.dot_dimension_numbers<[1], [0], [0], [1], [0, 0, 1, 1], [], []>} : vector<256x128xbf16>, vector<128x128xbf16>, vector<256x128xf32> -> vector<256x128xf32>
    %c0_8 = arith.constant 0 : index
    %c0_9 = arith.constant 0 : index
    %12 = vector.load %arg5[%c0_8, %c0_9] : memref<256x128xf32, #tpu.memory_space<vmem>>, vector<256x128xf32>
    tpu.vector_store %arg5[%c0_8, %c0_9], %11 {strides = array<i32>} : memref<256x128xf32, #tpu.memory_space<vmem>>, vector<256x128xf32>,
    %cst_10 = arith.constant dense<0.000000e+00> : vector<128xf32>
    %13 = vector.multi_reduction <add>, %11, %cst_10 [0] : vector<256x128xf32> to vector<128xf32>
    %14 = vector.shape_cast %13 : vector<128xf32> to vector<1x128xf32>
    %15 = vector.shape_cast %14 : vector<1x128xf32> to vector<1x1x128xf32>
    %c0_11 = arith.constant 0 : index
    %c0_12 = arith.constant 0 : index
    %c0_13 = arith.constant 0 : index
    %16 = vector.load %arg6[%c0_11, %c0_12, %c0_13] : memref<1x1x128xf32, #tpu.memory_space<vmem>>, vector<1x1x128xf32>
    tpu.vector_store %arg6[%c0_11, %c0_12, %c0_13], %15 {strides = array<i32>} : memref<1x1x128xf32, #tpu.memory_space<vmem>>, vector<1x1x128xf32>,
    %17 = arith.mulf %11, %11 : vector<256x128xf32>
    %cst_14 = arith.constant dense<0.000000e+00> : vector<128xf32>
    %18 = vector.multi_reduction <add>, %17, %cst_14 [0] : vector<256x128xf32> to vector<128xf32>
    %19 = vector.shape_cast %18 : vector<128xf32> to vector<1x128xf32>
    %20 = vector.shape_cast %19 : vector<1x128xf32> to vector<1x1x128xf32>
    %c0_15 = arith.constant 0 : index
    %c0_16 = arith.constant 0 : index
    %c0_17 = arith.constant 0 : index
    %21 = vector.load %arg7[%c0_15, %c0_16, %c0_17] : memref<1x1x128xf32, #tpu.memory_space<vmem>>, vector<1x1x128xf32>
    tpu.vector_store %arg7[%c0_15, %c0_16, %c0_17], %20 {strides = array<i32>} : memref<1x1x128xf32, #tpu.memory_space<vmem>>, vector<1x1x128xf32>,
    return
  }
  func.func @transform_0(%arg0: i32) -> (i32, i32) {
    %c0_i32 = arith.constant 0 : i32
    %c0_i32_0 = arith.constant 0 : i32
    return %arg0, %c0_i32 : i32, i32
  }
  func.func @transform_1(%arg0: i32) -> (i32, i32) {
    %c0_i32 = arith.constant 0 : i32
    %c0_i32_0 = arith.constant 0 : i32
    %c0_i32_1 = arith.constant 0 : i32
    return %c0_i32, %c0_i32_0 : i32, i32
  }
  func.func @transform_2(%arg0: i32) -> (i32, i32) {
    %c0_i32 = arith.constant 0 : i32
    %c0_i32_0 = arith.constant 0 : i32
    %c0_i32_1 = arith.constant 0 : i32
    return %c0_i32, %c0_i32_0 : i32, i32
  }
  func.func @transform_3(%arg0: i32) -> (i32, i32) {
    %c0_i32 = arith.constant 0 : i32
    %c0_i32_0 = arith.constant 0 : i32
    %c0_i32_1 = arith.constant 0 : i32
    return %c0_i32, %c0_i32_0 : i32, i32
  }
  func.func @transform_4(%arg0: i32) -> (i32, i32) {
    %c0_i32 = arith.constant 0 : i32
    %c0_i32_0 = arith.constant 0 : i32
    return %arg0, %c0_i32 : i32, i32
  }
  func.func @transform_5(%arg0: i32) -> (i32, i32, i32) {
    %c0_i32 = arith.constant 0 : i32
    %c0_i32_0 = arith.constant 0 : i32
    %c0_i32_1 = arith.constant 0 : i32
    return %arg0, %c0_i32, %c0_i32_0 : i32, i32, i32
  }
  func.func @transform_6(%arg0: i32) -> (i32, i32, i32) {
    %c0_i32 = arith.constant 0 : i32
    %c0_i32_0 = arith.constant 0 : i32
    %c0_i32_1 = arith.constant 0 : i32
    return %arg0, %c0_i32, %c0_i32_0 : i32, i32, i32
  }
}

module attributes {stable_mosaic.version = 11 : i64} {
  func.func @_bn_add_relu_kernel(%arg0: i32, %arg1: memref<256x128xf32, #tpu.memory_space<vmem>>, %arg2: memref<256x128xf32, #tpu.memory_space<vmem>>, %arg3: memref<1x128xf32, #tpu.memory_space<vmem>>, %arg4: memref<1x128xf32, #tpu.memory_space<vmem>>, %arg5: memref<1x128xf32, #tpu.memory_space<vmem>>, %arg6: memref<1x128xf32, #tpu.memory_space<vmem>>, %arg7: memref<256x128xf32, #tpu.memory_space<vmem>>) attributes {dimension_semantics = [#tpu.dimension_semantics<parallel>], iteration_bounds = array<i64: 2>, scalar_prefetch = 0 : i64, scratch_operands = 0 : i64, tpu.core_type = #tpu.core_type<tc>, window_params = [{transform_indices = @transform_0, window_bounds = array<i64: 256, 128>}, {transform_indices = @transform_1, window_bounds = array<i64: 256, 128>}, {pipeline_mode = #tpu.pipeline_mode<synchronous>, transform_indices = @transform_2, window_bounds = array<i64: 1, 128>}, {pipeline_mode = #tpu.pipeline_mode<synchronous>, transform_indices = @transform_3, window_bounds = array<i64: 1, 128>}, {pipeline_mode = #tpu.pipeline_mode<synchronous>, transform_indices = @transform_4, window_bounds = array<i64: 1, 128>}, {pipeline_mode = #tpu.pipeline_mode<synchronous>, transform_indices = @transform_5, window_bounds = array<i64: 1, 128>}, {transform_indices = @transform_6, window_bounds = array<i64: 256, 128>}]} {
    %c0 = arith.constant 0 : index
    %c0_0 = arith.constant 0 : index
    %0 = vector.load %arg1[%c0, %c0_0] : memref<256x128xf32, #tpu.memory_space<vmem>>, vector<256x128xf32>
    %c0_1 = arith.constant 0 : index
    %c0_2 = arith.constant 0 : index
    %1 = vector.load %arg3[%c0_1, %c0_2] : memref<1x128xf32, #tpu.memory_space<vmem>>, vector<1x128xf32>
    %2 = vector.broadcast %1 : vector<1x128xf32> to vector<256x128xf32>
    %3 = arith.mulf %0, %2 : vector<256x128xf32>
    %c0_3 = arith.constant 0 : index
    %c0_4 = arith.constant 0 : index
    %4 = vector.load %arg4[%c0_3, %c0_4] : memref<1x128xf32, #tpu.memory_space<vmem>>, vector<1x128xf32>
    %5 = vector.broadcast %4 : vector<1x128xf32> to vector<256x128xf32>
    %6 = arith.addf %3, %5 : vector<256x128xf32>
    %c0_5 = arith.constant 0 : index
    %c0_6 = arith.constant 0 : index
    %7 = vector.load %arg2[%c0_5, %c0_6] : memref<256x128xf32, #tpu.memory_space<vmem>>, vector<256x128xf32>
    %c0_7 = arith.constant 0 : index
    %c0_8 = arith.constant 0 : index
    %8 = vector.load %arg5[%c0_7, %c0_8] : memref<1x128xf32, #tpu.memory_space<vmem>>, vector<1x128xf32>
    %9 = vector.broadcast %8 : vector<1x128xf32> to vector<256x128xf32>
    %10 = arith.mulf %7, %9 : vector<256x128xf32>
    %c0_9 = arith.constant 0 : index
    %c0_10 = arith.constant 0 : index
    %11 = vector.load %arg6[%c0_9, %c0_10] : memref<1x128xf32, #tpu.memory_space<vmem>>, vector<1x128xf32>
    %12 = vector.broadcast %11 : vector<1x128xf32> to vector<256x128xf32>
    %13 = arith.addf %10, %12 : vector<256x128xf32>
    %14 = arith.addf %6, %13 : vector<256x128xf32>
    %cst = arith.constant 0.000000e+00 : f32
    %15 = vector.broadcast %cst : f32 to vector<256x128xf32>
    %16 = arith.maximumf %14, %15 : vector<256x128xf32>
    %c0_11 = arith.constant 0 : index
    %c0_12 = arith.constant 0 : index
    %17 = vector.load %arg7[%c0_11, %c0_12] : memref<256x128xf32, #tpu.memory_space<vmem>>, vector<256x128xf32>
    tpu.vector_store %arg7[%c0_11, %c0_12], %16 {strides = array<i32>} : memref<256x128xf32, #tpu.memory_space<vmem>>, vector<256x128xf32>,
    return
  }
  func.func @transform_0(%arg0: i32) -> (i32, i32) {
    %c0_i32 = arith.constant 0 : i32
    %c0_i32_0 = arith.constant 0 : i32
    return %arg0, %c0_i32 : i32, i32
  }
  func.func @transform_1(%arg0: i32) -> (i32, i32) {
    %c0_i32 = arith.constant 0 : i32
    %c0_i32_0 = arith.constant 0 : i32
    return %arg0, %c0_i32 : i32, i32
  }
  func.func @transform_2(%arg0: i32) -> (i32, i32) {
    %c0_i32 = arith.constant 0 : i32
    %c0_i32_0 = arith.constant 0 : i32
    %c0_i32_1 = arith.constant 0 : i32
    return %c0_i32, %c0_i32_0 : i32, i32
  }
  func.func @transform_3(%arg0: i32) -> (i32, i32) {
    %c0_i32 = arith.constant 0 : i32
    %c0_i32_0 = arith.constant 0 : i32
    %c0_i32_1 = arith.constant 0 : i32
    return %c0_i32, %c0_i32_0 : i32, i32
  }
  func.func @transform_4(%arg0: i32) -> (i32, i32) {
    %c0_i32 = arith.constant 0 : i32
    %c0_i32_0 = arith.constant 0 : i32
    %c0_i32_1 = arith.constant 0 : i32
    return %c0_i32, %c0_i32_0 : i32, i32
  }
  func.func @transform_5(%arg0: i32) -> (i32, i32) {
    %c0_i32 = arith.constant 0 : i32
    %c0_i32_0 = arith.constant 0 : i32
    %c0_i32_1 = arith.constant 0 : i32
    return %c0_i32, %c0_i32_0 : i32, i32
  }
  func.func @transform_6(%arg0: i32) -> (i32, i32) {
    %c0_i32 = arith.constant 0 : i32
    %c0_i32_0 = arith.constant 0 : i32
    return %arg0, %c0_i32 : i32, i32
  }
}

</mosaic_0001>

<bundles_post_ra>
// kernel: bottleneck_forward.5
= control target key start
LH: loop header
LB: loop body
LE: loop exit
PB: predicated region body
PF: predicated region fallthrough
CT: control target
= control target key end

     0   :  { %s1070_s21 = smov 0   ;;  %s1256_s0 = inlined_call_operand.vmem [shape: bf16[512,128], index: 0, kind: input, shape index: {}]   ;;  %s1257_s1 = inlined_call_operand.vmem [shape: bf16[128,128], index: 1, kind: input, shape index: {}]   ;;  %s1258_s2 = inlined_call_operand.vmem [shape: f32[1,128], index: 2, kind: input, shape index: {}]   ;;  %s1259_s3 = inlined_call_operand.vmem [shape: f32[1,128], index: 3, kind: input, shape index: {}]   ;;  %s1260_s4 = inlined_call_operand.vmem [shape: f32[512,128], index: 4, kind: output, shape index: {0}]   ;;  %s1261_s5 = inlined_call_operand.vmem [shape: f32[2,1,128], index: 5, kind: output, shape index: {1}]   ;;  %s1262_s6 = inlined_call_operand.vmem [shape: f32[2,1,128], index: 6, kind: output, shape index: {2}]  }
   0x1 LB: > { %s1076_s2 = sadd.s32 4294967295, %s1033_s21   ;;  %p876_p0 = scmp.ge.s32.totalorder %s1033_s21, 1  ;;  %s1033_s21 = sphi %s1070_s21, %s17_s21  }
   0x2   : > { %p218_p1 = scmp.lt.s32.totalorder %s1033_s21, 3 }
   0x4   : > { %p219_p2 = pnand %p876_p0, %p218_p1 }
   0x5   : > { %v1003_v0 = vld [vmem:[%s1257_s1] sm:$0xff] (!%p219_p2)   ;;  %s877_s23 = sshll.u32 (!%p219_p2), %s1076_s2, 5  ;;  %v1004_v1 = vld [vmem:[%s1257_s1 + $0x8] sm:$0xff] (!%p219_p2)   ;;  %v1005_v2 = vld [vmem:[%s1257_s1 + $0x10] sm:$0xff] (!%p219_p2)   ;;  %p266_p4 = scmp.lt.s32.totalorder (!%p219_p2), %s1076_s2, 1 }
   0x6   : > { %222 = sbr.rel (%p219_p2) target bundleno = 330 (0x14a), region = 36  ;;  %p255_p3 = scmp.lt.s32.totalorder (!%p219_p2), %s877_s23, 63  ;;  %931 = vmatprep.subr.bf16.mxu0 (!%p219_p2), %v1003_v0  ;;  %979 = vmatprep.subr.bf16.mxu1 (!%p219_p2), %v1003_v0  ;;  %v1006_v3 = vld [vmem:[%s1257_s1 + $0x18] sm:$0xff] (!%p219_p2)   ;;  %v1007_v5 = vld [vmem:[%s1257_s1 + $0x20] sm:$0xff] (!%p219_p2)   ;;  %v1008_v6 = vld [vmem:[%s1257_s1 + $0x28] sm:$0xff] (!%p219_p2)  }
   0x7   : > { %932 = vmatpush3.bf16.msra.mxu0 (!%p219_p2), %v1003_v0  ;;  %987 = vmatpush3.bf16.msra.mxu1 (!%p219_p2), %v1003_v0  ;;  %v1009_v8 = vld [vmem:[%s1257_s1 + $0x30] sm:$0xff] (!%p219_p2)   ;;  %v1010_v9 = vld [vmem:[%s1257_s1 + $0x38] sm:$0xff] (!%p219_p2)  }
   0x8   : > { %933 = vmatprep.subr.bf16.mxu0 (!%p219_p2), %v1004_v1  ;;  %980 = vmatprep.subr.bf16.mxu1 (!%p219_p2), %v1004_v1 }
   0xb   : > { %934 = vmatpush3.bf16.msra.mxu0 (!%p219_p2), %v1004_v1  ;;  %988 = vmatpush3.bf16.msra.mxu1 (!%p219_p2), %v1004_v1 }
   0xc   : > { %935 = vmatprep.subr.bf16.mxu0 (!%p219_p2), %v1005_v2  ;;  %981 = vmatprep.subr.bf16.mxu1 (!%p219_p2), %v1005_v2 }
   0xd   : > { %s1264_s23 = smov (!%p255_p3, %s877_s23), 63  ;;  %s1266_s2 = smov (!%p266_p4, %s1076_s2), 1 }
   0xe   : > { %s878_s28 = sshll.u32 %s1264_s23, 2  ;;  %s880_s18 = sshll.u32 %s1264_s23, 3 }
   0xf   : > { %s1096_s7 = scalar_lea.vmem %s1256_s0, %s878_s28  ;;  %936 = vmatpush3.bf16.msra.mxu0 %v1005_v2  ;;  %989 = vmatpush3.bf16.msra.mxu1 %v1005_v2  ;;  %s1133_s3 = scalar_lea.vmem %s1260_s4, %s880_s18 }
  0x10   : > { %v1011_v4 = vld [vmem:[%s1096_s7] sm:$0xff]   ;;  %937 = vmatprep.subr.bf16.mxu0 %v1006_v3  ;;  %982 = vmatprep.subr.bf16.mxu1 %v1006_v3  ;;  %v1012_v10 = vld [vmem:[%s1096_s7 + $0x8] sm:$0xff]   ;;  %v1013_v12 = vld [vmem:[%s1096_s7 + $0x10] sm:$0xff]   ;;  %s268_s24 = scalar_lea.vmem %s1261_s5, %s1266_s2  ;;  %s271_s27 = scalar_lea.vmem %s1262_s6, %s1266_s2 }
  0x11   : > { %947 = vmatprep.mubr.bf16.mxu0 %v1011_v4  ;;  %v1019_v7 = vld [vmem:[%s1096_s7 + $0x40] sm:$0xff]   ;;  %v1020_v11 = vld [vmem:[%s1096_s7 + $0x48] sm:$0xff]   ;;  %v1021_v13 = vld [vmem:[%s1096_s7 + $0x50] sm:$0xff]  }
  0x12   : > { %963 = vmatprep.mubr.bf16.mxu1 %v1019_v7  ;;  %v1014_v14 = vld [vmem:[%s1096_s7 + $0x18] sm:$0xff]   ;;  %v1015_v16 = vld [vmem:[%s1096_s7 + $0x20] sm:$0xff]   ;;  %v1016_v18 = vld [vmem:[%s1096_s7 + $0x28] sm:$0xff]  }
  0x13   : > { %938 = vmatpush3.bf16.msra.mxu0 %v1006_v3  ;;  %990 = vmatpush3.bf16.msra.mxu1 %v1006_v3  ;;  %v1022_v15 = vld [vmem:[%s1096_s7 + $0x58] sm:$0xff]   ;;  %v1023_v17 = vld [vmem:[%s1096_s7 + $0x60] sm:$0xff]   ;;  %v1024_v19 = vld [vmem:[%s1096_s7 + $0x68] sm:$0xff]  }
  0x14   : > { %939 = vmatprep.subr.bf16.mxu0 %v1007_v5  ;;  %983 = vmatprep.subr.bf16.mxu1 %v1007_v5  ;;  %v1017_v20 = vld [vmem:[%s1096_s7 + $0x30] sm:$0xff]   ;;  %v1018_v22 = vld [vmem:[%s1096_s7 + $0x38] sm:$0xff]  }
  0x15   : > { %v1025_v21 = vld [vmem:[%s1096_s7 + $0x70] sm:$0xff]   ;;  %v1026_v23 = vld [vmem:[%s1096_s7 + $0x78] sm:$0xff]  }
  0x17   : > { %940 = vmatpush3.bf16.msra.mxu0 %v1007_v5  ;;  %991 = vmatpush3.bf16.msra.mxu1 %v1007_v5 }
  0x18   : > { %941 = vmatprep.subr.bf16.mxu0 %v1008_v6  ;;  %984 = vmatprep.subr.bf16.mxu1 %v1008_v6 }
  0x1b   : > { %942 = vmatpush3.bf16.msra.mxu0 %v1008_v6  ;;  %992 = vmatpush3.bf16.msra.mxu1 %v1008_v6 }
  0x1c   : > { %943 = vmatprep.subr.bf16.mxu0 %v1009_v8  ;;  %985 = vmatprep.subr.bf16.mxu1 %v1009_v8 }
  0x1f   : > { %944 = vmatpush3.bf16.msra.mxu0 %v1009_v8  ;;  %993 = vmatpush3.bf16.msra.mxu1 %v1009_v8 }
  0x20   : > { %945 = vmatprep.subr.bf16.mxu0 %v1010_v9  ;;  %986 = vmatprep.subr.bf16.mxu1 %v1010_v9 }
  0x23   : > { %946 = vmatpush3.bf16.msra.mxu0 %v1010_v9  ;;  %994 = vmatpush3.bf16.msra.mxu1 %v1010_v9 }
  0x26   : > { %948 = vmatmul.mubr.bf16.vlgmr.msra.gmra.mrb[0].mxu0 %v1012_v10  ;;  %964 = vmatmul.mubr.bf16.vlgmr.msra.gmra.mrb[0].mxu1 %v1020_v11 }
  0x27   : > { %951 = vmatprep.mubr.bf16.mxu0 %v1013_v12  ;;  %967 = vmatprep.mubr.bf16.mxu1 %v1021_v13 }
  0x2e   : > { %952 = vmatmul.mubr.bf16.gmra.mrb[4].mxu0 %v1014_v14  ;;  %968 = vmatmul.mubr.bf16.gmra.mrb[4].mxu1 %v1022_v15 }
  0x2f   : > { %955 = vmatprep.mubr.bf16.mxu0 %v1015_v16  ;;  %971 = vmatprep.mubr.bf16.mxu1 %v1023_v17 }
  0x36   : > { %956 = vmatmul.mubr.bf16.gmra.mrb[8].mxu0 %v1016_v18  ;;  %972 = vmatmul.mubr.bf16.gmra.mrb[8].mxu1 %v1024_v19 }
  0x37   : > { %959 = vmatprep.mubr.bf16.mxu0 %v1017_v20  ;;  %975 = vmatprep.mubr.bf16.mxu1 %v1025_v21 }
  0x3e   : > { %960 = vmatmul.mubr.bf16.gmra.mrb[12].mxu0 %v1018_v22  ;;  %976 = vmatmul.mubr.bf16.gmra.mrb[12].mxu1 %v1026_v23 }
  0xf9   : > { %v949_v24 = vpop.f32.mrb[0].mxu0  ;;  %v1135_v25 = vpop.f32.mrb[0].mxu1 }
  0xfa   : > { %628 = vst [vmem:[%s1133_s3 + $0x10] sm:$0xff] %v949_v24  ;;  %v499_v26 = vpop.f32.mrb[1].mxu0  ;;  %644 = vst [vmem:[%s1133_s3 + $0x90] sm:$0xff] %v1135_v25  ;;  %v1140_v27 = vpop.f32.mrb[1].mxu1  ;;  %v698_v35 = vmul.f32 %v949_v24, %v949_v24 }
  0xfb   : > { %626 = vst [vmem:[%s1133_s3] sm:$0xff] %v499_v26  ;;  %v950_v28 = vpop.f32.mrb[2].mxu0  ;;  %642 = vst [vmem:[%s1133_s3 + $0x80] sm:$0xff] %v1140_v27  ;;  %v1145_v29 = vpop.f32.mrb[2].mxu1  ;;  %v696_v32 = vmul.f32 %v499_v26, %v499_v26 }
  0xfc   : > { %629 = vst [vmem:[%s1133_s3 + $0x18] sm:$0xff] %v950_v28  ;;  %v502_v30 = vpop.f32.mrb[3].mxu0  ;;  %645 = vst [vmem:[%s1133_s3 + $0x98] sm:$0xff] %v1145_v29  ;;  %v1150_v31 = vpop.f32.mrb[3].mxu1  ;;  %v699_v38 = vmul.f32 %v950_v28, %v950_v28 }
  0xfd   : > { %627 = vst [vmem:[%s1133_s3 + $0x8] sm:$0xff] %v502_v30  ;;  %v658_v33 = vadd.f32 %v502_v30, %v499_v26  ;;  %v697_v34 = vmul.f32 %v502_v30, %v502_v30  ;;  %643 = vst [vmem:[%s1133_s3 + $0x88] sm:$0xff] %v1150_v31 }
  0xff   : > { %v659_v36 = vadd.f32 %v949_v24, %v658_v33  ;;  %v728_v37 = vadd.f32 %v697_v34, %v696_v32 }
 0x101   : > { %v729_v39 = vadd.f32 %v728_v37, %v698_v35  ;;  %v953_v40 = vpop.f32.mrb[4].mxu0  ;;  %v660_v41 = vadd.f32 %v950_v28, %v659_v36  ;;  %v1155_v42 = vpop.f32.mrb[4].mxu1 }
 0x102   : > { %632 = vst [vmem:[%s1133_s3 + $0x30] sm:$0xff] %v953_v40  ;;  %v515_v43 = vpop.f32.mrb[5].mxu0  ;;  %648 = vst [vmem:[%s1133_s3 + $0xb0] sm:$0xff] %v1155_v42  ;;  %v1160_v44 = vpop.f32.mrb[5].mxu1  ;;  %v702_v55 = vmul.f32 %v953_v40, %v953_v40 }
 0x103   : > { %630 = vst [vmem:[%s1133_s3 + $0x20] sm:$0xff] %v515_v43  ;;  %v661_v45 = vadd.f32 %v660_v41, %v515_v43  ;;  %v700_v46 = vmul.f32 %v515_v43, %v515_v43  ;;  %v730_v47 = vadd.f32 %v729_v39, %v699_v38  ;;  %v954_v48 = vpop.f32.mrb[6].mxu0  ;;  %646 = vst [vmem:[%s1133_s3 + $0xa0] sm:$0xff] %v1160_v44  ;;  %v1165_v49 = vpop.f32.mrb[6].mxu1 }
 0x104   : > { %633 = vst [vmem:[%s1133_s3 + $0x38] sm:$0xff] %v954_v48  ;;  %v518_v50 = vpop.f32.mrb[7].mxu0  ;;  %649 = vst [vmem:[%s1133_s3 + $0xb8] sm:$0xff] %v1165_v49  ;;  %v1170_v51 = vpop.f32.mrb[7].mxu1  ;;  %v703_v58 = vmul.f32 %v954_v48, %v954_v48  ;;  %v712_v41 = vmul.f32 %v1140_v27, %v1140_v27 }
 0x105   : > { %v731_v52 = vadd.f32 %v730_v47, %v700_v46  ;;  %631 = vst [vmem:[%s1133_s3 + $0x28] sm:$0xff] %v518_v50  ;;  %v662_v53 = vadd.f32 %v661_v45, %v518_v50  ;;  %v701_v54 = vmul.f32 %v518_v50, %v518_v50  ;;  %647 = vst [vmem:[%s1133_s3 + $0xa8] sm:$0xff] %v1170_v51 }
 0x106   : > { %v714_v50 = vmul.f32 %v1135_v25, %v1135_v25 }
 0x107   : > { %v663_v56 = vadd.f32 %v953_v40, %v662_v53  ;;  %v732_v57 = vadd.f32 %v731_v52, %v701_v54  ;;  %v715_v54 = vmul.f32 %v1145_v29, %v1145_v29 }
 0x109   : > { %v733_v59 = vadd.f32 %v732_v57, %v702_v55  ;;  %v957_v60 = vpop.f32.mrb[8].mxu0  ;;  %v664_v61 = vadd.f32 %v954_v48, %v663_v56  ;;  %v1175_v62 = vpop.f32.mrb[8].mxu1  ;;  %v713_v48 = vmul.f32 %v1150_v31, %v1150_v31 }
 0x10a   : > { %636 = vst [vmem:[%s1133_s3 + $0x50] sm:$0xff] %v957_v60  ;;  %v531_v63 = vpop.f32.mrb[9].mxu0  ;;  %652 = vst [vmem:[%s1133_s3 + $0xd0] sm:$0xff] %v1175_v62  ;;  %v1180_v0 = vpop.f32.mrb[9].mxu1  ;;  %v706_v11 = vmul.f32 %v957_v60, %v957_v60 }
 0x10b   : > { %634 = vst [vmem:[%s1133_s3 + $0x40] sm:$0xff] %v531_v63  ;;  %v665_v1 = vadd.f32 %v664_v61, %v531_v63  ;;  %v704_v2 = vmul.f32 %v531_v63, %v531_v63  ;;  %v734_v3 = vadd.f32 %v733_v59, %v703_v58  ;;  %v958_v4 = vpop.f32.mrb[10].mxu0  ;;  %650 = vst [vmem:[%s1133_s3 + $0xc0] sm:$0xff] %v1180_v0  ;;  %v1185_v5 = vpop.f32.mrb[10].mxu1 }
 0x10c   : > { %637 = vst [vmem:[%s1133_s3 + $0x58] sm:$0xff] %v958_v4  ;;  %v534_v6 = vpop.f32.mrb[11].mxu0  ;;  %653 = vst [vmem:[%s1133_s3 + $0xd8] sm:$0xff] %v1185_v5  ;;  %v1190_v7 = vpop.f32.mrb[11].mxu1  ;;  %v707_v14 = vmul.f32 %v958_v4, %v958_v4 }
 0x10d   : > { %v735_v8 = vadd.f32 %v734_v3, %v704_v2  ;;  %635 = vst [vmem:[%s1133_s3 + $0x48] sm:$0xff] %v534_v6  ;;  %v666_v9 = vadd.f32 %v665_v1, %v534_v6  ;;  %v705_v10 = vmul.f32 %v534_v6, %v534_v6  ;;  %651 = vst [vmem:[%s1133_s3 + $0xc8] sm:$0xff] %v1190_v7 }
 0x10f   : > { %v667_v12 = vadd.f32 %v957_v60, %v666_v9  ;;  %v736_v13 = vadd.f32 %v735_v8, %v705_v10  ;;  %v717_v60 = vmul.f32 %v1170_v51, %v1170_v51  ;;  %v721_v8 = vmul.f32 %v1190_v7, %v1190_v7 }
 0x111   : > { %v737_v15 = vadd.f32 %v736_v13, %v706_v11  ;;  %v961_v16 = vpop.f32.mrb[12].mxu0  ;;  %v668_v17 = vadd.f32 %v958_v4, %v667_v12  ;;  %v1195_v18 = vpop.f32.mrb[12].mxu1 }
 0x112   : > { %640 = vst [vmem:[%s1133_s3 + $0x70] sm:$0xff] %v961_v16  ;;  %v547_v19 = vpop.f32.mrb[13].mxu0  ;;  %656 = vst [vmem:[%s1133_s3 + $0xf0] sm:$0xff] %v1195_v18  ;;  %v611_v20 = vpop.f32.mrb[13].mxu1  ;;  %v710_v35 = vmul.f32 %v961_v16, %v961_v16 }
 0x113   : > { %638 = vst [vmem:[%s1133_s3 + $0x60] sm:$0xff] %v547_v19  ;;  %v669_v21 = vadd.f32 %v668_v17, %v547_v19  ;;  %v708_v22 = vmul.f32 %v547_v19, %v547_v19  ;;  %v738_v23 = vadd.f32 %v737_v15, %v707_v14  ;;  %v962_v24 = vpop.f32.mrb[14].mxu0  ;;  %654 = vst [vmem:[%s1133_s3 + $0xe0] sm:$0xff] %v611_v20  ;;  %v978_v26 = vpop.f32.mrb[14].mxu1 }
 0x114   : > { %641 = vst [vmem:[%s1133_s3 + $0x78] sm:$0xff] %v962_v24  ;;  %v550_v28 = vpop.f32.mrb[15].mxu0  ;;  %657 = vst [vmem:[%s1133_s3 + $0xf8] sm:$0xff] %v978_v26  ;;  %v614_v30 = vpop.f32.mrb[15].mxu1  ;;  %v711_v38 = vmul.f32 %v962_v24, %v962_v24  ;;  %v724_v12 = vmul.f32 %v611_v20, %v611_v20  ;;  %v726_v17 = vmul.f32 %v1195_v18, %v1195_v18 }
 0x115   : > { %v739_v32 = vadd.f32 %v738_v23, %v708_v22  ;;  %639 = vst [vmem:[%s1133_s3 + $0x68] sm:$0xff] %v550_v28  ;;  %v670_v33 = vadd.f32 %v669_v21, %v550_v28  ;;  %v709_v34 = vmul.f32 %v550_v28, %v550_v28  ;;  %655 = vst [vmem:[%s1133_s3 + $0xe8] sm:$0xff] %v614_v30 }
 0x116   : > { %v727_v21 = vmul.f32 %v978_v26, %v978_v26 }
 0x117   : > { %v671_v36 = vadd.f32 %v961_v16, %v670_v33  ;;  %v740_v37 = vadd.f32 %v739_v32, %v709_v34 }
 0x119   : > { %v741_v39 = vadd.f32 %v740_v37, %v710_v35  ;;  %v672_v40 = vadd.f32 %v962_v24, %v671_v36 }
 0x11b   : > { %v673_v43 = vadd.f32 %v672_v40, %v1140_v27  ;;  %v742_v45 = vadd.f32 %v741_v39, %v711_v38  ;;  %v716_v27 = vmul.f32 %v1160_v44, %v1160_v44 }
 0x11d   : > { %v743_v46 = vadd.f32 %v742_v45, %v712_v41  ;;  %v674_v47 = vadd.f32 %v673_v43, %v1150_v31 }
 0x11f   : > { %v675_v52 = vadd.f32 %v1135_v25, %v674_v47  ;;  %v744_v53 = vadd.f32 %v743_v46, %v713_v48  ;;  %v718_v25 = vmul.f32 %v1155_v42, %v1155_v42 }
 0x121   : > { %v745_v55 = vadd.f32 %v744_v53, %v714_v50  ;;  %v676_v56 = vadd.f32 %v1145_v29, %v675_v52  ;;  %v719_v29 = vmul.f32 %v1165_v49, %v1165_v49 }
 0x123   : > { %v677_v57 = vadd.f32 %v676_v56, %v1160_v44  ;;  %v746_v58 = vadd.f32 %v745_v55, %v715_v54  ;;  %v720_v44 = vmul.f32 %v1180_v0, %v1180_v0 }
 0x125   : > { %v747_v59 = vadd.f32 %v746_v58, %v716_v27  ;;  %v678_v31 = vadd.f32 %v677_v57, %v1170_v51 }
 0x127   : > { %v679_v61 = vadd.f32 %v1155_v42, %v678_v31  ;;  %v748_v63 = vadd.f32 %v747_v59, %v717_v60  ;;  %v722_v42 = vmul.f32 %v1175_v62, %v1175_v62 }
 0x129   : > { %v749_v1 = vadd.f32 %v748_v63, %v718_v25  ;;  %v680_v2 = vadd.f32 %v1165_v49, %v679_v61  ;;  %v723_v49 = vmul.f32 %v1185_v5, %v1185_v5 }
 0x12b   : > { %v681_v3 = vadd.f32 %v680_v2, %v1180_v0  ;;  %v750_v4 = vadd.f32 %v749_v1, %v719_v29 }
 0x12d   : > { %v751_v6 = vadd.f32 %v750_v4, %v720_v44  ;;  %v682_v51 = vadd.f32 %v681_v3, %v1190_v7  ;;  %v725_v7 = vmul.f32 %v614_v30, %v614_v30 }
 0x12f   : > { %v683_v9 = vadd.f32 %v1175_v62, %v682_v51  ;;  %v752_v10 = vadd.f32 %v751_v6, %v721_v8 }
 0x131   : > { %v753_v11 = vadd.f32 %v752_v10, %v722_v42  ;;  %v684_v0 = vadd.f32 %v1185_v5, %v683_v9 }
 0x133   : > { %v685_v13 = vadd.f32 %v684_v0, %v611_v20  ;;  %v754_v14 = vadd.f32 %v753_v11, %v723_v49 }
 0x135   : > { %v755_v15 = vadd.f32 %v754_v14, %v724_v12  ;;  %v686_v16 = vadd.f32 %v685_v13, %v614_v30 }
 0x137   : > { %v687_v62 = vadd.f32 %v1195_v18, %v686_v16  ;;  %v756_v19 = vadd.f32 %v755_v15, %v725_v7 }
 0x139   : > { %v688_v22 = vadd.f32 %v978_v26, %v687_v62  ;;  %v757_v23 = vadd.f32 %v756_v19, %v726_v17 }
 0x13b   : > { %v689_v24 = vrot.slane %v688_v22, 4  ;;  %v758_v28 = vadd.f32 %v757_v23, %v727_v21 }
 0x13d   : > { %v690_v5 = vadd.f32 %v689_v24, %v688_v22  ;;  %v759_v32 = vrot.slane %v758_v28, 4 }
 0x13f   : > { %v691_v20 = vrot.slane %v690_v5, 2  ;;  %v760_v33 = vadd.f32 %v759_v32, %v758_v28 }
 0x141   : > { %v692_v34 = vadd.f32 %v691_v20, %v690_v5  ;;  %v761_v35 = vrot.slane %v760_v33, 2 }
 0x143   : > { %v693_v30 = vrot.slane %v692_v34, 1  ;;  %v762_v36 = vadd.f32 %v761_v35, %v760_v33 }
 0x145   : > { %v694_v18 = vadd.f32 %v693_v30, %v692_v34  ;;  %v763_v37 = vrot.slane %v762_v36, 1 }
 0x147   : > { %695 = vst [vmem:[%s268_s24] sm:$0x1] %v694_v18  ;;  %v764_v26 = vadd.f32 %v763_v37, %v762_v36 }
 0x149   : > { %765 = vst [vmem:[%s271_s27] sm:$0x1] %v764_v26 }
 0x14a PF: > { %s17_s21 = sadd.s32 1, %s1033_s21  }
 0x14b   : > { %p14_p5 = scmp.ge.s32.totalorder %s17_s21, 4  }
 0x14d   :  { %16 = sbr.rel (!%p14_p5) target bundleno = 1 (0x1), region = 90 }

// kernel: bottleneck_forward.7
= control target key start
LH: loop header
LB: loop body
LE: loop exit
PB: predicated region body
PF: predicated region fallthrough
CT: control target
= control target key end

     0   :  { %s1070_s21 = smov 0   ;;  %s1369_s0 = inlined_call_operand.vmem [shape: f32[512,128], index: 0, kind: input, shape index: {}]   ;;  %s1370_s1 = inlined_call_operand.vmem [shape: bf16[128,128], index: 1, kind: input, shape index: {}]   ;;  %s1371_s2 = inlined_call_operand.vmem [shape: f32[1,128], index: 2, kind: input, shape index: {}]   ;;  %s1372_s3 = inlined_call_operand.vmem [shape: f32[1,128], index: 3, kind: input, shape index: {}]   ;;  %s1373_s4 = inlined_call_operand.vmem [shape: f32[512,128], index: 4, kind: output, shape index: {0}]   ;;  %s1374_s5 = inlined_call_operand.vmem [shape: f32[2,1,128], index: 5, kind: output, shape index: {1}]   ;;  %s1375_s6 = inlined_call_operand.vmem [shape: f32[2,1,128], index: 6, kind: output, shape index: {2}]  }
   0x1 LB: > { %s1076_s22 = sadd.s32 4294967295, %s1033_s21   ;;  %p906_p0 = scmp.ge.s32.totalorder %s1033_s21, 1  ;;  %s1033_s21 = sphi %s1070_s21, %s17_s21  }
   0x2   : > { %p218_p1 = scmp.lt.s32.totalorder %s1033_s21, 3 }
   0x4   : > { %p219_p2 = pnand %p906_p0, %p218_p1 }
   0x5   : > { %v1019_v0 = vld [vmem:[%s1370_s1] sm:$0xff] (!%p219_p2)   ;;  %s907_s25 = sshll.u32 (!%p219_p2), %s1076_s22, 5  ;;  %v1020_v1 = vld [vmem:[%s1370_s1 + $0x8] sm:$0xff] (!%p219_p2)   ;;  %v1021_v2 = vld [vmem:[%s1370_s1 + $0x10] sm:$0xff] (!%p219_p2)   ;;  %p266_p4 = scmp.lt.s32.totalorder (!%p219_p2), %s1076_s22, 1 }
   0x6   : > { %222 = sbr.rel (%p219_p2) target bundleno = 330 (0x14a), region = 36  ;;  %p255_p3 = scmp.lt.s32.totalorder (!%p219_p2), %s907_s25, 63  ;;  %947 = vmatprep.subr.bf16.mxu0 (!%p219_p2), %v1019_v0  ;;  %995 = vmatprep.subr.bf16.mxu1 (!%p219_p2), %v1019_v0  ;;  %v1022_v3 = vld [vmem:[%s1370_s1 + $0x18] sm:$0xff] (!%p219_p2)   ;;  %v1108_v6 = vld [vmem:[%s1371_s2] ss:$0 sm:$0xff] (!%p219_p2)  ;;  %v1024_v27 = vld [vmem:[%s1370_s1 + $0x28] sm:$0xff] (!%p219_p2)  }
   0x7   : > { %948 = vmatpush3.bf16.msra.mxu0 (!%p219_p2), %v1019_v0  ;;  %1003 = vmatpush3.bf16.msra.mxu1 (!%p219_p2), %v1019_v0  ;;  %v1115_v9 = vld [vmem:[%s1372_s3] ss:$0 sm:$0xff] (!%p219_p2)  ;;  %v1025_v35 = vld [vmem:[%s1370_s1 + $0x30] sm:$0xff] (!%p219_p2)   ;;  %v1026_v52 = vld [vmem:[%s1370_s1 + $0x38] sm:$0xff] (!%p219_p2)  }
   0x8   : > { %949 = vmatprep.subr.bf16.mxu0 (!%p219_p2), %v1020_v1  ;;  %996 = vmatprep.subr.bf16.mxu1 (!%p219_p2), %v1020_v1  ;;  %v1023_v17 = vld [vmem:[%s1370_s1 + $0x20] sm:$0xff] (!%p219_p2)  }
   0xb   : > { %950 = vmatpush3.bf16.msra.mxu0 (!%p219_p2), %v1020_v1  ;;  %1004 = vmatpush3.bf16.msra.mxu1 (!%p219_p2), %v1020_v1 }
   0xc   : > { %951 = vmatprep.subr.bf16.mxu0 (!%p219_p2), %v1021_v2  ;;  %997 = vmatprep.subr.bf16.mxu1 (!%p219_p2), %v1021_v2 }
   0xd   : > { %s1377_s25 = smov (!%p255_p3, %s907_s25), 63  ;;  %s1379_s22 = smov (!%p266_p4, %s1076_s22), 1 }
   0xe   : > { %s908_s30 = sshll.u32 %s1377_s25, 3  ;;  %s268_s7 = scalar_lea.vmem %s1374_s5, %s1379_s22 }
   0xf   : > { %s1098_s9 = scalar_lea.vmem %s1369_s0, %s908_s30  ;;  %952 = vmatpush3.bf16.msra.mxu0 %v1021_v2  ;;  %1005 = vmatpush3.bf16.msra.mxu1 %v1021_v2  ;;  %s1246_s29 = scalar_lea.vmem %s1373_s4, %s908_s30 }
  0x10   : > { %v273_v4 = vld [vmem:[%s1098_s9] sm:$0xff]  ;;  %v274_v5 = vld [vmem:[%s1098_s9 + $0x8] sm:$0xff]  ;;  %v275_v10 = vld [vmem:[%s1098_s9 + $0x10] sm:$0xff]  ;;  %953 = vmatprep.subr.bf16.mxu0 %v1022_v3  ;;  %998 = vmatprep.subr.bf16.mxu1 %v1022_v3  ;;  %s271_s10 = scalar_lea.vmem %s1375_s6, %s1379_s22 }
  0x11   : > { %v312_v7 = vmul.f32 %v1108_v6, %v273_v4  ;;  %v313_v8 = vmul.f32 %v1108_v6, %v274_v5  ;;  %v276_v11 = vld [vmem:[%s1098_s9 + $0x18] sm:$0xff]  ;;  %v314_v12 = vmul.f32 %v1108_v6, %v275_v10  ;;  %v277_v16 = vld [vmem:[%s1098_s9 + $0x20] sm:$0xff]  ;;  %v278_v20 = vld [vmem:[%s1098_s9 + $0x28] sm:$0xff] }
  0x12   : > { %v315_v15 = vmul.f32 %v1108_v6, %v276_v11  ;;  %v316_v21 = vmul.f32 %v1108_v6, %v277_v16  ;;  %v279_v22 = vld [vmem:[%s1098_s9 + $0x30] sm:$0xff]  ;;  %v280_v26 = vld [vmem:[%s1098_s9 + $0x38] sm:$0xff]  ;;  %v317_v28 = vmul.f32 %v1108_v6, %v278_v20  ;;  %v289_v31 = vld [vmem:[%s1098_s9 + $0x80] sm:$0xff] }
  0x13   : > { %v351_v13 = vadd.f32 %v1115_v9, %v312_v7  ;;  %v352_v14 = vadd.f32 %v1115_v9, %v313_v8  ;;  %954 = vmatpush3.bf16.msra.mxu0 %v1022_v3  ;;  %v353_v24 = vadd.f32 %v1115_v9, %v314_v12  ;;  %1006 = vmatpush3.bf16.msra.mxu1 %v1022_v3  ;;  %v281_v37 = vld [vmem:[%s1098_s9 + $0x40] sm:$0xff]  ;;  %v290_v38 = vld [vmem:[%s1098_s9 + $0x88] sm:$0xff]  ;;  %v291_v42 = vld [vmem:[%s1098_s9 + $0x90] sm:$0xff] }
  0x14   : > { %v354_v25 = vadd.f32 %v1115_v9, %v315_v15  ;;  %955 = vmatprep.subr.bf16.mxu0 %v1023_v17  ;;  %999 = vmatprep.subr.bf16.mxu1 %v1023_v17  ;;  %v318_v29 = vmul.f32 %v1108_v6, %v279_v22  ;;  %v319_v30 = vmul.f32 %v1108_v6, %v280_v26  ;;  %v282_v40 = vld [vmem:[%s1098_s9 + $0x48] sm:$0xff]  ;;  %v292_v44 = vld [vmem:[%s1098_s9 + $0x98] sm:$0xff]  ;;  %v293_v45 = vld [vmem:[%s1098_s9 + $0xa0] sm:$0xff] }
  0x15   : > { %v383_v18 = vmax.f32 %v351_v13, 0.0  ;;  %v384_v19 = vmax.f32 %v352_v14, 0.0  ;;  %v385_v32 = vmax.f32 %v353_v24, 0.0  ;;  %v1141_v34 = vadd.f32 %v1115_v9, %v316_v21  ;;  %v294_v50 = vld [vmem:[%s1098_s9 + $0xa8] sm:$0xff]  ;;  %v295_v51 = vld [vmem:[%s1098_s9 + $0xb0] sm:$0xff]  ;;  %v296_v61 = vld [vmem:[%s1098_s9 + $0xb8] sm:$0xff] }
  0x16   : > { %v386_v33 = vmax.f32 %v354_v25, 0.0  ;;  %v1147_v36 = vadd.f32 %v1115_v9, %v317_v28  ;;  %v1152_v39 = vadd.f32 %v1115_v9, %v318_v29  ;;  %v328_v41 = vmul.f32 %v1108_v6, %v289_v31  ;;  %v297_v2 = vld [vmem:[%s1098_s9 + $0xc0] sm:$0xff]  ;;  %v298_v8 = vld [vmem:[%s1098_s9 + $0xc8] sm:$0xff]  ;;  %v283_v14 = vld [vmem:[%s1098_s9 + $0x50] sm:$0xff] }
  0x17   : > { %v415_v23 = vpack.c.bf16 %v384_v19, %v383_v18  ;;  %956 = vmatpush3.bf16.msra.mxu0 %v1023_v17  ;;  %1007 = vmatpush3.bf16.msra.mxu1 %v1023_v17  ;;  %v1158_v43 = vadd.f32 %v1115_v9, %v319_v30  ;;  %v387_v47 = vmax.f32 %v1141_v34, 0.0  ;;  %v320_v48 = vmul.f32 %v1108_v6, %v281_v37  ;;  %v284_v15 = vld [vmem:[%s1098_s9 + $0x58] sm:$0xff]  ;;  %v285_v20 = vld [vmem:[%s1098_s9 + $0x60] sm:$0xff]  ;;  %v286_v21 = vld [vmem:[%s1098_s9 + $0x68] sm:$0xff] }
  0x18   : > { %957 = vmatprep.subr.bf16.mxu0 %v1024_v27  ;;  %1000 = vmatprep.subr.bf16.mxu1 %v1024_v27  ;;  %v1162_v46 = vpack.c.bf16 %v386_v33, %v385_v32  ;;  %v329_v49 = vmul.f32 %v1108_v6, %v290_v38  ;;  %v388_v53 = vmax.f32 %v1147_v36, 0.0  ;;  %v321_v54 = vmul.f32 %v1108_v6, %v282_v40  ;;  %v299_v30 = vld [vmem:[%s1098_s9 + $0xd0] sm:$0xff]  ;;  %v300_v31 = vld [vmem:[%s1098_s9 + $0xd8] sm:$0xff]  ;;  %v301_v36 = vld [vmem:[%s1098_s9 + $0xe0] sm:$0xff] }
  0x19   : > { %963 = vmatprep.mubr.bf16.mxu0 %v415_v23  ;;  %v367_v55 = vadd.f32 %v1115_v9, %v328_v41  ;;  %v330_v56 = vmul.f32 %v1108_v6, %v291_v42  ;;  %v389_v57 = vmax.f32 %v1152_v39, 0.0  ;;  %v331_v59 = vmul.f32 %v1108_v6, %v292_v44  ;;  %v302_v37 = vld [vmem:[%s1098_s9 + $0xe8] sm:$0xff] }
  0x1a   : > { %v368_v58 = vadd.f32 %v1115_v9, %v329_v49  ;;  %v332_v60 = vmul.f32 %v1108_v6, %v293_v45  ;;  %v333_v0 = vmul.f32 %v1108_v6, %v294_v50  ;;  %v334_v1 = vmul.f32 %v1108_v6, %v295_v51 }
  0x1b   : > { %958 = vmatpush3.bf16.msra.mxu0 %v1024_v27  ;;  %1008 = vmatpush3.bf16.msra.mxu1 %v1024_v27  ;;  %v399_v62 = vmax.f32 %v367_v55, 0.0  ;;  %v369_v63 = vadd.f32 %v1115_v9, %v330_v56  ;;  %v1186_v3 = vadd.f32 %v1115_v9, %v320_v48  ;;  %v370_v5 = vadd.f32 %v1115_v9, %v331_v59  ;;  %v287_v56 = vld [vmem:[%s1098_s9 + $0x70] sm:$0xff] }
  0x1c   : > { %959 = vmatprep.subr.bf16.mxu0 %v1025_v35  ;;  %1001 = vmatprep.subr.bf16.mxu1 %v1025_v35  ;;  %v400_v4 = vmax.f32 %v368_v58, 0.0  ;;  %v371_v7 = vadd.f32 %v1115_v9, %v332_v60  ;;  %v360_v10 = vadd.f32 %v1115_v9, %v321_v54  ;;  %v372_v12 = vadd.f32 %v1115_v9, %v333_v0  ;;  %v288_v58 = vld [vmem:[%s1098_s9 + $0x78] sm:$0xff]  ;;  %v303_v0 = vld [vmem:[%s1098_s9 + $0xf0] sm:$0xff] }
  0x1d   : > { %v401_v11 = vmax.f32 %v369_v63, 0.0  ;;  %v335_v13 = vmul.f32 %v1108_v6, %v296_v61  ;;  %v402_v17 = vmax.f32 %v370_v5, 0.0  ;;  %v336_v19 = vmul.f32 %v1108_v6, %v297_v2 }
  0x1e   : > { %v423_v16 = vpack.c.bf16 %v400_v4, %v399_v62  ;;  %v403_v18 = vmax.f32 %v371_v7, 0.0  ;;  %v404_v22 = vmax.f32 %v372_v12, 0.0  ;;  %v373_v23 = vadd.f32 %v1115_v9, %v334_v1  ;;  %v304_v1 = vld [vmem:[%s1098_s9 + $0xf8] sm:$0xff] }
  0x1f   : > { %960 = vmatpush3.bf16.msra.mxu0 %v1025_v35  ;;  %1009 = vmatpush3.bf16.msra.mxu1 %v1025_v35  ;;  %v374_v24 = vadd.f32 %v1115_v9, %v335_v13  ;;  %v337_v25 = vmul.f32 %v1108_v6, %v298_v8  ;;  %v417_v26 = vpack.c.bf16 %v388_v53, %v387_v47  ;;  %v390_v27 = vmax.f32 %v1158_v43, 0.0 }
  0x20   : > { %961 = vmatprep.subr.bf16.mxu0 %v1026_v52  ;;  %1002 = vmatprep.subr.bf16.mxu1 %v1026_v52  ;;  %v424_v28 = vpack.c.bf16 %v402_v17, %v401_v11  ;;  %v375_v29 = vadd.f32 %v1115_v9, %v336_v19  ;;  %v322_v32 = vmul.f32 %v1108_v6, %v283_v14  ;;  %v391_v38 = vmax.f32 %v1186_v3, 0.0 }
  0x21   : > { %v323_v33 = vmul.f32 %v1108_v6, %v284_v15  ;;  %979 = vmatprep.mubr.bf16.mxu1 %v423_v16  ;;  %v425_v34 = vpack.c.bf16 %v404_v22, %v403_v18  ;;  %v376_v35 = vadd.f32 %v1115_v9, %v337_v25  ;;  %v392_v40 = vmax.f32 %v360_v10, 0.0 }
  0x22   : > { %v324_v41 = vmul.f32 %v1108_v6, %v285_v20  ;;  %v325_v42 = vmul.f32 %v1108_v6, %v286_v21  ;;  %v405_v43 = vmax.f32 %v373_v23, 0.0  ;;  %v406_v44 = vmax.f32 %v374_v24, 0.0 }
  0x23   : > { %962 = vmatpush3.bf16.msra.mxu0 %v1026_v52  ;;  %1010 = vmatpush3.bf16.msra.mxu1 %v1026_v52  ;;  %v338_v45 = vmul.f32 %v1108_v6, %v299_v30  ;;  %v339_v47 = vmul.f32 %v1108_v6, %v300_v31  ;;  %v407_v48 = vmax.f32 %v375_v29, 0.0  ;;  %v408_v49 = vmax.f32 %v376_v35, 0.0 }
  0x24   : > { %v340_v50 = vmul.f32 %v1108_v6, %v301_v36  ;;  %v341_v51 = vmul.f32 %v1108_v6, %v302_v37  ;;  %v361_v52 = vadd.f32 %v1115_v9, %v322_v32  ;;  %v362_v53 = vadd.f32 %v1115_v9, %v323_v33 }
  0x25   : > { %v363_v54 = vadd.f32 %v1115_v9, %v324_v41  ;;  %v364_v55 = vadd.f32 %v1115_v9, %v325_v42  ;;  %v426_v59 = vpack.c.bf16 %v406_v44, %v405_v43  ;;  %v377_v60 = vadd.f32 %v1115_v9, %v338_v45 }
  0x26   : > { %964 = vmatmul.mubr.bf16.vlgmr.msra.gmra.mrb[0].mxu0 %v1162_v46  ;;  %980 = vmatmul.mubr.bf16.vlgmr.msra.gmra.mrb[0].mxu1 %v424_v28  ;;  %v418_v46 = vpack.c.bf16 %v390_v27, %v389_v57  ;;  %v378_v61 = vadd.f32 %v1115_v9, %v339_v47  ;;  %v419_v62 = vpack.c.bf16 %v392_v40, %v391_v38  ;;  %v393_v2 = vmax.f32 %v361_v52, 0.0 }
  0x27   : > { %967 = vmatprep.mubr.bf16.mxu0 %v417_v26  ;;  %983 = vmatprep.mubr.bf16.mxu1 %v425_v34  ;;  %v427_v63 = vpack.c.bf16 %v408_v49, %v407_v48  ;;  %v379_v39 = vadd.f32 %v1115_v9, %v340_v50  ;;  %v380_v57 = vadd.f32 %v1115_v9, %v341_v51  ;;  %v394_v3 = vmax.f32 %v362_v53, 0.0 }
  0x28   : > { %v326_v4 = vmul.f32 %v1108_v6, %v287_v56  ;;  %v327_v5 = vmul.f32 %v1108_v6, %v288_v58  ;;  %v409_v7 = vmax.f32 %v377_v60, 0.0  ;;  %v410_v8 = vmax.f32 %v378_v61, 0.0 }
  0x29   : > { %v342_v10 = vmul.f32 %v1108_v6, %v303_v0  ;;  %v343_v11 = vmul.f32 %v1108_v6, %v304_v1  ;;  %v395_v12 = vmax.f32 %v363_v54, 0.0  ;;  %v396_v13 = vmax.f32 %v364_v55, 0.0 }
  0x2a   : > { %v411_v14 = vmax.f32 %v379_v39, 0.0  ;;  %v412_v15 = vmax.f32 %v380_v57, 0.0  ;;  %v420_v16 = vpack.c.bf16 %v394_v3, %v393_v2  ;;  %v365_v17 = vadd.f32 %v1115_v9, %v326_v4 }
  0x2b   : > { %v366_v18 = vadd.f32 %v1115_v9, %v327_v5  ;;  %v428_v19 = vpack.c.bf16 %v410_v8, %v409_v7  ;;  %v381_v20 = vadd.f32 %v1115_v9, %v342_v10  ;;  %v382_v21 = vadd.f32 %v1115_v9, %v343_v11 }
  0x2c   : > { %v421_v22 = vpack.c.bf16 %v396_v13, %v395_v12  ;;  %v429_v23 = vpack.c.bf16 %v412_v15, %v411_v14  ;;  %v397_v6 = vmax.f32 %v365_v17, 0.0 }
  0x2d   : > { %v398_v24 = vmax.f32 %v366_v18, 0.0  ;;  %v413_v25 = vmax.f32 %v381_v20, 0.0  ;;  %v414_v26 = vmax.f32 %v382_v21, 0.0 }
  0x2e   : > { %968 = vmatmul.mubr.bf16.gmra.mrb[4].mxu0 %v418_v46  ;;  %984 = vmatmul.mubr.bf16.gmra.mrb[4].mxu1 %v426_v59 }
  0x2f   : > { %971 = vmatprep.mubr.bf16.mxu0 %v419_v62  ;;  %987 = vmatprep.mubr.bf16.mxu1 %v427_v63  ;;  %v422_v27 = vpack.c.bf16 %v398_v24, %v397_v6  ;;  %v430_v28 = vpack.c.bf16 %v414_v26, %v413_v25 }
  0x36   : > { %972 = vmatmul.mubr.bf16.gmra.mrb[8].mxu0 %v420_v16  ;;  %988 = vmatmul.mubr.bf16.gmra.mrb[8].mxu1 %v428_v19 }
  0x37   : > { %975 = vmatprep.mubr.bf16.mxu0 %v421_v22  ;;  %991 = vmatprep.mubr.bf16.mxu1 %v429_v23 }
  0x3e   : > { %976 = vmatmul.mubr.bf16.gmra.mrb[12].mxu0 %v422_v27  ;;  %992 = vmatmul.mubr.bf16.gmra.mrb[12].mxu1 %v430_v28 }
  0xf9   : > { %v965_v9 = vpop.f32.mrb[0].mxu0  ;;  %v1248_v29 = vpop.f32.mrb[0].mxu1 }
  0xfa   : > { %658 = vst [vmem:[%s1246_s29 + $0x10] sm:$0xff] %v965_v9  ;;  %v529_v30 = vpop.f32.mrb[1].mxu0  ;;  %674 = vst [vmem:[%s1246_s29 + $0x90] sm:$0xff] %v1248_v29  ;;  %v1253_v31 = vpop.f32.mrb[1].mxu1  ;;  %v728_v40 = vmul.f32 %v965_v9, %v965_v9 }
  0xfb   : > { %656 = vst [vmem:[%s1246_s29] sm:$0xff] %v529_v30  ;;  %v966_v32 = vpop.f32.mrb[2].mxu0  ;;  %672 = vst [vmem:[%s1246_s29 + $0x80] sm:$0xff] %v1253_v31  ;;  %v1258_v33 = vpop.f32.mrb[2].mxu1  ;;  %v726_v36 = vmul.f32 %v529_v30, %v529_v30 }
  0xfc   : > { %659 = vst [vmem:[%s1246_s29 + $0x18] sm:$0xff] %v966_v32  ;;  %v532_v34 = vpop.f32.mrb[3].mxu0  ;;  %675 = vst [vmem:[%s1246_s29 + $0x98] sm:$0xff] %v1258_v33  ;;  %v1263_v35 = vpop.f32.mrb[3].mxu1  ;;  %v729_v43 = vmul.f32 %v966_v32, %v966_v32 }
  0xfd   : > { %657 = vst [vmem:[%s1246_s29 + $0x8] sm:$0xff] %v532_v34  ;;  %v688_v37 = vadd.f32 %v532_v34, %v529_v30  ;;  %v727_v38 = vmul.f32 %v532_v34, %v532_v34  ;;  %673 = vst [vmem:[%s1246_s29 + $0x88] sm:$0xff] %v1263_v35 }
  0xff   : > { %v689_v41 = vadd.f32 %v965_v9, %v688_v37  ;;  %v758_v42 = vadd.f32 %v727_v38, %v726_v36 }
 0x101   : > { %v759_v44 = vadd.f32 %v758_v42, %v728_v40  ;;  %v969_v45 = vpop.f32.mrb[4].mxu0  ;;  %v690_v47 = vadd.f32 %v966_v32, %v689_v41  ;;  %v1268_v48 = vpop.f32.mrb[4].mxu1 }
 0x102   : > { %662 = vst [vmem:[%s1246_s29 + $0x30] sm:$0xff] %v969_v45  ;;  %v545_v49 = vpop.f32.mrb[5].mxu0  ;;  %678 = vst [vmem:[%s1246_s29 + $0xb0] sm:$0xff] %v1268_v48  ;;  %v1273_v50 = vpop.f32.mrb[5].mxu1  ;;  %v732_v61 = vmul.f32 %v969_v45, %v969_v45 }
 0x103   : > { %660 = vst [vmem:[%s1246_s29 + $0x20] sm:$0xff] %v545_v49  ;;  %v691_v51 = vadd.f32 %v690_v47, %v545_v49  ;;  %v730_v46 = vmul.f32 %v545_v49, %v545_v49  ;;  %v760_v52 = vadd.f32 %v759_v44, %v729_v43  ;;  %v970_v53 = vpop.f32.mrb[6].mxu0  ;;  %676 = vst [vmem:[%s1246_s29 + $0xa0] sm:$0xff] %v1273_v50  ;;  %v1278_v54 = vpop.f32.mrb[6].mxu1 }
 0x104   : > { %663 = vst [vmem:[%s1246_s29 + $0x38] sm:$0xff] %v970_v53  ;;  %v548_v55 = vpop.f32.mrb[7].mxu0  ;;  %679 = vst [vmem:[%s1246_s29 + $0xb8] sm:$0xff] %v1278_v54  ;;  %v1283_v56 = vpop.f32.mrb[7].mxu1  ;;  %v733_v39 = vmul.f32 %v970_v53, %v970_v53  ;;  %v742_v47 = vmul.f32 %v1253_v31, %v1253_v31 }
 0x105   : > { %v761_v58 = vadd.f32 %v760_v52, %v730_v46  ;;  %661 = vst [vmem:[%s1246_s29 + $0x28] sm:$0xff] %v548_v55  ;;  %v692_v59 = vadd.f32 %v691_v51, %v548_v55  ;;  %v731_v60 = vmul.f32 %v548_v55, %v548_v55  ;;  %677 = vst [vmem:[%s1246_s29 + $0xa8] sm:$0xff] %v1283_v56 }
 0x106   : > { %v744_v55 = vmul.f32 %v1248_v29, %v1248_v29 }
 0x107   : > { %v693_v62 = vadd.f32 %v969_v45, %v692_v59  ;;  %v762_v63 = vadd.f32 %v761_v58, %v731_v60  ;;  %v745_v60 = vmul.f32 %v1258_v33, %v1258_v33 }
 0x109   : > { %v763_v57 = vadd.f32 %v762_v63, %v732_v61  ;;  %v973_v0 = vpop.f32.mrb[8].mxu0  ;;  %v694_v1 = vadd.f32 %v970_v53, %v693_v62  ;;  %v1288_v2 = vpop.f32.mrb[8].mxu1  ;;  %v743_v53 = vmul.f32 %v1263_v35, %v1263_v35 }
 0x10a   : > { %666 = vst [vmem:[%s1246_s29 + $0x50] sm:$0xff] %v973_v0  ;;  %v561_v3 = vpop.f32.mrb[9].mxu0  ;;  %682 = vst [vmem:[%s1246_s29 + $0xd0] sm:$0xff] %v1288_v2  ;;  %v1293_v4 = vpop.f32.mrb[9].mxu1  ;;  %v736_v17 = vmul.f32 %v973_v0, %v973_v0 }
 0x10b   : > { %664 = vst [vmem:[%s1246_s29 + $0x40] sm:$0xff] %v561_v3  ;;  %v695_v5 = vadd.f32 %v694_v1, %v561_v3  ;;  %v734_v7 = vmul.f32 %v561_v3, %v561_v3  ;;  %v764_v8 = vadd.f32 %v763_v57, %v733_v39  ;;  %v974_v10 = vpop.f32.mrb[10].mxu0  ;;  %680 = vst [vmem:[%s1246_s29 + $0xc0] sm:$0xff] %v1293_v4  ;;  %v1298_v11 = vpop.f32.mrb[10].mxu1 }
 0x10c   : > { %667 = vst [vmem:[%s1246_s29 + $0x58] sm:$0xff] %v974_v10  ;;  %v564_v12 = vpop.f32.mrb[11].mxu0  ;;  %683 = vst [vmem:[%s1246_s29 + $0xd8] sm:$0xff] %v1298_v11  ;;  %v1303_v13 = vpop.f32.mrb[11].mxu1  ;;  %v737_v20 = vmul.f32 %v974_v10, %v974_v10 }
 0x10d   : > { %v765_v14 = vadd.f32 %v764_v8, %v734_v7  ;;  %665 = vst [vmem:[%s1246_s29 + $0x48] sm:$0xff] %v564_v12  ;;  %v696_v15 = vadd.f32 %v695_v5, %v564_v12  ;;  %v735_v16 = vmul.f32 %v564_v12, %v564_v12  ;;  %681 = vst [vmem:[%s1246_s29 + $0xc8] sm:$0xff] %v1303_v13 }
 0x10f   : > { %v697_v18 = vadd.f32 %v973_v0, %v696_v15  ;;  %v766_v19 = vadd.f32 %v765_v14, %v735_v16  ;;  %v747_v0 = vmul.f32 %v1283_v56, %v1283_v56  ;;  %v751_v14 = vmul.f32 %v1303_v13, %v1303_v13 }
 0x111   : > { %v767_v21 = vadd.f32 %v766_v19, %v736_v17  ;;  %v977_v22 = vpop.f32.mrb[12].mxu0  ;;  %v698_v23 = vadd.f32 %v974_v10, %v697_v18  ;;  %v1308_v6 = vpop.f32.mrb[12].mxu1 }
 0x112   : > { %670 = vst [vmem:[%s1246_s29 + $0x70] sm:$0xff] %v977_v22  ;;  %v577_v24 = vpop.f32.mrb[13].mxu0  ;;  %686 = vst [vmem:[%s1246_s29 + $0xf0] sm:$0xff] %v1308_v6  ;;  %v641_v25 = vpop.f32.mrb[13].mxu1  ;;  %v740_v40 = vmul.f32 %v977_v22, %v977_v22 }
 0x113   : > { %668 = vst [vmem:[%s1246_s29 + $0x60] sm:$0xff] %v577_v24  ;;  %v699_v26 = vadd.f32 %v698_v23, %v577_v24  ;;  %v738_v27 = vmul.f32 %v577_v24, %v577_v24  ;;  %v768_v28 = vadd.f32 %v767_v21, %v737_v20  ;;  %v978_v9 = vpop.f32.mrb[14].mxu0  ;;  %684 = vst [vmem:[%s1246_s29 + $0xe0] sm:$0xff] %v641_v25  ;;  %v994_v30 = vpop.f32.mrb[14].mxu1 }
 0x114   : > { %671 = vst [vmem:[%s1246_s29 + $0x78] sm:$0xff] %v978_v9  ;;  %v580_v32 = vpop.f32.mrb[15].mxu0  ;;  %687 = vst [vmem:[%s1246_s29 + $0xf8] sm:$0xff] %v994_v30  ;;  %v644_v34 = vpop.f32.mrb[15].mxu1  ;;  %v741_v43 = vmul.f32 %v978_v9, %v978_v9  ;;  %v754_v18 = vmul.f32 %v641_v25, %v641_v25  ;;  %v756_v23 = vmul.f32 %v1308_v6, %v1308_v6 }
 0x115   : > { %v769_v36 = vadd.f32 %v768_v28, %v738_v27  ;;  %669 = vst [vmem:[%s1246_s29 + $0x68] sm:$0xff] %v580_v32  ;;  %v700_v37 = vadd.f32 %v699_v26, %v580_v32  ;;  %v739_v38 = vmul.f32 %v580_v32, %v580_v32  ;;  %685 = vst [vmem:[%s1246_s29 + $0xe8] sm:$0xff] %v644_v34 }
 0x116   : > { %v757_v26 = vmul.f32 %v994_v30, %v994_v30 }
 0x117   : > { %v701_v41 = vadd.f32 %v977_v22, %v700_v37  ;;  %v770_v42 = vadd.f32 %v769_v36, %v739_v38 }
 0x119   : > { %v771_v44 = vadd.f32 %v770_v42, %v740_v40  ;;  %v702_v45 = vadd.f32 %v978_v9, %v701_v41 }
 0x11b   : > { %v703_v49 = vadd.f32 %v702_v45, %v1253_v31  ;;  %v772_v51 = vadd.f32 %v771_v44, %v741_v43  ;;  %v746_v31 = vmul.f32 %v1273_v50, %v1273_v50 }
 0x11d   : > { %v773_v46 = vadd.f32 %v772_v51, %v742_v47  ;;  %v704_v52 = vadd.f32 %v703_v49, %v1263_v35 }
 0x11f   : > { %v705_v58 = vadd.f32 %v1248_v29, %v704_v52  ;;  %v774_v59 = vadd.f32 %v773_v46, %v743_v53  ;;  %v748_v29 = vmul.f32 %v1268_v48, %v1268_v48 }
 0x121   : > { %v775_v61 = vadd.f32 %v774_v59, %v744_v55  ;;  %v706_v62 = vadd.f32 %v1258_v33, %v705_v58  ;;  %v749_v33 = vmul.f32 %v1278_v54, %v1278_v54 }
 0x123   : > { %v707_v63 = vadd.f32 %v706_v62, %v1273_v50  ;;  %v776_v39 = vadd.f32 %v775_v61, %v745_v60  ;;  %v750_v50 = vmul.f32 %v1293_v4, %v1293_v4 }
 0x125   : > { %v777_v57 = vadd.f32 %v776_v39, %v746_v31  ;;  %v708_v35 = vadd.f32 %v707_v63, %v1283_v56 }
 0x127   : > { %v709_v1 = vadd.f32 %v1268_v48, %v708_v35  ;;  %v778_v3 = vadd.f32 %v777_v57, %v747_v0  ;;  %v752_v48 = vmul.f32 %v1288_v2, %v1288_v2 }
 0x129   : > { %v779_v5 = vadd.f32 %v778_v3, %v748_v29  ;;  %v710_v7 = vadd.f32 %v1278_v54, %v709_v1  ;;  %v753_v54 = vmul.f32 %v1298_v11, %v1298_v11 }
 0x12b   : > { %v711_v8 = vadd.f32 %v710_v7, %v1293_v4  ;;  %v780_v10 = vadd.f32 %v779_v5, %v749_v33 }
 0x12d   : > { %v781_v12 = vadd.f32 %v780_v10, %v750_v50  ;;  %v712_v56 = vadd.f32 %v711_v8, %v1303_v13  ;;  %v755_v13 = vmul.f32 %v644_v34, %v644_v34 }
 0x12f   : > { %v713_v15 = vadd.f32 %v1288_v2, %v712_v56  ;;  %v782_v16 = vadd.f32 %v781_v12, %v751_v14 }
 0x131   : > { %v783_v17 = vadd.f32 %v782_v16, %v752_v48  ;;  %v714_v4 = vadd.f32 %v1298_v11, %v713_v15 }
 0x133   : > { %v715_v19 = vadd.f32 %v714_v4, %v641_v25  ;;  %v784_v20 = vadd.f32 %v783_v17, %v753_v54 }
 0x135   : > { %v785_v21 = vadd.f32 %v784_v20, %v754_v18  ;;  %v716_v22 = vadd.f32 %v715_v19, %v644_v34 }
 0x137   : > { %v717_v2 = vadd.f32 %v1308_v6, %v716_v22  ;;  %v786_v24 = vadd.f32 %v785_v21, %v755_v13 }
 0x139   : > { %v718_v27 = vadd.f32 %v994_v30, %v717_v2  ;;  %v787_v28 = vadd.f32 %v786_v24, %v756_v23 }
 0x13b   : > { %v719_v9 = vrot.slane %v718_v27, 4  ;;  %v788_v32 = vadd.f32 %v787_v28, %v757_v26 }
 0x13d   : > { %v720_v11 = vadd.f32 %v719_v9, %v718_v27  ;;  %v789_v36 = vrot.slane %v788_v32, 4 }
 0x13f   : > { %v721_v25 = vrot.slane %v720_v11, 2  ;;  %v790_v37 = vadd.f32 %v789_v36, %v788_v32 }
 0x141   : > { %v722_v38 = vadd.f32 %v721_v25, %v720_v11  ;;  %v791_v40 = vrot.slane %v790_v37, 2 }
 0x143   : > { %v723_v34 = vrot.slane %v722_v38, 1  ;;  %v792_v41 = vadd.f32 %v791_v40, %v790_v37 }
 0x145   : > { %v724_v6 = vadd.f32 %v723_v34, %v722_v38  ;;  %v793_v42 = vrot.slane %v792_v41, 1 }
 0x147   : > { %725 = vst [vmem:[%s268_s7] sm:$0x1] %v724_v6  ;;  %v794_v30 = vadd.f32 %v793_v42, %v792_v41 }
 0x149   : > { %795 = vst [vmem:[%s271_s10] sm:$0x1] %v794_v30 }
 0x14a PF: > { %s17_s21 = sadd.s32 1, %s1033_s21  }
 0x14b   : > { %p14_p5 = scmp.ge.s32.totalorder %s17_s21, 4  }
 0x14d   :  { %16 = sbr.rel (!%p14_p5) target bundleno = 1 (0x1), region = 90 }

// kernel: bottleneck_forward.6
= control target key start
LH: loop header
LB: loop body
LE: loop exit
PB: predicated region body
PF: predicated region fallthrough
CT: control target
= control target key end

     0   :  { %s3894_s21 = smov 0   ;;  %s4670_s0 = inlined_call_operand.vmem [shape: bf16[512,1152], index: 0, kind: input, shape index: {}]   ;;  %s4671_s1 = inlined_call_operand.vmem [shape: bf16[1152,128], index: 1, kind: input, shape index: {}]   ;;  %s4672_s2 = inlined_call_operand.vmem [shape: f32[1,1152], index: 2, kind: input, shape index: {}]   ;;  %s4673_s3 = inlined_call_operand.vmem [shape: f32[1,1152], index: 3, kind: input, shape index: {}]   ;;  %s4674_s4 = inlined_call_operand.vmem [shape: f32[512,128], index: 4, kind: output, shape index: {0}]   ;;  %s4675_s5 = inlined_call_operand.vmem [shape: f32[2,1,128], index: 5, kind: output, shape index: {1}]   ;;  %s4676_s6 = inlined_call_operand.vmem [shape: f32[2,1,128], index: 6, kind: output, shape index: {2}]  }
   0x1 LB: > { %s3900_s2 = sadd.s32 4294967295, %s3857_s21   ;;  %p2803_p0 = scmp.ge.s32.totalorder %s3857_s21, 1  ;;  %s3857_s21 = sphi %s3894_s21, %s17_s21  }
   0x2   : > { %p219_p1 = scmp.lt.s32.totalorder %s3857_s21, 3 }
   0x4   : > { %p220_p2 = pnand %p2803_p0, %p219_p1 }
   0x5   : > { %v3571_v0 = vld [vmem:[%s4671_s1 + $0x40] sm:$0xff] (!%p220_p2)   ;;  %s2804_s23 = sshll.u32 (!%p220_p2), %s3900_s2, 5  ;;  %v3573_v2 = vld [vmem:[%s4671_s1 + $0x48] sm:$0xff] (!%p220_p2)   ;;  %v3575_v4 = vld [vmem:[%s4671_s1 + $0x50] sm:$0xff] (!%p220_p2)   ;;  %p269_p4 = scmp.lt.s32.totalorder (!%p220_p2), %s3900_s2, 1 }
   0x6   : > { %223 = sbr.rel (%p220_p2) target bundleno = 557 (0x22d), region = 36  ;;  %v3572_v1 = vld [vmem:[%s4671_s1] sm:$0xff] (!%p220_p2)   ;;  %3026 = vmatprep.subr.bf16.mxu0 (!%p220_p2), %v3571_v0  ;;  %3546 = vmatprep.subr.bf16.mxu1 (!%p220_p2), %v3571_v0  ;;  %p257_p3 = scmp.lt.s32.totalorder (!%p220_p2), %s2804_s23, 63  ;;  %v3574_v3 = vld [vmem:[%s4671_s1 + $0x8] sm:$0xff] (!%p220_p2)   ;;  %v3576_v5 = vld [vmem:[%s4671_s1 + $0x10] sm:$0xff] (!%p220_p2)  }
   0x7   : > { %3027 = vmatpush3.bf16.msra.mxu0 (!%p220_p2), %v3572_v1  ;;  %3554 = vmatpush3.bf16.msra.mxu1 (!%p220_p2), %v3572_v1  ;;  %v3577_v6 = vld [vmem:[%s4671_s1 + $0x58] sm:$0xff] (!%p220_p2)   ;;  %v3579_v8 = vld [vmem:[%s4671_s1 + $0x60] sm:$0xff] (!%p220_p2)   ;;  %v3581_v10 = vld [vmem:[%s4671_s1 + $0x68] sm:$0xff] (!%p220_p2)  }
   0x8   : > { %3028 = vmatprep.subr.bf16.mxu0 (!%p220_p2), %v3573_v2  ;;  %3547 = vmatprep.subr.bf16.mxu1 (!%p220_p2), %v3573_v2  ;;  %v3578_v7 = vld [vmem:[%s4671_s1 + $0x18] sm:$0xff] (!%p220_p2)   ;;  %v3580_v9 = vld [vmem:[%s4671_s1 + $0x20] sm:$0xff] (!%p220_p2)   ;;  %v3582_v13 = vld [vmem:[%s4671_s1 + $0x28] sm:$0xff] (!%p220_p2)  }
   0x9   : > { %v3583_v14 = vld [vmem:[%s4671_s1 + $0x70] sm:$0xff] (!%p220_p2)   ;;  %v3585_v16 = vld [vmem:[%s4671_s1 + $0x78] sm:$0xff] (!%p220_p2)   ;;  %v3593_v18 = vld [vmem:[%s4671_s1 + $0xc0] sm:$0xff] (!%p220_p2)  }
   0xa   : > { %v3584_v15 = vld [vmem:[%s4671_s1 + $0x30] sm:$0xff] (!%p220_p2)   ;;  %v3586_v17 = vld [vmem:[%s4671_s1 + $0x38] sm:$0xff] (!%p220_p2)   ;;  %v3594_v21 = vld [vmem:[%s4671_s1 + $0x140] sm:$0xff] (!%p220_p2)  }
   0xb   : > { %3029 = vmatpush3.bf16.msra.mxu0 (!%p220_p2), %v3574_v3  ;;  %3555 = vmatpush3.bf16.msra.mxu1 (!%p220_p2), %v3574_v3  ;;  %v3595_v22 = vld [vmem:[%s4671_s1 + $0x80] sm:$0xff] (!%p220_p2)   ;;  %v3597_v24 = vld [vmem:[%s4671_s1 + $0xc8] sm:$0xff] (!%p220_p2)   ;;  %v3605_v32 = vld [vmem:[%s4671_s1 + $0xd0] sm:$0xff] (!%p220_p2)  }
   0xc   : > { %3030 = vmatprep.subr.bf16.mxu0 (!%p220_p2), %v3575_v4  ;;  %3548 = vmatprep.subr.bf16.mxu1 (!%p220_p2), %v3575_v4  ;;  %v3596_v23 = vld [vmem:[%s4671_s1 + $0x100] sm:$0xff] (!%p220_p2)   ;;  %v3608_v27 = vld [vmem:[%s4671_s1 + $0x148] sm:$0xff] (!%p220_p2)   ;;  %v3606_v33 = vld [vmem:[%s4671_s1 + $0x90] sm:$0xff] (!%p220_p2)  }
   0xd   : > { %s4678_s23 = smov (!%p257_p3, %s2804_s23), 63  ;;  %v3598_v28 = vld [vmem:[%s4671_s1 + $0x88] sm:$0xff]   ;;  %v3607_v34 = vld [vmem:[%s4671_s1 + $0xd8] sm:$0xff]   ;;  %v3617_v38 = vld [vmem:[%s4671_s1 + $0xe0] sm:$0xff]   ;;  %s4680_s2 = smov (!%p269_p4, %s3900_s2), 1 }
   0xe   : > { %s3562_s12 = smul.u32 36, %s4678_s23  ;;  %v3610_v29 = vld [vmem:[%s4671_s1 + $0x108] sm:$0xff]   ;;  %v3609_v37 = vld [vmem:[%s4671_s1 + $0x98] sm:$0xff]   ;;  %v3628_v41 = vld [vmem:[%s4671_s1 + $0x150] sm:$0xff]   ;;  %s271_s17 = scalar_lea.vmem %s4675_s5, %s4680_s2 }
   0xf   : > { %3031 = vmatpush3.bf16.msra.mxu0 %v3576_v5  ;;  %3556 = vmatpush3.bf16.msra.mxu1 %v3576_v5  ;;  %v3618_v42 = vld [vmem:[%s4671_s1 + $0xa0] sm:$0xff]   ;;  %v3619_v43 = vld [vmem:[%s4671_s1 + $0xe8] sm:$0xff]   ;;  %v3630_v44 = vld [vmem:[%s4671_s1 + $0x110] sm:$0xff]   ;;  %s274_s3 = scalar_lea.vmem %s4676_s6, %s4680_s2 }
  0x10   : > { %3032 = vmatprep.subr.bf16.mxu0 %v3577_v6  ;;  %3549 = vmatprep.subr.bf16.mxu1 %v3577_v6  ;;  %s3938_s19 = scalar_lea.vmem %s4670_s0, %s3562_s12  ;;  %v3620_v47 = vld [vmem:[%s4671_s1 + $0xa8] sm:$0xff]   ;;  %v3627_v50 = vld [vmem:[%s4671_s1 + $0xf0] sm:$0xff]   ;;  %v3631_v53 = vld [vmem:[%s4671_s1 + $0xf8] sm:$0xff]  }
  0x11   : > { %v3589_v11 = vld [vmem:[%s3938_s19 + $0x4] ss:$36 sps:$4 sm:$0xff]   ;;  %v3599_v25 = vld [vmem:[%s3938_s19 + $0x4c] ss:$36 sps:$4 sm:$0xff]   ;;  %v3611_v35 = vld [vmem:[%s3938_s19 + $0x94] ss:$36 sps:$4 sm:$0xff]  }
  0x12   : > { %v3592_v12 = vld [vmem:[%s3938_s19 + $0x364] ss:$36 sps:$4 sm:$0xff]   ;;  %1780 = vmatprep.mubr.bf16.mxu0 %v3589_v11  ;;  %v3601_v26 = vld [vmem:[%s3938_s19 + $0x3ac] ss:$36 sps:$4 sm:$0xff]   ;;  %v3613_v36 = vld [vmem:[%s3938_s19 + $0x3f4] ss:$36 sps:$4 sm:$0xff]  }
  0x13   : > { %3033 = vmatpush3.bf16.msra.mxu0 %v3578_v7  ;;  %3557 = vmatpush3.bf16.msra.mxu1 %v3578_v7  ;;  %v3587_v19 = vld [vmem:[%s3938_s19] ss:$36 sps:$4 sm:$0xff]   ;;  %v3603_v30 = vld [vmem:[%s3938_s19 + $0x48] ss:$36 sps:$4 sm:$0xff]   ;;  %v3615_v39 = vld [vmem:[%s3938_s19 + $0x90] ss:$36 sps:$4 sm:$0xff]  }
  0x14   : > { %3034 = vmatprep.subr.bf16.mxu0 %v3579_v8  ;;  %3550 = vmatprep.subr.bf16.mxu1 %v3579_v8  ;;  %v3590_v20 = vld [vmem:[%s3938_s19 + $0x360] ss:$36 sps:$4 sm:$0xff]   ;;  %v3604_v31 = vld [vmem:[%s3938_s19 + $0x3a8] ss:$36 sps:$4 sm:$0xff]   ;;  %v3616_v40 = vld [vmem:[%s3938_s19 + $0x3f0] ss:$36 sps:$4 sm:$0xff]  }
  0x15   : > { %1876 = vmatprep.mubr.bf16.mxu1 %v3592_v12  ;;  %v3621_v45 = vld [vmem:[%s3938_s19 + $0xdc] ss:$36 sps:$4 sm:$0xff]   ;;  %v3629_v51 = vld [vmem:[%s4671_s1 + $0xb0] sm:$0xff]   ;;  %v3633_v52 = vld [vmem:[%s3938_s19 + $0x124] ss:$36 sps:$4 sm:$0xff]  }
  0x16   : > { %v3623_v46 = vld [vmem:[%s3938_s19 + $0x43c] ss:$36 sps:$4 sm:$0xff]   ;;  %v3637_v56 = vld [vmem:[%s3938_s19 + $0xc] ss:$36 sps:$4 sm:$0xff]   ;;  %v3645_v0 = vld [vmem:[%s3938_s19 + $0x54] ss:$36 sps:$4 sm:$0xff]  }
  0x17   : > { %3035 = vmatpush3.bf16.msra.mxu0 %v3580_v9  ;;  %3558 = vmatpush3.bf16.msra.mxu1 %v3580_v9  ;;  %v3625_v48 = vld [vmem:[%s3938_s19 + $0xd8] ss:$36 sps:$4 sm:$0xff]   ;;  %v3635_v58 = vld [vmem:[%s3938_s19 + $0x8] ss:$36 sps:$4 sm:$0xff]   ;;  %v3638_v59 = vld [vmem:[%s3938_s19 + $0x120] ss:$36 sps:$4 sm:$0xff]  }
  0x18   : > { %3036 = vmatprep.subr.bf16.mxu0 %v3581_v10  ;;  %3551 = vmatprep.subr.bf16.mxu1 %v3581_v10  ;;  %v3626_v49 = vld [vmem:[%s3938_s19 + $0x438] ss:$36 sps:$4 sm:$0xff]   ;;  %v3639_v60 = vld [vmem:[%s4671_s1 + $0x1c0] sm:$0xff]   ;;  %v3643_v62 = vld [vmem:[%s3938_s19 + $0x16c] ss:$36 sps:$4 sm:$0xff]  }
  0x19   : > { %v3641_v54 = vld [vmem:[%s4671_s1 + $0x158] sm:$0xff]   ;;  %v3640_v61 = vld [vmem:[%s4671_s1 + $0x180] sm:$0xff]   ;;  %v3656_v2 = vld [vmem:[%s4671_s1 + $0x1c8] sm:$0xff]  }
  0x1a   : > { %v3642_v55 = vld [vmem:[%s4671_s1 + $0x118] sm:$0xff]   ;;  %v3655_v63 = vld [vmem:[%s4671_s1 + $0x160] sm:$0xff]   ;;  %v3658_v3 = vld [vmem:[%s4671_s1 + $0x188] sm:$0xff]  }
  0x1b   : > { %3037 = vmatpush3.bf16.msra.mxu0 %v3582_v13  ;;  %3559 = vmatpush3.bf16.msra.mxu1 %v3582_v13  ;;  %v3632_v57 = vld [vmem:[%s4671_s1 + $0xb8] sm:$0xff]   ;;  %v3657_v1 = vld [vmem:[%s4671_s1 + $0x120] sm:$0xff]   ;;  %v3647_v4 = vld [vmem:[%s3938_s19 + $0x168] ss:$36 sps:$4 sm:$0xff]  }
  0x1c   : > { %3038 = vmatprep.subr.bf16.mxu0 %v3583_v14  ;;  %3552 = vmatprep.subr.bf16.mxu1 %v3583_v14  ;;  %v3665_v5 = vld [vmem:[%s4671_s1 + $0x168] sm:$0xff]   ;;  %v3648_v7 = vld [vmem:[%s3938_s19 + $0x50] ss:$36 sps:$4 sm:$0xff]   ;;  %v3651_v9 = vld [vmem:[%s3938_s19 + $0x9c] ss:$36 sps:$4 sm:$0xff]  }
  0x1d   : > { %v3666_v6 = vld [vmem:[%s4671_s1 + $0x128] sm:$0xff]   ;;  %v3649_v8 = vld [vmem:[%s3938_s19 + $0x1b4] ss:$36 sps:$4 sm:$0xff]   ;;  %v3659_v14 = vld [vmem:[%s3938_s19 + $0x1fc] ss:$36 sps:$4 sm:$0xff]  }
  0x1e   : > { %v3673_v10 = vld [vmem:[%s4671_s1 + $0x1d0] sm:$0xff]   ;;  %v3654_v13 = vld [vmem:[%s3938_s19 + $0x98] ss:$36 sps:$4 sm:$0xff]  }
  0x1f   : > { %3039 = vmatpush3.bf16.msra.mxu0 %v3584_v15  ;;  %3560 = vmatpush3.bf16.msra.mxu1 %v3584_v15  ;;  %v3674_v11 = vld [vmem:[%s4671_s1 + $0x190] sm:$0xff]  }
  0x20   : > { %3040 = vmatprep.subr.bf16.mxu0 %v3585_v16  ;;  %3553 = vmatprep.subr.bf16.mxu1 %v3585_v16  ;;  %v3653_v12 = vld [vmem:[%s3938_s19 + $0x1b0] ss:$36 sps:$4 sm:$0xff]  }
  0x21   : > { %v3681_v15 = vld [vmem:[%s4671_s1 + $0x170] sm:$0xff]  }
  0x22   : > { %v3682_v16 = vld [vmem:[%s4671_s1 + $0x130] sm:$0xff]  }
  0x23   : > { %3041 = vmatpush3.bf16.msra.mxu0 %v3586_v17  ;;  %3561 = vmatpush3.bf16.msra.mxu1 %v3586_v17  ;;  %v3661_v17 = vld [vmem:[%s3938_s19 + $0xe4] ss:$36 sps:$4 sm:$0xff]  }
  0x24   : > { %3138 = vmatprep.subr.bf16.mxu1 %v3593_v18  ;;  %3250 = vmatprep.subr.bf16.mxu0 %v3594_v21  ;;  %v3689_v18 = vld [vmem:[%s4671_s1 + $0x1d8] sm:$0xff]  }
  0x25   : > { %v3691_v21 = vld [vmem:[%s4671_s1 + $0x178] sm:$0xff]  }
  0x26   : > { %1781 = vmatmul.mubr.bf16.vlgmr.msra.gmra.mrb[0].mxu0 %v3587_v19  ;;  %1877 = vmatmul.mubr.bf16.vlgmr.msra.gmra.mrb[0].mxu1 %v3590_v20  ;;  %v3690_v19 = vld [vmem:[%s4671_s1 + $0x198] sm:$0xff]  }
  0x27   : > { %3139 = vmatpush3.bf16.msra.mxu1 %v3595_v22  ;;  %3251 = vmatpush3.bf16.msra.mxu0 %v3596_v23  ;;  %v3663_v20 = vld [vmem:[%s3938_s19 + $0x1f8] ss:$36 sps:$4 sm:$0xff]   ;;  %v3664_v23 = vld [vmem:[%s3938_s19 + $0xe0] ss:$36 sps:$4 sm:$0xff]  }
  0x28   : > { %3140 = vmatprep.subr.bf16.mxu1 %v3597_v24  ;;  %1788 = vmatprep.mubr.bf16.mxu0 %v3599_v25  ;;  %v3692_v22 = vld [vmem:[%s4671_s1 + $0x138] sm:$0xff]   ;;  %v3667_v24 = vld [vmem:[%s3938_s19 + $0x244] ss:$36 sps:$4 sm:$0xff]   ;;  %v3669_v25 = vld [vmem:[%s3938_s19 + $0x12c] ss:$36 sps:$4 sm:$0xff]  }
  0x29   : > { %1884 = vmatprep.mubr.bf16.mxu1 %v3601_v26  ;;  %3252 = vmatprep.subr.bf16.mxu0 %v3608_v27  ;;  %v3705_v26 = vld [vmem:[%s4671_s1 + $0x1e0] sm:$0xff]  }
  0x2a   : > { %v3671_v27 = vld [vmem:[%s3938_s19 + $0x240] ss:$36 sps:$4 sm:$0xff]  }
  0x2b   : > { %3141 = vmatpush3.bf16.msra.mxu1 %v3598_v28  ;;  %3253 = vmatpush3.bf16.msra.mxu0 %v3610_v29  ;;  %v3706_v28 = vld [vmem:[%s4671_s1 + $0x200] sm:$0xff]  }
  0x2c   : > { %3142 = vmatprep.subr.bf16.mxu1 %v3605_v32  ;;  %3254 = vmatprep.subr.bf16.mxu0 %v3628_v41  ;;  %v3707_v29 = vld [vmem:[%s4671_s1 + $0x1a0] sm:$0xff]   ;;  %v3677_v32 = vld [vmem:[%s3938_s19 + $0x174] ss:$36 sps:$4 sm:$0xff]  }
  0x2d   : > { %v3735_v41 = vld [vmem:[%s4671_s1 + $0x1f0] sm:$0xff]  }
  0x2e   : > { %1789 = vmatmul.mubr.bf16.gmra.mrb[4].mxu0 %v3603_v30  ;;  %1885 = vmatmul.mubr.bf16.gmra.mrb[4].mxu1 %v3604_v31  ;;  %v3672_v30 = vld [vmem:[%s3938_s19 + $0x128] ss:$36 sps:$4 sm:$0xff]  }
  0x2f   : > { %3143 = vmatpush3.bf16.msra.mxu1 %v3606_v33  ;;  %1796 = vmatprep.mubr.bf16.mxu0 %v3611_v35  ;;  %v3675_v31 = vld [vmem:[%s3938_s19 + $0x28c] ss:$36 sps:$4 sm:$0xff]  }
  0x30   : > { %3144 = vmatprep.subr.bf16.mxu1 %v3607_v34  ;;  %1892 = vmatprep.mubr.bf16.mxu1 %v3613_v36  ;;  %v3720_v33 = vld [vmem:[%s4671_s1 + $0x1e8] sm:$0xff]   ;;  %v3680_v35 = vld [vmem:[%s3938_s19 + $0x170] ss:$36 sps:$4 sm:$0xff]  }
  0x31   : > { %3255 = vmatpush3.bf16.msra.mxu0 %v3630_v44  ;;  %v3679_v34 = vld [vmem:[%s3938_s19 + $0x288] ss:$36 sps:$4 sm:$0xff]  }
  0x32   : > { %3256 = vmatprep.subr.bf16.mxu0 %v3641_v54  ;;  %v3722_v36 = vld [vmem:[%s4671_s1 + $0x1a8] sm:$0xff]   ;;  %v3710_v54 = vld [vmem:[%s3938_s19 + $0x5c] ss:$36 sps:$4 sm:$0xff]  }
  0x33   : > { %3145 = vmatpush3.bf16.msra.mxu1 %v3609_v37  ;;  %v3683_v37 = vld [vmem:[%s3938_s19 + $0x2d4] ss:$36 sps:$4 sm:$0xff]   ;;  %v3695_v44 = vld [vmem:[%s3938_s19 + $0x204] ss:$36 sps:$4 sm:$0xff]  }
  0x34   : > { %3146 = vmatprep.subr.bf16.mxu1 %v3617_v38  ;;  %v3685_v38 = vld [vmem:[%s3938_s19 + $0x1bc] ss:$36 sps:$4 sm:$0xff]  }
  0x35   : > { %3257 = vmatpush3.bf16.msra.mxu0 %v3642_v55  ;;  %v3721_v55 = vld [vmem:[%s4671_s1 + $0x208] sm:$0xff]  }
  0x36   : > { %1797 = vmatmul.mubr.bf16.gmra.mrb[8].mxu0 %v3615_v39  ;;  %1893 = vmatmul.mubr.bf16.gmra.mrb[8].mxu1 %v3616_v40  ;;  %v3687_v39 = vld [vmem:[%s3938_s19 + $0x2d0] ss:$36 sps:$4 sm:$0xff]   ;;  %v3688_v40 = vld [vmem:[%s3938_s19 + $0x1b8] ss:$36 sps:$4 sm:$0xff]  }
  0x37   : > { %3147 = vmatpush3.bf16.msra.mxu1 %v3618_v42  ;;  %1804 = vmatprep.mubr.bf16.mxu0 %v3621_v45  ;;  %v3693_v42 = vld [vmem:[%s3938_s19 + $0x31c] ss:$36 sps:$4 sm:$0xff]  }
  0x38   : > { %3148 = vmatprep.subr.bf16.mxu1 %v3619_v43  ;;  %1900 = vmatprep.mubr.bf16.mxu1 %v3623_v46  ;;  %v3737_v43 = vld [vmem:[%s4671_s1 + $0x1b0] sm:$0xff]   ;;  %v3697_v45 = vld [vmem:[%s3938_s19 + $0x318] ss:$36 sps:$4 sm:$0xff]   ;;  %v3698_v46 = vld [vmem:[%s3938_s19 + $0x200] ss:$36 sps:$4 sm:$0xff]  }
  0x39   : > { %3258 = vmatprep.subr.bf16.mxu0 %v3655_v63  ;;  %v3718_v63 = vld [vmem:[%s3938_s19 + $0x2d8] ss:$36 sps:$4 sm:$0xff]  }
  0x3a   : > { %3259 = vmatpush3.bf16.msra.mxu0 %v3657_v1  ;;  %v3723_v1 = vld [vmem:[%s3938_s19 + $0x324] ss:$36 sps:$4 sm:$0xff]  }
  0x3b   : > { %3149 = vmatpush3.bf16.msra.mxu1 %v3620_v47  ;;  %3260 = vmatprep.subr.bf16.mxu0 %v3665_v5  ;;  %v3750_v47 = vld [vmem:[%s4671_s1 + $0x1f8] sm:$0xff]   ;;  %v3728_v5 = vld [vmem:[%s3938_s19 + $0xe8] ss:$36 sps:$4 sm:$0xff]  }
  0x3c   : > { %3150 = vmatprep.subr.bf16.mxu1 %v3627_v50  ;;  %v3703_v50 = vld [vmem:[%s3938_s19 + $0x14] ss:$36 sps:$4 sm:$0xff]  }
  0x3e   : > { %1805 = vmatmul.mubr.bf16.gmra.mrb[12].mxu0 %v3625_v48  ;;  %1901 = vmatmul.mubr.bf16.gmra.mrb[12].mxu1 %v3626_v49  ;;  %v3699_v48 = vld [vmem:[%s3938_s19 + $0x24c] ss:$36 sps:$4 sm:$0xff]   ;;  %v3752_v49 = vld [vmem:[%s4671_s1 + $0x1b8] sm:$0xff]  }
  0x3f   : > { %3151 = vmatpush3.bf16.msra.mxu1 %v3629_v51  ;;  %1812 = vmatprep.mubr.bf16.mxu0 %v3633_v52  ;;  %v3701_v51 = vld [vmem:[%s3938_s19 + $0x10] ss:$36 sps:$4 sm:$0xff]   ;;  %v3704_v52 = vld [vmem:[%s3938_s19 + $0x248] ss:$36 sps:$4 sm:$0xff]  }
  0x40   : > { %3152 = vmatprep.subr.bf16.mxu1 %v3631_v53  ;;  %1941 = vmatprep.mubr.bf16.mxu1 %v3637_v56  ;;  %v3708_v53 = vld [vmem:[%s3938_s19 + $0x294] ss:$36 sps:$4 sm:$0xff]  }
  0x41   : > { %3261 = vmatpush3.bf16.msra.mxu0 %v3666_v6  ;;  %v3736_v56 = vld [vmem:[%s4671_s1 + $0x210] sm:$0xff]  }
  0x42   : > { %3262 = vmatprep.subr.bf16.mxu0 %v3681_v15  ;;  %v3791_v6 = vld [vmem:[%s4671_s1 + $0x230] sm:$0xff]   ;;  %v3743_v15 = vld [vmem:[%s3938_s19 + $0x178] ss:$36 sps:$4 sm:$0xff]  }
  0x43   : > { %3153 = vmatpush3.bf16.msra.mxu1 %v3632_v57  ;;  %v3712_v57 = vld [vmem:[%s3938_s19 + $0x290] ss:$36 sps:$4 sm:$0xff]  }
  0x44   : > { %3362 = vmatprep.subr.bf16.mxu1 %v3639_v60  ;;  %v3716_v60 = vld [vmem:[%s3938_s19 + $0xa4] ss:$36 sps:$4 sm:$0xff]  }
  0x45   : > { %3263 = vmatpush3.bf16.msra.mxu0 %v3682_v16  ;;  %v3744_v16 = vld [vmem:[%s3938_s19 + $0x3fc] ss:$36 sps:$4 sm:$0xff]  }
  0x46   : > { %1813 = vmatmul.mubr.bf16.gmra.mrb[16].mxu0 %v3638_v59  ;;  %1942 = vmatmul.mubr.bf16.vlgmr.msra.gmra.mrb[16].mxu1 %v3635_v58  ;;  %v3713_v58 = vld [vmem:[%s3938_s19 + $0x58] ss:$36 sps:$4 sm:$0xff]  }
  0x47   : > { %3363 = vmatpush3.bf16.msra.mxu1 %v3640_v61  ;;  %1820 = vmatprep.mubr.bf16.mxu0 %v3643_v62  ;;  %v3714_v59 = vld [vmem:[%s3938_s19 + $0x2dc] ss:$36 sps:$4 sm:$0xff]  }
  0x48   : > { %1949 = vmatprep.mubr.bf16.mxu1 %v3645_v0  ;;  %3364 = vmatprep.subr.bf16.mxu1 %v3656_v2  ;;  %v3751_v61 = vld [vmem:[%s4671_s1 + $0x218] sm:$0xff]   ;;  %v3765_v62 = vld [vmem:[%s4671_s1 + $0x220] sm:$0xff]   ;;  %v3725_v2 = vld [vmem:[%s3938_s19 + $0xec] ss:$36 sps:$4 sm:$0xff]  }
  0x49   : > { %3264 = vmatprep.subr.bf16.mxu0 %v3691_v21  ;;  %v3719_v0 = vld [vmem:[%s3938_s19 + $0xa0] ss:$36 sps:$4 sm:$0xff]   ;;  %v3755_v21 = vld [vmem:[%s3938_s19 + $0x20c] ss:$36 sps:$4 sm:$0xff]  }
  0x4a   : > { %3265 = vmatpush3.bf16.msra.mxu0 %v3692_v22  ;;  %v3757_v22 = vld [vmem:[%s3938_s19 + $0x440] ss:$36 sps:$4 sm:$0xff]  }
  0x4b   : > { %3365 = vmatpush3.bf16.msra.mxu1 %v3658_v3  ;;  %3498 = vmatprep.subr.bf16.mxu0 %v3706_v28  ;;  %v3778_v3 = vld [vmem:[%s4671_s1 + $0x228] sm:$0xff]  }
  0x4c   : > { %3366 = vmatprep.subr.bf16.mxu1 %v3673_v10  ;;  %v3733_v10 = vld [vmem:[%s3938_s19 + $0x368] ss:$36 sps:$4 sm:$0xff]  }
  0x4e   : > { %1821 = vmatmul.mubr.bf16.gmra.mrb[20].mxu0 %v3647_v4  ;;  %1950 = vmatmul.mubr.bf16.gmra.mrb[20].mxu1 %v3648_v7  ;;  %v3727_v4 = vld [vmem:[%s3938_s19 + $0x320] ss:$36 sps:$4 sm:$0xff]   ;;  %v3729_v7 = vld [vmem:[%s3938_s19 + $0x36c] ss:$36 sps:$4 sm:$0xff]  }
  0x4f   : > { %1828 = vmatprep.mubr.bf16.mxu0 %v3649_v8  ;;  %1957 = vmatprep.mubr.bf16.mxu1 %v3651_v9  ;;  %v3731_v8 = vld [vmem:[%s3938_s19 + $0x134] ss:$36 sps:$4 sm:$0xff]  }
  0x50   : > { %3367 = vmatpush3.bf16.msra.mxu1 %v3674_v11  ;;  %v3804_v9 = vld [vmem:[%s4671_s1 + $0x238] sm:$0xff]   ;;  %v3734_v11 = vld [vmem:[%s3938_s19 + $0x130] ss:$36 sps:$4 sm:$0xff]  }
  0x51   : > { %3368 = vmatprep.subr.bf16.mxu1 %v3689_v18  ;;  %v3748_v18 = vld [vmem:[%s3938_s19 + $0x3f8] ss:$36 sps:$4 sm:$0xff]  }
  0x54   : > { %3369 = vmatpush3.bf16.msra.mxu1 %v3690_v19  ;;  %v3749_v19 = vld [vmem:[%s3938_s19 + $0x1c0] ss:$36 sps:$4 sm:$0xff]  }
  0x55   : > { %3370 = vmatprep.subr.bf16.mxu1 %v3705_v26  ;;  %v3761_v26 = vld [vmem:[%s3938_s19 + $0x18] ss:$36 sps:$4 sm:$0xff]  }
  0x56   : > { %1829 = vmatmul.mubr.bf16.gmra.mrb[24].mxu0 %v3653_v12  ;;  %1958 = vmatmul.mubr.bf16.gmra.mrb[24].mxu1 %v3654_v13  ;;  %v3738_v12 = vld [vmem:[%s3938_s19 + $0x3b4] ss:$36 sps:$4 sm:$0xff]   ;;  %v3740_v13 = vld [vmem:[%s3938_s19 + $0x17c] ss:$36 sps:$4 sm:$0xff]  }
  0x57   : > { %1836 = vmatprep.mubr.bf16.mxu0 %v3659_v14  ;;  %1965 = vmatprep.mubr.bf16.mxu1 %v3661_v17  ;;  %v3742_v14 = vld [vmem:[%s3938_s19 + $0x3b0] ss:$36 sps:$4 sm:$0xff]   ;;  %v3746_v17 = vld [vmem:[%s3938_s19 + $0x1c4] ss:$36 sps:$4 sm:$0xff]  }
  0x58   : > { %3371 = vmatpush3.bf16.msra.mxu1 %v3707_v29  ;;  %v3768_v29 = vld [vmem:[%s3938_s19 + $0x64] ss:$36 sps:$4 sm:$0xff]  }
  0x59   : > { %3372 = vmatprep.subr.bf16.mxu1 %v3720_v33  ;;  %v3774_v33 = vld [vmem:[%s3938_s19 + $0xac] ss:$36 sps:$4 sm:$0xff]  }
  0x5c   : > { %3373 = vmatpush3.bf16.msra.mxu1 %v3722_v36  ;;  %v3779_v36 = vld [vmem:[%s3938_s19 + $0x32c] ss:$36 sps:$4 sm:$0xff]  }
  0x5d   : > { %3374 = vmatprep.subr.bf16.mxu1 %v3735_v41  ;;  %v3787_v41 = vld [vmem:[%s3938_s19 + $0x13c] ss:$36 sps:$4 sm:$0xff]  }
  0x5e   : > { %1837 = vmatmul.mubr.bf16.gmra.mrb[28].mxu0 %v3663_v20  ;;  %1966 = vmatmul.mubr.bf16.gmra.mrb[28].mxu1 %v3664_v23  ;;  %v3753_v20 = vld [vmem:[%s3938_s19 + $0x444] ss:$36 sps:$4 sm:$0xff]  }
  0x5f   : > { %1844 = vmatprep.mubr.bf16.mxu0 %v3667_v24  ;;  %1973 = vmatprep.mubr.bf16.mxu1 %v3669_v25  ;;  %v3758_v23 = vld [vmem:[%s3938_s19 + $0x208] ss:$36 sps:$4 sm:$0xff]   ;;  %v3759_v24 = vld [vmem:[%s3938_s19 + $0x254] ss:$36 sps:$4 sm:$0xff]   ;;  %v3763_v25 = vld [vmem:[%s3938_s19 + $0x1c] ss:$36 sps:$4 sm:$0xff]  }
  0x60   : > { %3375 = vmatpush3.bf16.msra.mxu1 %v3737_v43  ;;  %v3790_v43 = vld [vmem:[%s3938_s19 + $0x138] ss:$36 sps:$4 sm:$0xff]  }
  0x61   : > { %3376 = vmatprep.subr.bf16.mxu1 %v3750_v47  ;;  %v3797_v47 = vld [vmem:[%s3938_s19 + $0x180] ss:$36 sps:$4 sm:$0xff]  }
  0x64   : > { %3377 = vmatpush3.bf16.msra.mxu1 %v3752_v49  ;;  %v3800_v49 = vld [vmem:[%s3938_s19 + $0x1cc] ss:$36 sps:$4 sm:$0xff]  }
  0x66   : > { %1845 = vmatmul.mubr.bf16.gmra.mrb[32].mxu0 %v3671_v27  ;;  %1974 = vmatmul.mubr.bf16.gmra.mrb[32].mxu1 %v3672_v30  ;;  %v3764_v27 = vld [vmem:[%s3938_s19 + $0x250] ss:$36 sps:$4 sm:$0xff]   ;;  %v3770_v30 = vld [vmem:[%s3938_s19 + $0x298] ss:$36 sps:$4 sm:$0xff]  }
  0x67   : > { %1852 = vmatprep.mubr.bf16.mxu0 %v3675_v31  ;;  %1981 = vmatprep.mubr.bf16.mxu1 %v3677_v32  ;;  %v3771_v31 = vld [vmem:[%s3938_s19 + $0x60] ss:$36 sps:$4 sm:$0xff]  }
  0x68   : > { %v3772_v32 = vld [vmem:[%s3938_s19 + $0x2e4] ss:$36 sps:$4 sm:$0xff]  }
  0x6e   : > { %1853 = vmatmul.mubr.bf16.gmra.mrb[36].mxu0 %v3679_v34  ;;  %1982 = vmatmul.mubr.bf16.gmra.mrb[36].mxu1 %v3680_v35  ;;  %v3776_v34 = vld [vmem:[%s3938_s19 + $0x2e0] ss:$36 sps:$4 sm:$0xff]   ;;  %v3777_v35 = vld [vmem:[%s3938_s19 + $0xa8] ss:$36 sps:$4 sm:$0xff]  }
  0x6f   : > { %1860 = vmatprep.mubr.bf16.mxu0 %v3683_v37  ;;  %1989 = vmatprep.mubr.bf16.mxu1 %v3685_v38  ;;  %v3781_v37 = vld [vmem:[%s3938_s19 + $0xf4] ss:$36 sps:$4 sm:$0xff]   ;;  %v3783_v38 = vld [vmem:[%s3938_s19 + $0x328] ss:$36 sps:$4 sm:$0xff]  }
  0x76   : > { %1861 = vmatmul.mubr.bf16.gmra.mrb[40].mxu0 %v3687_v39  ;;  %1990 = vmatmul.mubr.bf16.gmra.mrb[40].mxu1 %v3688_v40  ;;  %v3784_v39 = vld [vmem:[%s3938_s19 + $0xf0] ss:$36 sps:$4 sm:$0xff]  }
  0x77   : > { %1868 = vmatprep.mubr.bf16.mxu0 %v3693_v42  ;;  %1997 = vmatprep.mubr.bf16.mxu1 %v3695_v44  ;;  %v3785_v40 = vld [vmem:[%s3938_s19 + $0x374] ss:$36 sps:$4 sm:$0xff]   ;;  %v3792_v44 = vld [vmem:[%s3938_s19 + $0x3bc] ss:$36 sps:$4 sm:$0xff]  }
  0x78   : > { %v3789_v42 = vld [vmem:[%s3938_s19 + $0x370] ss:$36 sps:$4 sm:$0xff]  }
  0x7e   : > { %1869 = vmatmul.mubr.bf16.gmra.mrb[44].mxu0 %v3697_v45  ;;  %1998 = vmatmul.mubr.bf16.gmra.mrb[44].mxu1 %v3698_v46  ;;  %v3794_v45 = vld [vmem:[%s3938_s19 + $0x184] ss:$36 sps:$4 sm:$0xff]   ;;  %v3796_v46 = vld [vmem:[%s3938_s19 + $0x3b8] ss:$36 sps:$4 sm:$0xff]  }
  0x7f   : > { %2005 = vmatprep.mubr.bf16.mxu1 %v3699_v48  ;;  %2102 = vmatprep.mubr.bf16.mxu0 %v3703_v50  ;;  %v3798_v48 = vld [vmem:[%s3938_s19 + $0x404] ss:$36 sps:$4 sm:$0xff]  }
  0x80   : > { %v3802_v50 = vld [vmem:[%s3938_s19 + $0x400] ss:$36 sps:$4 sm:$0xff]  }
  0x86   : > { %2006 = vmatmul.mubr.bf16.gmra.mrb[48].mxu1 %v3704_v52  ;;  %2103 = vmatmul.mubr.bf16.vlgmr.msra.gmra.mrb[48].mxu0 %v3701_v51  ;;  %v3803_v51 = vld [vmem:[%s3938_s19 + $0x1c8] ss:$36 sps:$4 sm:$0xff]  }
  0x87   : > { %3499 = vmatpush3.bf16.msra.mxu0 %v3706_v28  ;;  %2013 = vmatprep.mubr.bf16.mxu1 %v3708_v53  ;;  %v3766_v28 = vld [vmem:[%s3938_s19 + $0x29c] ss:$36 sps:$4 sm:$0xff]   ;;  %v3805_v52 = vld [vmem:[%s3938_s19 + $0x44c] ss:$36 sps:$4 sm:$0xff]   ;;  %v3807_v53 = vld [vmem:[%s3938_s19 + $0x214] ss:$36 sps:$4 sm:$0xff]  }
  0x88   : > { %2110 = vmatprep.mubr.bf16.mxu0 %v3710_v54  ;;  %3500 = vmatprep.subr.bf16.mxu0 %v3721_v55 }
  0x8b   : > { %3501 = vmatpush3.bf16.msra.mxu0 %v3721_v55 }
  0x8c   : > { %3502 = vmatprep.subr.bf16.mxu0 %v3736_v56 }
  0x8e   : > { %2014 = vmatmul.mubr.bf16.gmra.mrb[52].mxu1 %v3712_v57  ;;  %2111 = vmatmul.mubr.bf16.gmra.mrb[52].mxu0 %v3713_v58  ;;  %v3809_v58 = vld [vmem:[%s3938_s19 + $0x448] ss:$36 sps:$4 sm:$0xff]  }
  0x8f   : > { %2021 = vmatprep.mubr.bf16.mxu1 %v3714_v59  ;;  %2118 = vmatprep.mubr.bf16.mxu0 %v3716_v60  ;;  %v3810_v59 = vld [vmem:[%s3938_s19 + $0x210] ss:$36 sps:$4 sm:$0xff]  }
  0x90   : > { %3503 = vmatpush3.bf16.msra.mxu0 %v3736_v56 }
  0x91   : > { %3504 = vmatprep.subr.bf16.mxu0 %v3751_v61 }
  0x94   : > { %3505 = vmatpush3.bf16.msra.mxu0 %v3751_v61 }
  0x95   : > { %3506 = vmatprep.subr.bf16.mxu0 %v3765_v62 }
  0x96   : > { %2022 = vmatmul.mubr.bf16.gmra.mrb[56].mxu1 %v3718_v63  ;;  %2119 = vmatmul.mubr.bf16.gmra.mrb[56].mxu0 %v3719_v0  ;;  %v3811_v0 = vld [vmem:[%s3938_s19 + $0x25c] ss:$36 sps:$4 sm:$0xff]  }
  0x97   : > { %2029 = vmatprep.mubr.bf16.mxu1 %v3723_v1  ;;  %2126 = vmatprep.mubr.bf16.mxu0 %v3725_v2  ;;  %v3813_v1 = vld [vmem:[%s3938_s19 + $0x20] ss:$36 sps:$4 sm:$0xff]  }
  0x98   : > { %3507 = vmatpush3.bf16.msra.mxu0 %v3765_v62 }
  0x99   : > { %3508 = vmatprep.subr.bf16.mxu0 %v3778_v3 }
  0x9c   : > { %3509 = vmatpush3.bf16.msra.mxu0 %v3778_v3 }
  0x9d   : > { %3510 = vmatprep.subr.bf16.mxu0 %v3791_v6 }
  0x9e   : > { %2030 = vmatmul.mubr.bf16.gmra.mrb[60].mxu1 %v3727_v4  ;;  %2127 = vmatmul.mubr.bf16.gmra.mrb[60].mxu0 %v3728_v5 }
  0x9f   : > { %2037 = vmatprep.mubr.bf16.mxu1 %v3729_v7  ;;  %2134 = vmatprep.mubr.bf16.mxu0 %v3731_v8 }
  0xa0   : > { %3511 = vmatpush3.bf16.msra.mxu0 %v3791_v6 }
  0xa1   : > { %3512 = vmatprep.subr.bf16.mxu0 %v3804_v9 }
  0xa4   : > { %3513 = vmatpush3.bf16.msra.mxu0 %v3804_v9 }
  0xa6   : > { %2038 = vmatmul.mubr.bf16.gmra.mrb[64].mxu1 %v3733_v10  ;;  %2135 = vmatmul.mubr.bf16.gmra.mrb[64].mxu0 %v3734_v11  ;;  %v3814_v10 = vld [vmem:[%s3938_s19 + $0x258] ss:$36 sps:$4 sm:$0xff]   ;;  %v3815_v11 = vld [vmem:[%s3938_s19 + $0x68] ss:$36 sps:$4 sm:$0xff]  }
  0xa7   : > { %2045 = vmatprep.mubr.bf16.mxu1 %v3738_v12  ;;  %2142 = vmatprep.mubr.bf16.mxu0 %v3740_v13 }
  0xae   : > { %2046 = vmatmul.mubr.bf16.gmra.mrb[68].mxu1 %v3742_v14  ;;  %2143 = vmatmul.mubr.bf16.gmra.mrb[68].mxu0 %v3743_v15 }
  0xaf   : > { %2053 = vmatprep.mubr.bf16.mxu1 %v3744_v16  ;;  %2150 = vmatprep.mubr.bf16.mxu0 %v3746_v17  ;;  %v3816_v16 = vld [vmem:[%s3938_s19 + $0x2a4] ss:$36 sps:$4 sm:$0xff]   ;;  %v3818_v17 = vld [vmem:[%s3938_s19 + $0xb0] ss:$36 sps:$4 sm:$0xff]  }
  0xb6   : > { %2054 = vmatmul.mubr.bf16.gmra.mrb[72].mxu1 %v3748_v18  ;;  %2151 = vmatmul.mubr.bf16.gmra.mrb[72].mxu0 %v3749_v19 }
  0xb7   : > { %2061 = vmatprep.mubr.bf16.mxu1 %v3753_v20  ;;  %2158 = vmatprep.mubr.bf16.mxu0 %v3755_v21 }
  0xbe   : > { %2062 = vmatmul.mubr.bf16.gmra.mrb[76].mxu1 %v3757_v22  ;;  %2159 = vmatmul.mubr.bf16.gmra.mrb[76].mxu0 %v3758_v23 }
  0xbf   : > { %2166 = vmatprep.mubr.bf16.mxu0 %v3759_v24  ;;  %2263 = vmatprep.mubr.bf16.mxu1 %v3763_v25 }
  0xc6   : > { %2167 = vmatmul.mubr.bf16.gmra.mrb[80].mxu0 %v3764_v27  ;;  %2264 = vmatmul.mubr.bf16.vlgmr.msra.gmra.mrb[80].mxu1 %v3761_v26  ;;  %v3819_v26 = vld [vmem:[%s3938_s19 + $0x2a0] ss:$36 sps:$4 sm:$0xff]   ;;  %v3820_v27 = vld [vmem:[%s3938_s19 + $0xf8] ss:$36 sps:$4 sm:$0xff]  }
  0xc7   : > { %2174 = vmatprep.mubr.bf16.mxu0 %v3766_v28  ;;  %2271 = vmatprep.mubr.bf16.mxu1 %v3768_v29 }
  0xce   : > { %2175 = vmatmul.mubr.bf16.gmra.mrb[84].mxu0 %v3770_v30  ;;  %2272 = vmatmul.mubr.bf16.gmra.mrb[84].mxu1 %v3771_v31 }
  0xcf   : > { %2182 = vmatprep.mubr.bf16.mxu0 %v3772_v32  ;;  %2279 = vmatprep.mubr.bf16.mxu1 %v3774_v33  ;;  %v3821_v32 = vld [vmem:[%s3938_s19 + $0x2ec] ss:$36 sps:$4 sm:$0xff]   ;;  %v3823_v33 = vld [vmem:[%s3938_s19 + $0x140] ss:$36 sps:$4 sm:$0xff]  }
  0xd6   : > { %2183 = vmatmul.mubr.bf16.gmra.mrb[88].mxu0 %v3776_v34  ;;  %2280 = vmatmul.mubr.bf16.gmra.mrb[88].mxu1 %v3777_v35 }
  0xd7   : > { %2190 = vmatprep.mubr.bf16.mxu0 %v3779_v36  ;;  %2287 = vmatprep.mubr.bf16.mxu1 %v3781_v37 }
  0xde   : > { %2191 = vmatmul.mubr.bf16.gmra.mrb[92].mxu0 %v3783_v38  ;;  %2288 = vmatmul.mubr.bf16.gmra.mrb[92].mxu1 %v3784_v39 }
  0xdf   : > { %2198 = vmatprep.mubr.bf16.mxu0 %v3785_v40  ;;  %2295 = vmatprep.mubr.bf16.mxu1 %v3787_v41 }
  0xe6   : > { %2199 = vmatmul.mubr.bf16.gmra.mrb[96].mxu0 %v3789_v42  ;;  %2296 = vmatmul.mubr.bf16.gmra.mrb[96].mxu1 %v3790_v43  ;;  %v3824_v42 = vld [vmem:[%s3938_s19 + $0x2e8] ss:$36 sps:$4 sm:$0xff]  }
  0xe7   : > { %2206 = vmatprep.mubr.bf16.mxu0 %v3792_v44  ;;  %2303 = vmatprep.mubr.bf16.mxu1 %v3794_v45  ;;  %v3825_v43 = vld [vmem:[%s3938_s19 + $0x188] ss:$36 sps:$4 sm:$0xff]  }
  0xee   : > { %2207 = vmatmul.mubr.bf16.gmra.mrb[100].mxu0 %v3796_v46  ;;  %2304 = vmatmul.mubr.bf16.gmra.mrb[100].mxu1 %v3797_v47 }
  0xef   : > { %2214 = vmatprep.mubr.bf16.mxu0 %v3798_v48  ;;  %2311 = vmatprep.mubr.bf16.mxu1 %v3800_v49  ;;  %v3826_v48 = vld [vmem:[%s3938_s19 + $0x334] ss:$36 sps:$4 sm:$0xff]  }
  0xf0   : > { %v3828_v49 = vld [vmem:[%s3938_s19 + $0x1d0] ss:$36 sps:$4 sm:$0xff]  }
  0xf6   : > { %2215 = vmatmul.mubr.bf16.gmra.mrb[104].mxu0 %v3802_v50  ;;  %2312 = vmatmul.mubr.bf16.gmra.mrb[104].mxu1 %v3803_v51 }
  0xf7   : > { %2222 = vmatprep.mubr.bf16.mxu0 %v3805_v52  ;;  %2319 = vmatprep.mubr.bf16.mxu1 %v3807_v53 }
  0xf9   : > { %v3042_v54 = vpop.f32.mrb[0].mxu0  ;;  %v3114_v55 = vpop.f32.mrb[0].mxu1 }
  0xfa   : > { %v3043_v56 = vpop.f32.mrb[1].mxu0  ;;  %v3115_v57 = vpop.f32.mrb[1].mxu1 }
  0xfb   : > { %v4241_v60 = vadd.f32 %v3043_v56, %v3042_v54  ;;  %v4243_v61 = vadd.f32 %v3115_v57, %v3114_v55  ;;  %v3045_v62 = vpop.f32.mrb[2].mxu0  ;;  %v3117_v63 = vpop.f32.mrb[2].mxu1 }
  0xfc   : > { %v3046_v2 = vpop.f32.mrb[3].mxu0  ;;  %v3118_v3 = vpop.f32.mrb[3].mxu1 }
  0xfd   : > { %v4247_v4 = vadd.f32 %v3046_v2, %v3045_v62  ;;  %v4249_v5 = vadd.f32 %v3118_v3, %v3117_v63  ;;  %v3831_v2 = vld [vmem:[%s3938_s19 + $0x37c] ss:$36 sps:$4 sm:$0xff]  }
  0xfe   : > { %2223 = vmatmul.mubr.bf16.gmra.mrb[108].mxu0 %v3809_v58  ;;  %2320 = vmatmul.mubr.bf16.gmra.mrb[108].mxu1 %v3810_v59  ;;  %v3829_v58 = vld [vmem:[%s3938_s19 + $0x330] ss:$36 sps:$4 sm:$0xff]   ;;  %v3830_v59 = vld [vmem:[%s3938_s19 + $0x218] ss:$36 sps:$4 sm:$0xff]   ;;  %v3833_v3 = vld [vmem:[%s3938_s19 + $0x260] ss:$36 sps:$4 sm:$0xff]  }
  0xff   : > { %2327 = vmatprep.mubr.bf16.mxu1 %v3811_v0  ;;  %3514 = vmatprep.mubr.bf16.mxu0 %v3813_v1 }
 0x101   : > { %v3048_v6 = vpop.f32.mrb[4].mxu0  ;;  %v3120_v7 = vpop.f32.mrb[4].mxu1 }
 0x102   : > { %v3049_v8 = vpop.f32.mrb[5].mxu0  ;;  %v3121_v9 = vpop.f32.mrb[5].mxu1 }
 0x103   : > { %v4253_v12 = vadd.f32 %v3049_v8, %v3048_v6  ;;  %v4255_v13 = vadd.f32 %v3121_v9, %v3120_v7  ;;  %v3051_v14 = vpop.f32.mrb[6].mxu0  ;;  %v3123_v15 = vpop.f32.mrb[6].mxu1 }
 0x104   : > { %v3052_v18 = vpop.f32.mrb[7].mxu0  ;;  %v3124_v19 = vpop.f32.mrb[7].mxu1 }
 0x105   : > { %v4259_v20 = vadd.f32 %v3052_v18, %v3051_v14  ;;  %v4261_v21 = vadd.f32 %v3124_v19, %v3123_v15  ;;  %v3834_v18 = vld [vmem:[%s3938_s19 + $0x378] ss:$36 sps:$4 sm:$0xff]   ;;  %v3835_v19 = vld [vmem:[%s3938_s19 + $0x2a8] ss:$36 sps:$4 sm:$0xff]  }
 0x106   : > { %2328 = vmatmul.mubr.bf16.gmra.mrb[112].mxu1 %v3814_v10  ;;  %3515 = vmatmul.mubr.bf16.vlgmr.msra.gmra.mrb[112].mxu0 %v3815_v11 }
 0x107   : > { %2335 = vmatprep.mubr.bf16.mxu1 %v3816_v16  ;;  %3518 = vmatprep.mubr.bf16.mxu0 %v3818_v17 }
 0x109   : > { %v3054_v22 = vpop.f32.mrb[8].mxu0  ;;  %v3126_v23 = vpop.f32.mrb[8].mxu1 }
 0x10a   : > { %v3055_v24 = vpop.f32.mrb[9].mxu0  ;;  %v3127_v25 = vpop.f32.mrb[9].mxu1 }
 0x10b   : > { %v4265_v28 = vadd.f32 %v3055_v24, %v3054_v22  ;;  %v4267_v29 = vadd.f32 %v3127_v25, %v3126_v23  ;;  %v3057_v30 = vpop.f32.mrb[10].mxu0  ;;  %v3129_v31 = vpop.f32.mrb[10].mxu1  ;;  %v3836_v25 = vld [vmem:[%s3938_s19 + $0x3c4] ss:$36 sps:$4 sm:$0xff]  }
 0x10c   : > { %v3058_v34 = vpop.f32.mrb[11].mxu0  ;;  %v3130_v35 = vpop.f32.mrb[11].mxu1 }
 0x10d   : > { %v4271_v36 = vadd.f32 %v3058_v34, %v3057_v30  ;;  %v4273_v37 = vadd.f32 %v3130_v35, %v3129_v31 }
 0x10e   : > { %2336 = vmatmul.mubr.bf16.gmra.mrb[116].mxu1 %v3819_v26  ;;  %3519 = vmatmul.mubr.bf16.gmra.mrb[116].mxu0 %v3820_v27  ;;  %v3838_v26 = vld [vmem:[%s3938_s19 + $0x2f0] ss:$36 sps:$4 sm:$0xff]  }
 0x10f   : > { %2343 = vmatprep.mubr.bf16.mxu1 %v3821_v32  ;;  %3522 = vmatprep.mubr.bf16.mxu0 %v3823_v33 }
 0x111   : > { %v3060_v38 = vpop.f32.mrb[12].mxu0  ;;  %v3132_v39 = vpop.f32.mrb[12].mxu1 }
 0x112   : > { %v3061_v40 = vpop.f32.mrb[13].mxu0  ;;  %v3133_v41 = vpop.f32.mrb[13].mxu1 }
 0x113   : > { %v4277_v44 = vadd.f32 %v3061_v40, %v3060_v38  ;;  %v4279_v45 = vadd.f32 %v3133_v41, %v3132_v39  ;;  %v3063_v46 = vpop.f32.mrb[14].mxu0  ;;  %v3135_v47 = vpop.f32.mrb[14].mxu1  ;;  %v3839_v40 = vld [vmem:[%s3938_s19 + $0x3c0] ss:$36 sps:$4 sm:$0xff]   ;;  %v3840_v41 = vld [vmem:[%s3938_s19 + $0x338] ss:$36 sps:$4 sm:$0xff]  }
 0x114   : > { %v3064_v50 = vpop.f32.mrb[15].mxu0  ;;  %v3136_v51 = vpop.f32.mrb[15].mxu1 }
 0x115   : > { %v4283_v52 = vadd.f32 %v3064_v50, %v3063_v46  ;;  %v4285_v53 = vadd.f32 %v3136_v51, %v3135_v47  ;;  %v3841_v47 = vld [vmem:[%s3938_s19 + $0x40c] ss:$36 sps:$4 sm:$0xff]  }
 0x116   : > { %2344 = vmatmul.mubr.bf16.gmra.mrb[120].mxu1 %v3824_v42  ;;  %3523 = vmatmul.mubr.bf16.gmra.mrb[120].mxu0 %v3825_v43 }
 0x117   : > { %2351 = vmatprep.mubr.bf16.mxu1 %v3826_v48  ;;  %3526 = vmatprep.mubr.bf16.mxu0 %v3828_v49  ;;  %v3843_v48 = vld [vmem:[%s3938_s19 + $0x380] ss:$36 sps:$4 sm:$0xff]  }
 0x119   : > { %v3066_v54 = vpop.f32.mrb[16].mxu0  ;;  %v3154_v55 = vpop.f32.mrb[16].mxu1 }
 0x11a   : > { %v3067_v56 = vpop.f32.mrb[17].mxu0  ;;  %v3155_v57 = vpop.f32.mrb[17].mxu1 }
 0x11b   : > { %v4289_v62 = vadd.f32 %v3067_v56, %v3066_v54  ;;  %v3156_v63 = vadd.f32 %v3155_v57, %v3154_v55  ;;  %v3069_v0 = vpop.f32.mrb[18].mxu0  ;;  %v3157_v1 = vpop.f32.mrb[18].mxu1 }
 0x11c   : > { %v3070_v6 = vpop.f32.mrb[19].mxu0  ;;  %v3158_v7 = vpop.f32.mrb[19].mxu1 }
 0x11d   : > { %v4294_v8 = vadd.f32 %v3156_v63, %v4241_v60  ;;  %v4296_v9 = vadd.f32 %v3070_v6, %v3069_v0  ;;  %v3159_v10 = vadd.f32 %v3158_v7, %v3157_v1  ;;  %v3844_v63 = vld [vmem:[%s3938_s19 + $0x408] ss:$36 sps:$4 sm:$0xff]   ;;  %v3846_v6 = vld [vmem:[%s3938_s19 + $0x454] ss:$36 sps:$4 sm:$0xff]  }
 0x11e   : > { %2352 = vmatmul.mubr.bf16.gmra.mrb[124].mxu1 %v3829_v58  ;;  %3527 = vmatmul.mubr.bf16.gmra.mrb[124].mxu0 %v3830_v59  ;;  %v3845_v0 = vld [vmem:[%s3938_s19 + $0x3c8] ss:$36 sps:$4 sm:$0xff]   ;;  %v3848_v7 = vld [vmem:[%s3938_s19 + $0x410] ss:$36 sps:$4 sm:$0xff]  }
 0x11f   : > { %v4299_v11 = vadd.f32 %v3159_v10, %v4247_v4  ;;  %2359 = vmatprep.mubr.bf16.mxu1 %v3831_v2  ;;  %3530 = vmatprep.mubr.bf16.mxu0 %v3833_v3 }
 0x121   : > { %v3072_v14 = vpop.f32.mrb[20].mxu0  ;;  %v3160_v15 = vpop.f32.mrb[20].mxu1 }
 0x122   : > { %v3073_v16 = vpop.f32.mrb[21].mxu0  ;;  %v3161_v17 = vpop.f32.mrb[21].mxu1 }
 0x123   : > { %v4303_v60 = vadd.f32 %v3073_v16, %v3072_v14  ;;  %v3162_v22 = vadd.f32 %v3161_v17, %v3160_v15  ;;  %v3075_v23 = vpop.f32.mrb[22].mxu0  ;;  %v3163_v24 = vpop.f32.mrb[22].mxu1 }
 0x124   : > { %v3076_v27 = vpop.f32.mrb[23].mxu0  ;;  %v3164_v4 = vpop.f32.mrb[23].mxu1 }
 0x125   : > { %v4308_v30 = vadd.f32 %v3162_v22, %v4253_v12  ;;  %v4310_v31 = vadd.f32 %v3076_v27, %v3075_v23  ;;  %v3165_v32 = vadd.f32 %v3164_v4, %v3163_v24  ;;  %v3849_v24 = vld [vmem:[%s3938_s19 + $0x450] ss:$36 sps:$4 sm:$0xff]  }
 0x126   : > { %2360 = vmatmul.mubr.bf16.gmra.mrb[128].mxu1 %v3834_v18  ;;  %3531 = vmatmul.mubr.bf16.gmra.mrb[128].mxu0 %v3835_v19 }
 0x127   : > { %v4313_v33 = vadd.f32 %v3165_v32, %v4259_v20  ;;  %2367 = vmatprep.mubr.bf16.mxu1 %v3836_v25  ;;  %3534 = vmatprep.mubr.bf16.mxu0 %v3838_v26  ;;  %v3850_v25 = vld [vmem:[%s3938_s19 + $0x458] ss:$36 sps:$4 sm:$0xff]   ;;  %s2807_s19 = sshll.u32 %s4678_s23, 3 }
 0x128   : > { %s4575_s15 = scalar_lea.vmem %s4674_s4, %s2807_s19 }
 0x129   : > { %v3078_v34 = vpop.f32.mrb[24].mxu0  ;;  %v3166_v35 = vpop.f32.mrb[24].mxu1 }
 0x12a   : > { %v3079_v38 = vpop.f32.mrb[25].mxu0  ;;  %v3167_v39 = vpop.f32.mrb[25].mxu1 }
 0x12b   : > { %v4317_v12 = vadd.f32 %v3079_v38, %v3078_v34  ;;  %v3168_v42 = vadd.f32 %v3167_v39, %v3166_v35  ;;  %v3081_v43 = vpop.f32.mrb[26].mxu0  ;;  %v3169_v46 = vpop.f32.mrb[26].mxu1 }
 0x12c   : > { %v3082_v49 = vpop.f32.mrb[27].mxu0  ;;  %v3170_v20 = vpop.f32.mrb[27].mxu1 }
 0x12d   : > { %v4322_v50 = vadd.f32 %v3168_v42, %v4265_v28  ;;  %v4324_v51 = vadd.f32 %v3082_v49, %v3081_v43  ;;  %v3171_v54 = vadd.f32 %v3170_v20, %v3169_v46 }
 0x12e   : > { %2368 = vmatmul.mubr.bf16.gmra.mrb[132].mxu1 %v3839_v40  ;;  %3535 = vmatmul.mubr.bf16.gmra.mrb[132].mxu0 %v3840_v41 }
 0x12f   : > { %v4327_v55 = vadd.f32 %v3171_v54, %v4271_v36  ;;  %2375 = vmatprep.mubr.bf16.mxu1 %v3841_v47  ;;  %3538 = vmatprep.mubr.bf16.mxu0 %v3843_v48 }
 0x131   : > { %v3084_v56 = vpop.f32.mrb[28].mxu0  ;;  %v3172_v57 = vpop.f32.mrb[28].mxu1 }
 0x132   : > { %v3085_v58 = vpop.f32.mrb[29].mxu0  ;;  %v3173_v59 = vpop.f32.mrb[29].mxu1 }
 0x133   : > { %v4331_v28 = vadd.f32 %v3085_v58, %v3084_v56  ;;  %v3174_v1 = vadd.f32 %v3173_v59, %v3172_v57  ;;  %v3087_v2 = vpop.f32.mrb[30].mxu0  ;;  %v3175_v3 = vpop.f32.mrb[30].mxu1 }
 0x134   : > { %v3088_v10 = vpop.f32.mrb[31].mxu0  ;;  %v3176_v36 = vpop.f32.mrb[31].mxu1 }
 0x135   : > { %v4336_v14 = vadd.f32 %v3174_v1, %v4277_v44  ;;  %v4338_v15 = vadd.f32 %v3088_v10, %v3087_v2  ;;  %v3177_v16 = vadd.f32 %v3176_v36, %v3175_v3 }
 0x136   : > { %2376 = vmatmul.mubr.bf16.gmra.mrb[136].mxu1 %v3844_v63  ;;  %3539 = vmatmul.mubr.bf16.gmra.mrb[136].mxu0 %v3845_v0 }
 0x137   : > { %v4341_v17 = vadd.f32 %v3177_v16, %v4283_v52  ;;  %2383 = vmatprep.mubr.bf16.mxu1 %v3846_v6  ;;  %3542 = vmatprep.mubr.bf16.mxu0 %v3848_v7 }
 0x139   : > { %v3090_v18 = vpop.f32.mrb[32].mxu0  ;;  %v3178_v19 = vpop.f32.mrb[32].mxu1 }
 0x13a   : > { %v3091_v22 = vpop.f32.mrb[33].mxu0  ;;  %v3179_v23 = vpop.f32.mrb[33].mxu1 }
 0x13b   : > { %v4345_v26 = vadd.f32 %v3091_v22, %v3090_v18  ;;  %v3180_v44 = vadd.f32 %v3179_v23, %v3178_v19  ;;  %v3093_v27 = vpop.f32.mrb[34].mxu0  ;;  %v3181_v4 = vpop.f32.mrb[34].mxu1 }
 0x13c   : > { %v3094_v32 = vpop.f32.mrb[35].mxu0  ;;  %v3182_v34 = vpop.f32.mrb[35].mxu1 }
 0x13d   : > { %v4348_v35 = vadd.f32 %v3180_v44, %v4289_v62  ;;  %v3095_v52 = vadd.f32 %v3094_v32, %v3093_v27  ;;  %v3183_v38 = vadd.f32 %v3182_v34, %v3181_v4 }
 0x13e   : > { %2384 = vmatmul.mubr.bf16.gmra.mrb[140].mxu1 %v3849_v24  ;;  %3543 = vmatmul.mubr.bf16.gmra.mrb[140].mxu0 %v3850_v25 }
 0x13f   : > { %v4351_v39 = vadd.f32 %v3183_v38, %v4296_v9 }
 0x141   : > { %v3096_v40 = vpop.f32.mrb[36].mxu0  ;;  %v3184_v41 = vpop.f32.mrb[36].mxu1 }
 0x142   : > { %v3097_v42 = vpop.f32.mrb[37].mxu0  ;;  %v3185_v43 = vpop.f32.mrb[37].mxu1 }
 0x143   : > { %v4353_v46 = vadd.f32 %v3097_v42, %v3096_v40  ;;  %v3186_v47 = vadd.f32 %v3185_v43, %v3184_v41  ;;  %v3099_v48 = vpop.f32.mrb[38].mxu0  ;;  %v3187_v49 = vpop.f32.mrb[38].mxu1 }
 0x144   : > { %v3100_v20 = vpop.f32.mrb[39].mxu0  ;;  %v3188_v54 = vpop.f32.mrb[39].mxu1 }
 0x145   : > { %v4356_v62 = vadd.f32 %v3186_v47, %v4303_v60  ;;  %v3101_v56 = vadd.f32 %v3100_v20, %v3099_v48  ;;  %v3189_v57 = vadd.f32 %v3188_v54, %v3187_v49 }
 0x147   : > { %v4359_v58 = vadd.f32 %v3189_v57, %v4310_v31 }
 0x149   : > { %v3102_v9 = vpop.f32.mrb[40].mxu0  ;;  %v3190_v59 = vpop.f32.mrb[40].mxu1 }
 0x14a   : > { %v3103_v63 = vpop.f32.mrb[41].mxu0  ;;  %v3191_v0 = vpop.f32.mrb[41].mxu1 }
 0x14b   : > { %v4361_v1 = vadd.f32 %v3103_v63, %v3102_v9  ;;  %v3192_v2 = vadd.f32 %v3191_v0, %v3190_v59  ;;  %v3105_v3 = vpop.f32.mrb[42].mxu0  ;;  %v3193_v6 = vpop.f32.mrb[42].mxu1 }
 0x14c   : > { %v3106_v7 = vpop.f32.mrb[43].mxu0  ;;  %v3194_v10 = vpop.f32.mrb[43].mxu1 }
 0x14d   : > { %v4364_v36 = vadd.f32 %v3192_v2, %v4317_v12  ;;  %v4366_v60 = vadd.f32 %v3106_v7, %v3105_v3  ;;  %v3195_v16 = vadd.f32 %v3194_v10, %v3193_v6 }
 0x14f   : > { %v4369_v31 = vadd.f32 %v3195_v16, %v4324_v51 }
 0x151   : > { %v3108_v18 = vpop.f32.mrb[44].mxu0  ;;  %v3196_v19 = vpop.f32.mrb[44].mxu1 }
 0x152   : > { %v3109_v22 = vpop.f32.mrb[45].mxu0  ;;  %v3197_v23 = vpop.f32.mrb[45].mxu1 }
 0x153   : > { %v4371_v24 = vadd.f32 %v3109_v22, %v3108_v18  ;;  %v3198_v25 = vadd.f32 %v3197_v23, %v3196_v19  ;;  %v3111_v44 = vpop.f32.mrb[46].mxu0  ;;  %v3199_v27 = vpop.f32.mrb[46].mxu1 }
 0x154   : > { %v3112_v4 = vpop.f32.mrb[47].mxu0  ;;  %v3200_v32 = vpop.f32.mrb[47].mxu1 }
 0x155   : > { %v4374_v12 = vadd.f32 %v3198_v25, %v4331_v28  ;;  %v4376_v34 = vadd.f32 %v3112_v4, %v3111_v44  ;;  %v3201_v38 = vadd.f32 %v3200_v32, %v3199_v27 }
 0x157   : > { %v4379_v51 = vadd.f32 %v3201_v38, %v4338_v15 }
 0x159   : > { %v3202_v40 = vpop.f32.mrb[48].mxu1  ;;  %v3266_v41 = vpop.f32.mrb[48].mxu0 }
 0x15a   : > { %v3203_v42 = vpop.f32.mrb[49].mxu1  ;;  %v3267_v43 = vpop.f32.mrb[49].mxu0 }
 0x15b   : > { %v3204_v47 = vadd.f32 %v3203_v42, %v3202_v40  ;;  %v3268_v48 = vadd.f32 %v3267_v43, %v3266_v41  ;;  %v3205_v49 = vpop.f32.mrb[50].mxu1  ;;  %v3269_v20 = vpop.f32.mrb[50].mxu0 }
 0x15c   : > { %v3206_v54 = vpop.f32.mrb[51].mxu1  ;;  %v3270_v57 = vpop.f32.mrb[51].mxu0 }
 0x15d   : > { %v4382_v9 = vadd.f32 %v3204_v47, %v4345_v26  ;;  %v4385_v28 = vadd.f32 %v3268_v48, %v4294_v8  ;;  %v3207_v59 = vadd.f32 %v3206_v54, %v3205_v49  ;;  %v3271_v63 = vadd.f32 %v3270_v57, %v3269_v20 }
 0x15f   : > { %v4387_v15 = vadd.f32 %v3207_v59, %v3095_v52  ;;  %v4390_v0 = vadd.f32 %v3271_v63, %v4299_v11 }
 0x161   : > { %v3208_v2 = vpop.f32.mrb[52].mxu1  ;;  %v3272_v3 = vpop.f32.mrb[52].mxu0 }
 0x162   : > { %v3209_v6 = vpop.f32.mrb[53].mxu1  ;;  %v3273_v7 = vpop.f32.mrb[53].mxu0 }
 0x163   : > { %v3210_v10 = vadd.f32 %v3209_v6, %v3208_v2  ;;  %v3274_v16 = vadd.f32 %v3273_v7, %v3272_v3  ;;  %v3211_v18 = vpop.f32.mrb[54].mxu1  ;;  %v3275_v19 = vpop.f32.mrb[54].mxu0 }
 0x164   : > { %v3212_v26 = vpop.f32.mrb[55].mxu1  ;;  %v3276_v22 = vpop.f32.mrb[55].mxu0 }
 0x165   : > { %v4393_v8 = vadd.f32 %v3210_v10, %v4353_v46  ;;  %v4396_v23 = vadd.f32 %v3274_v16, %v4308_v30  ;;  %v3213_v52 = vadd.f32 %v3212_v26, %v3211_v18  ;;  %v3277_v25 = vadd.f32 %v3276_v22, %v3275_v19 }
 0x167   : > { %v4398_v11 = vadd.f32 %v3213_v52, %v3101_v56  ;;  %v4401_v44 = vadd.f32 %v3277_v25, %v4313_v33 }
 0x169   : > { %v3214_v27 = vpop.f32.mrb[56].mxu1  ;;  %v3278_v4 = vpop.f32.mrb[56].mxu0 }
 0x16a   : > { %v3215_v32 = vpop.f32.mrb[57].mxu1  ;;  %v3279_v38 = vpop.f32.mrb[57].mxu0 }
 0x16b   : > { %v3216_v40 = vadd.f32 %v3215_v32, %v3214_v27  ;;  %v3280_v41 = vadd.f32 %v3279_v38, %v3278_v4  ;;  %v3217_v42 = vpop.f32.mrb[58].mxu1  ;;  %v3281_v43 = vpop.f32.mrb[58].mxu0 }
 0x16c   : > { %v3218_v46 = vpop.f32.mrb[59].mxu1  ;;  %v3282_v47 = vpop.f32.mrb[59].mxu0 }
 0x16d   : > { %v4404_v30 = vadd.f32 %v3216_v40, %v4361_v1  ;;  %v4407_v48 = vadd.f32 %v3280_v41, %v4322_v50  ;;  %v3219_v56 = vadd.f32 %v3218_v46, %v3217_v42  ;;  %v3283_v49 = vadd.f32 %v3282_v47, %v3281_v43 }
 0x16f   : > { %v4410_v33 = vadd.f32 %v3219_v56, %v4366_v60  ;;  %v4413_v20 = vadd.f32 %v3283_v49, %v4327_v55 }
 0x171   : > { %v3220_v54 = vpop.f32.mrb[60].mxu1  ;;  %v3284_v57 = vpop.f32.mrb[60].mxu0 }
 0x172   : > { %v3221_v59 = vpop.f32.mrb[61].mxu1  ;;  %v3285_v63 = vpop.f32.mrb[61].mxu0 }
 0x173   : > { %v3222_v2 = vadd.f32 %v3221_v59, %v3220_v54  ;;  %v3286_v3 = vadd.f32 %v3285_v63, %v3284_v57  ;;  %v3223_v6 = vpop.f32.mrb[62].mxu1  ;;  %v3287_v1 = vpop.f32.mrb[62].mxu0 }
 0x174   : > { %v3224_v7 = vpop.f32.mrb[63].mxu1  ;;  %v3288_v10 = vpop.f32.mrb[63].mxu0 }
 0x175   : > { %v4416_v50 = vadd.f32 %v3222_v2, %v4371_v24  ;;  %v4419_v16 = vadd.f32 %v3286_v3, %v4336_v14  ;;  %v3225_v60 = vadd.f32 %v3224_v7, %v3223_v6  ;;  %v3289_v18 = vadd.f32 %v3288_v10, %v3287_v1 }
 0x177   : > { %v4422_v55 = vadd.f32 %v3225_v60, %v4376_v34  ;;  %v4425_v19 = vadd.f32 %v3289_v18, %v4341_v17 }
 0x179   : > { %v3226_v26 = vpop.f32.mrb[64].mxu1  ;;  %v3290_v22 = vpop.f32.mrb[64].mxu0 }
 0x17a   : > { %v3227_v52 = vpop.f32.mrb[65].mxu1  ;;  %v3291_v25 = vpop.f32.mrb[65].mxu0 }
 0x17b   : > { %v3228_v27 = vadd.f32 %v3227_v52, %v3226_v26  ;;  %v3292_v4 = vadd.f32 %v3291_v25, %v3290_v22  ;;  %v3229_v32 = vpop.f32.mrb[66].mxu1  ;;  %v3293_v24 = vpop.f32.mrb[66].mxu0 }
 0x17c   : > { %v3230_v38 = vpop.f32.mrb[67].mxu1  ;;  %v3294_v40 = vpop.f32.mrb[67].mxu0 }
 0x17d   : > { %v4428_v14 = vadd.f32 %v3228_v27, %v4243_v61  ;;  %v4431_v41 = vadd.f32 %v3292_v4, %v4348_v35  ;;  %v3231_v34 = vadd.f32 %v3230_v38, %v3229_v32  ;;  %v3295_v42 = vadd.f32 %v3294_v40, %v3293_v24 }
 0x17f   : > { %v4434_v17 = vadd.f32 %v3231_v34, %v4249_v5  ;;  %v4437_v43 = vadd.f32 %v3295_v42, %v4351_v39 }
 0x181   : > { %v3232_v46 = vpop.f32.mrb[68].mxu1  ;;  %v3296_v47 = vpop.f32.mrb[68].mxu0 }
 0x182   : > { %v3233_v56 = vpop.f32.mrb[69].mxu1  ;;  %v3297_v49 = vpop.f32.mrb[69].mxu0 }
 0x183   : > { %v3234_v54 = vadd.f32 %v3233_v56, %v3232_v46  ;;  %v3298_v57 = vadd.f32 %v3297_v49, %v3296_v47  ;;  %v3235_v59 = vpop.f32.mrb[70].mxu1  ;;  %v3299_v61 = vpop.f32.mrb[70].mxu0 }
 0x184   : > { %v3236_v63 = vpop.f32.mrb[71].mxu1  ;;  %v3300_v2 = vpop.f32.mrb[71].mxu0 }
 0x185   : > { %v4440_v35 = vadd.f32 %v3234_v54, %v4255_v13  ;;  %v4443_v3 = vadd.f32 %v3298_v57, %v4356_v62  ;;  %v3237_v5 = vadd.f32 %v3236_v63, %v3235_v59  ;;  %v3301_v6 = vadd.f32 %v3300_v2, %v3299_v61 }
 0x187   : > { %v4446_v39 = vadd.f32 %v3237_v5, %v4261_v21  ;;  %v4449_v1 = vadd.f32 %v3301_v6, %v4359_v58 }
 0x189   : > { %v3238_v7 = vpop.f32.mrb[72].mxu1  ;;  %v3302_v10 = vpop.f32.mrb[72].mxu0 }
 0x18a   : > { %v3239_v60 = vpop.f32.mrb[73].mxu1  ;;  %v3303_v18 = vpop.f32.mrb[73].mxu0 }
 0x18b   : > { %v3240_v26 = vadd.f32 %v3239_v60, %v3238_v7  ;;  %v3304_v22 = vadd.f32 %v3303_v18, %v3302_v10  ;;  %v3241_v52 = vpop.f32.mrb[74].mxu1  ;;  %v3305_v13 = vpop.f32.mrb[74].mxu0 }
 0x18c   : > { %v3242_v25 = vpop.f32.mrb[75].mxu1  ;;  %v3306_v27 = vpop.f32.mrb[75].mxu0 }
 0x18d   : > { %v4452_v62 = vadd.f32 %v3240_v26, %v4267_v29  ;;  %v4455_v4 = vadd.f32 %v3304_v22, %v4364_v36  ;;  %v3243_v21 = vadd.f32 %v3242_v25, %v3241_v52  ;;  %v3307_v32 = vadd.f32 %v3306_v27, %v3305_v13 }
 0x18f   : > { %v4458_v58 = vadd.f32 %v3243_v21, %v4273_v37  ;;  %v4461_v24 = vadd.f32 %v3307_v32, %v4369_v31 }
 0x191   : > { %v3244_v38 = vpop.f32.mrb[76].mxu1  ;;  %v3308_v40 = vpop.f32.mrb[76].mxu0 }
 0x192   : > { %v3245_v34 = vpop.f32.mrb[77].mxu1  ;;  %v3309_v42 = vpop.f32.mrb[77].mxu0 }
 0x193   : > { %v3246_v46 = vadd.f32 %v3245_v34, %v3244_v38  ;;  %v3310_v47 = vadd.f32 %v3309_v42, %v3308_v40  ;;  %v3247_v56 = vpop.f32.mrb[78].mxu1  ;;  %v3311_v29 = vpop.f32.mrb[78].mxu0 }
 0x194   : > { %v3248_v49 = vpop.f32.mrb[79].mxu1  ;;  %v3312_v54 = vpop.f32.mrb[79].mxu0 }
 0x195   : > { %v4464_v36 = vadd.f32 %v3246_v46, %v4279_v45  ;;  %v4467_v57 = vadd.f32 %v3310_v47, %v4374_v12  ;;  %v3249_v37 = vadd.f32 %v3248_v49, %v3247_v56  ;;  %v3313_v59 = vadd.f32 %v3312_v54, %v3311_v29 }
 0x197   : > { %v4470_v31 = vadd.f32 %v3249_v37, %v4285_v53  ;;  %v4473_v61 = vadd.f32 %v3313_v59, %v4379_v51 }
 0x199   : > { %v3314_v63 = vpop.f32.mrb[80].mxu0  ;;  %v3378_v2 = vpop.f32.mrb[80].mxu1 }
 0x19a   : > { %v3315_v5 = vpop.f32.mrb[81].mxu0  ;;  %v3379_v6 = vpop.f32.mrb[81].mxu1 }
 0x19b   : > { %v3316_v7 = vadd.f32 %v3315_v5, %v3314_v63  ;;  %v3380_v10 = vadd.f32 %v3379_v6, %v3378_v2  ;;  %v3317_v60 = vpop.f32.mrb[82].mxu0  ;;  %v3381_v45 = vpop.f32.mrb[82].mxu1 }
 0x19c   : > { %v3318_v18 = vpop.f32.mrb[83].mxu0  ;;  %v3382_v26 = vpop.f32.mrb[83].mxu1 }
 0x19d   : > { %v4476_v12 = vadd.f32 %v3316_v7, %v4382_v9  ;;  %v3319_v22 = vadd.f32 %v3318_v18, %v3317_v60  ;;  %v3383_v52 = vadd.f32 %v3382_v26, %v3381_v45  ;;  %v4479_v53 = vadd.f32 %v3380_v10, %v4385_v28 }
 0x19f   : > { %v4482_v51 = vadd.f32 %v3319_v22, %v4387_v15  ;;  %v4485_v13 = vadd.f32 %v3383_v52, %v4390_v0 }
 0x1a1   : > { %v3320_v25 = vpop.f32.mrb[84].mxu0  ;;  %v3384_v27 = vpop.f32.mrb[84].mxu1 }
 0x1a2   : > { %v3321_v21 = vpop.f32.mrb[85].mxu0  ;;  %v3385_v32 = vpop.f32.mrb[85].mxu1 }
 0x1a3   : > { %v3322_v38 = vadd.f32 %v3321_v21, %v3320_v25  ;;  %v3386_v40 = vadd.f32 %v3385_v32, %v3384_v27  ;;  %v3323_v34 = vpop.f32.mrb[86].mxu0  ;;  %v3387_v9 = vpop.f32.mrb[86].mxu1 }
 0x1a4   : > { %v3324_v42 = vpop.f32.mrb[87].mxu0  ;;  %v3388_v46 = vpop.f32.mrb[87].mxu1 }
 0x1a5   : > { %v4488_v47 = vadd.f32 %v3322_v38, %v4393_v8  ;;  %v3325_v28 = vadd.f32 %v3324_v42, %v3323_v34  ;;  %v3389_v56 = vadd.f32 %v3388_v46, %v3387_v9  ;;  %v4491_v15 = vadd.f32 %v3386_v40, %v4396_v23 }
 0x1a7   : > { %v4494_v0 = vadd.f32 %v3325_v28, %v4398_v11  ;;  %v4497_v29 = vadd.f32 %v3389_v56, %v4401_v44 }
 0x1a9   : > { %v3326_v49 = vpop.f32.mrb[88].mxu0  ;;  %v3390_v54 = vpop.f32.mrb[88].mxu1 }
 0x1aa   : > { %v3327_v37 = vpop.f32.mrb[89].mxu0  ;;  %v3391_v59 = vpop.f32.mrb[89].mxu1 }
 0x1ab   : > { %v3328_v63 = vadd.f32 %v3327_v37, %v3326_v49  ;;  %v3392_v2 = vadd.f32 %v3391_v59, %v3390_v54  ;;  %v3329_v5 = vpop.f32.mrb[90].mxu0  ;;  %v3393_v8 = vpop.f32.mrb[90].mxu1 }
 0x1ac   : > { %v3330_v6 = vpop.f32.mrb[91].mxu0  ;;  %v3394_v7 = vpop.f32.mrb[91].mxu1 }
 0x1ad   : > { %v4500_v10 = vadd.f32 %v3328_v63, %v4404_v30  ;;  %v3331_v23 = vadd.f32 %v3330_v6, %v3329_v5  ;;  %v3395_v60 = vadd.f32 %v3394_v7, %v3393_v8  ;;  %v4503_v11 = vadd.f32 %v3392_v2, %v4407_v48 }
 0x1af   : > { %v4506_v44 = vadd.f32 %v3331_v23, %v4410_v33  ;;  %v4509_v45 = vadd.f32 %v3395_v60, %v4413_v20 }
 0x1b1   : > { %v3332_v18 = vpop.f32.mrb[92].mxu0  ;;  %v3396_v26 = vpop.f32.mrb[92].mxu1 }
 0x1b2   : > { %v3333_v22 = vpop.f32.mrb[93].mxu0  ;;  %v3397_v52 = vpop.f32.mrb[93].mxu1 }
 0x1b3   : > { %v3334_v25 = vadd.f32 %v3333_v22, %v3332_v18  ;;  %v3398_v27 = vadd.f32 %v3397_v52, %v3396_v26  ;;  %v3335_v21 = vpop.f32.mrb[94].mxu0  ;;  %v3399_v30 = vpop.f32.mrb[94].mxu1 }
 0x1b4   : > { %v3336_v32 = vpop.f32.mrb[95].mxu0  ;;  %v3400_v38 = vpop.f32.mrb[95].mxu1 }
 0x1b5   : > { %v4512_v40 = vadd.f32 %v3334_v25, %v4416_v50  ;;  %v3337_v48 = vadd.f32 %v3336_v32, %v3335_v21  ;;  %v3401_v34 = vadd.f32 %v3400_v38, %v3399_v30  ;;  %v4515_v33 = vadd.f32 %v3398_v27, %v4419_v16 }
 0x1b7   : > { %v4518_v20 = vadd.f32 %v3337_v48, %v4422_v55  ;;  %v4521_v9 = vadd.f32 %v3401_v34, %v4425_v19 }
 0x1b9   : > { %v3338_v42 = vpop.f32.mrb[96].mxu0  ;;  %v3402_v46 = vpop.f32.mrb[96].mxu1 }
 0x1ba   : > { %v3339_v28 = vpop.f32.mrb[97].mxu0  ;;  %v3403_v56 = vpop.f32.mrb[97].mxu1 }
 0x1bb   : > { %v3340_v49 = vadd.f32 %v3339_v28, %v3338_v42  ;;  %v3404_v54 = vadd.f32 %v3403_v56, %v3402_v46  ;;  %v3341_v37 = vpop.f32.mrb[98].mxu0  ;;  %v3405_v50 = vpop.f32.mrb[98].mxu1 }
 0x1bc   : > { %v3342_v59 = vpop.f32.mrb[99].mxu0  ;;  %v3406_v63 = vpop.f32.mrb[99].mxu1 }
 0x1bd   : > { %v4524_v2 = vadd.f32 %v3340_v49, %v4428_v14  ;;  %v3343_v16 = vadd.f32 %v3342_v59, %v3341_v37  ;;  %v3407_v5 = vadd.f32 %v3406_v63, %v3405_v50  ;;  %v4527_v55 = vadd.f32 %v3404_v54, %v4431_v41 }
 0x1bf   : > { %v4530_v19 = vadd.f32 %v3343_v16, %v4434_v17  ;;  %v4533_v8 = vadd.f32 %v3407_v5, %v4437_v43 }
 0x1c1   : > { %v3344_v6 = vpop.f32.mrb[100].mxu0  ;;  %v3408_v7 = vpop.f32.mrb[100].mxu1 }
 0x1c2   : > { %v3345_v23 = vpop.f32.mrb[101].mxu0  ;;  %v3409_v60 = vpop.f32.mrb[101].mxu1 }
 0x1c3   : > { %v3346_v18 = vadd.f32 %v3345_v23, %v3344_v6  ;;  %v3410_v26 = vadd.f32 %v3409_v60, %v3408_v7  ;;  %v3347_v22 = vpop.f32.mrb[102].mxu0  ;;  %v3411_v14 = vpop.f32.mrb[102].mxu1 }
 0x1c4   : > { %v3348_v52 = vpop.f32.mrb[103].mxu0  ;;  %v3412_v25 = vpop.f32.mrb[103].mxu1 }
 0x1c5   : > { %v4536_v27 = vadd.f32 %v3346_v18, %v4440_v35  ;;  %v3349_v41 = vadd.f32 %v3348_v52, %v3347_v22  ;;  %v3413_v21 = vadd.f32 %v3412_v25, %v3411_v14  ;;  %v4539_v17 = vadd.f32 %v3410_v26, %v4443_v3 }
 0x1c7   : > { %v4542_v43 = vadd.f32 %v3349_v41, %v4446_v39  ;;  %v4545_v30 = vadd.f32 %v3413_v21, %v4449_v1 }
 0x1c9   : > { %v3350_v32 = vpop.f32.mrb[104].mxu0  ;;  %v3414_v38 = vpop.f32.mrb[104].mxu1 }
 0x1ca   : > { %v3351_v48 = vpop.f32.mrb[105].mxu0  ;;  %v3415_v34 = vpop.f32.mrb[105].mxu1 }
 0x1cb   : > { %v3352_v42 = vadd.f32 %v3351_v48, %v3350_v32  ;;  %v3416_v46 = vadd.f32 %v3415_v34, %v3414_v38  ;;  %v3353_v28 = vpop.f32.mrb[106].mxu0  ;;  %v3417_v35 = vpop.f32.mrb[106].mxu1 }
 0x1cc   : > { %v3354_v56 = vpop.f32.mrb[107].mxu0  ;;  %v3418_v49 = vpop.f32.mrb[107].mxu1 }
 0x1cd   : > { %v4548_v54 = vadd.f32 %v3352_v42, %v4452_v62  ;;  %v3355_v3 = vadd.f32 %v3354_v56, %v3353_v28  ;;  %v3419_v37 = vadd.f32 %v3418_v49, %v3417_v35  ;;  %v4551_v39 = vadd.f32 %v3416_v46, %v4455_v4 }
 0x1cf   : > { %v4554_v1 = vadd.f32 %v3355_v3, %v4458_v58  ;;  %v4557_v50 = vadd.f32 %v3419_v37, %v4461_v24 }
 0x1d1   : > { %v3356_v59 = vpop.f32.mrb[108].mxu0  ;;  %v3420_v63 = vpop.f32.mrb[108].mxu1 }
 0x1d2   : > { %v3357_v16 = vpop.f32.mrb[109].mxu0  ;;  %v3421_v5 = vpop.f32.mrb[109].mxu1 }
 0x1d3   : > { %v3358_v6 = vadd.f32 %v3357_v16, %v3356_v59  ;;  %v3422_v7 = vadd.f32 %v3421_v5, %v3420_v63  ;;  %v3359_v62 = vpop.f32.mrb[110].mxu0  ;;  %v3423_v23 = vpop.f32.mrb[110].mxu1 }
 0x1d4   : > { %v3360_v60 = vpop.f32.mrb[111].mxu0  ;;  %v3424_v18 = vpop.f32.mrb[111].mxu1 }
 0x1d5   : > { %v4560_v4 = vadd.f32 %v3358_v6, %v4464_v36  ;;  %v3361_v26 = vadd.f32 %v3360_v60, %v3359_v62  ;;  %v3425_v58 = vadd.f32 %v3424_v18, %v3423_v23  ;;  %v4563_v22 = vadd.f32 %v3422_v7, %v4467_v57 }
 0x1d7   : > { %v4567_v24 = vadd.f32 %v3361_v26, %v4470_v31  ;;  %v4570_v14 = vadd.f32 %v3425_v58, %v4473_v61 }
 0x1d9   : > { %v3426_v52 = vpop.f32.mrb[112].mxu1  ;;  %v3516_v36 = vpop.f32.mrb[112].mxu0 }
 0x1da   : > { %v2435_v57 = vadd.f32 %v3516_v36, %v4491_v15  ;;  %v3427_v25 = vpop.f32.mrb[113].mxu1  ;;  %v2426_v41 = vpop.f32.mrb[113].mxu0 }
 0x1db   : > { %v3428_v31 = vadd.f32 %v3427_v25, %v3426_v52  ;;  %v2427_v21 = vadd.f32 %v2426_v41, %v4479_v53  ;;  %v3429_v61 = vpop.f32.mrb[114].mxu1  ;;  %v3517_v32 = vpop.f32.mrb[114].mxu0 }
 0x1dc   : > { %2555 = vst [vmem:[%s4575_s15 + $0x10] sm:$0xff] %v2435_v57  ;;  %v2438_v38 = vadd.f32 %v3517_v32, %v4497_v29  ;;  %v3430_v48 = vpop.f32.mrb[115].mxu1  ;;  %v2429_v34 = vpop.f32.mrb[115].mxu0  ;;  %v2625_v49 = vmul.f32 %v2435_v57, %v2435_v57 }
 0x1dd   : > { %2553 = vst [vmem:[%s4575_s15] sm:$0xff] %v2427_v21  ;;  %v3431_v42 = vadd.f32 %v3430_v48, %v3429_v61  ;;  %v2430_v46 = vadd.f32 %v2429_v34, %v4485_v13  ;;  %v4584_v28 = vadd.f32 %v3428_v31, %v4476_v12  ;;  %v2623_v15 = vmul.f32 %v2427_v21, %v2427_v21 }
 0x1de   : > { %2556 = vst [vmem:[%s4575_s15 + $0x18] sm:$0xff] %v2438_v38  ;;  %v2626_v63 = vmul.f32 %v2438_v38, %v2438_v38 }
 0x1df   : > { %2554 = vst [vmem:[%s4575_s15 + $0x8] sm:$0xff] %v2430_v46  ;;  %v2585_v35 = vadd.f32 %v2430_v46, %v2427_v21  ;;  %v2624_v56 = vmul.f32 %v2430_v46, %v2430_v46  ;;  %v4589_v53 = vadd.f32 %v3431_v42, %v4482_v51 }
 0x1e1   : > { %v2586_v29 = vadd.f32 %v2585_v35, %v2435_v57  ;;  %v2655_v3 = vadd.f32 %v2624_v56, %v2623_v15  ;;  %v3432_v37 = vpop.f32.mrb[116].mxu1  ;;  %v3520_v59 = vpop.f32.mrb[116].mxu0 }
 0x1e2   : > { %v2451_v13 = vadd.f32 %v3520_v59, %v4515_v33  ;;  %v3433_v12 = vpop.f32.mrb[117].mxu1  ;;  %v2442_v16 = vpop.f32.mrb[117].mxu0 }
 0x1e3   : > { %v2656_v5 = vadd.f32 %v2655_v3, %v2625_v49  ;;  %v3434_v6 = vadd.f32 %v3433_v12, %v3432_v37  ;;  %v2443_v7 = vadd.f32 %v2442_v16, %v4503_v11  ;;  %v2587_v62 = vadd.f32 %v2586_v29, %v2438_v38  ;;  %v3435_v51 = vpop.f32.mrb[118].mxu1  ;;  %v3521_v23 = vpop.f32.mrb[118].mxu0 }
 0x1e4   : > { %2559 = vst [vmem:[%s4575_s15 + $0x30] sm:$0xff] %v2451_v13  ;;  %v2454_v60 = vadd.f32 %v3521_v23, %v4521_v9  ;;  %v3436_v18 = vpop.f32.mrb[119].mxu1  ;;  %v2445_v26 = vpop.f32.mrb[119].mxu0  ;;  %v2629_v32 = vmul.f32 %v2451_v13, %v2451_v13 }
 0x1e5   : > { %2557 = vst [vmem:[%s4575_s15 + $0x20] sm:$0xff] %v2443_v7  ;;  %v2588_v58 = vadd.f32 %v2587_v62, %v2443_v7  ;;  %v2627_v52 = vmul.f32 %v2443_v7, %v2443_v7  ;;  %v2657_v33 = vadd.f32 %v2656_v5, %v2626_v63  ;;  %v3437_v36 = vadd.f32 %v3436_v18, %v3435_v51 }
 0x1e6   : > { %2560 = vst [vmem:[%s4575_s15 + $0x38] sm:$0xff] %v2454_v60  ;;  %v2446_v57 = vadd.f32 %v2445_v26, %v4509_v45  ;;  %v4599_v25 = vadd.f32 %v3434_v6, %v4488_v47  ;;  %v2630_v35 = vmul.f32 %v2454_v60, %v2454_v60 }
 0x1e7   : > { %v2658_v11 = vadd.f32 %v2657_v33, %v2627_v52  ;;  %v4602_v41 = vadd.f32 %v3437_v36, %v4494_v0 }
 0x1e8   : > { %2558 = vst [vmem:[%s4575_s15 + $0x28] sm:$0xff] %v2446_v57  ;;  %v2589_v31 = vadd.f32 %v2588_v58, %v2446_v57  ;;  %v2628_v9 = vmul.f32 %v2446_v57, %v2446_v57 }
 0x1e9   : > { %v3438_v21 = vpop.f32.mrb[120].mxu1  ;;  %v3524_v61 = vpop.f32.mrb[120].mxu0 }
 0x1ea   : > { %v2590_v38 = vadd.f32 %v2589_v31, %v2451_v13  ;;  %v2659_v48 = vadd.f32 %v2658_v11, %v2628_v9  ;;  %v2467_v34 = vadd.f32 %v3524_v61, %v4539_v17  ;;  %v3439_v45 = vpop.f32.mrb[121].mxu1  ;;  %v2458_v42 = vpop.f32.mrb[121].mxu0 }
 0x1eb   : > { %v3440_v47 = vadd.f32 %v3439_v45, %v3438_v21  ;;  %v2459_v46 = vadd.f32 %v2458_v42, %v4527_v55  ;;  %v3441_v15 = vpop.f32.mrb[122].mxu1  ;;  %v3525_v0 = vpop.f32.mrb[122].mxu0 }
 0x1ec   : > { %v2660_v56 = vadd.f32 %v2659_v48, %v2629_v32  ;;  %2563 = vst [vmem:[%s4575_s15 + $0x50] sm:$0xff] %v2467_v34  ;;  %v2591_v49 = vadd.f32 %v2590_v38, %v2454_v60  ;;  %v2470_v29 = vadd.f32 %v3525_v0, %v4545_v30  ;;  %v3442_v3 = vpop.f32.mrb[123].mxu1  ;;  %v2461_v37 = vpop.f32.mrb[123].mxu0  ;;  %v2633_v51 = vmul.f32 %v2467_v34, %v2467_v34 }
 0x1ed   : > { %2561 = vst [vmem:[%s4575_s15 + $0x40] sm:$0xff] %v2459_v46  ;;  %v2631_v59 = vmul.f32 %v2459_v46, %v2459_v46  ;;  %v3443_v17 = vadd.f32 %v3442_v3, %v3441_v15  ;;  %v2462_v63 = vadd.f32 %v2461_v37, %v4533_v8  ;;  %v4612_v13 = vadd.f32 %v3440_v47, %v4500_v10 }
 0x1ee   : > { %v2592_v55 = vadd.f32 %v2591_v49, %v2459_v46  ;;  %v2661_v12 = vadd.f32 %v2660_v56, %v2630_v35  ;;  %2564 = vst [vmem:[%s4575_s15 + $0x58] sm:$0xff] %v2470_v29  ;;  %v2634_v33 = vmul.f32 %v2470_v29, %v2470_v29 }
 0x1ef   : > { %2562 = vst [vmem:[%s4575_s15 + $0x48] sm:$0xff] %v2462_v63  ;;  %v2632_v16 = vmul.f32 %v2462_v63, %v2462_v63  ;;  %v4617_v5 = vadd.f32 %v3443_v17, %v4506_v44 }
 0x1f0   : > { %v2662_v6 = vadd.f32 %v2661_v12, %v2631_v59  ;;  %v2593_v30 = vadd.f32 %v2592_v55, %v2462_v63 }
 0x1f1   : > { %v3444_v7 = vpop.f32.mrb[124].mxu1  ;;  %v3528_v62 = vpop.f32.mrb[124].mxu0 }
 0x1f2   : > { %v2594_v23 = vadd.f32 %v2593_v30, %v2467_v34  ;;  %v2663_v8 = vadd.f32 %v2662_v6, %v2632_v16  ;;  %v2483_v10 = vadd.f32 %v3528_v62, %v4563_v22  ;;  %v3445_v60 = vpop.f32.mrb[125].mxu1  ;;  %v2474_v18 = vpop.f32.mrb[125].mxu0 }
 0x1f3   : > { %v3446_v26 = vadd.f32 %v3445_v60, %v3444_v7  ;;  %v2475_v58 = vadd.f32 %v2474_v18, %v4551_v39  ;;  %v3447_v52 = vpop.f32.mrb[126].mxu1  ;;  %v3529_v44 = vpop.f32.mrb[126].mxu0 }
 0x1f4   : > { %v2664_v36 = vadd.f32 %v2663_v8, %v2633_v51  ;;  %2567 = vst [vmem:[%s4575_s15 + $0x70] sm:$0xff] %v2483_v10  ;;  %v2595_v57 = vadd.f32 %v2594_v23, %v2470_v29  ;;  %v2486_v11 = vadd.f32 %v3529_v44, %v4570_v14  ;;  %v3448_v31 = vpop.f32.mrb[127].mxu1  ;;  %v2477_v9 = vpop.f32.mrb[127].mxu0  ;;  %v2637_v46 = vmul.f32 %v2483_v10, %v2483_v10 }
 0x1f5   : > { %2565 = vst [vmem:[%s4575_s15 + $0x60] sm:$0xff] %v2475_v58  ;;  %v2635_v21 = vmul.f32 %v2475_v58, %v2475_v58  ;;  %v3449_v22 = vadd.f32 %v3448_v31, %v3447_v52  ;;  %v2478_v61 = vadd.f32 %v2477_v9, %v4557_v50  ;;  %v2354_v32 = vadd.f32 %v3446_v26, %v4512_v40 }
 0x1f6   : > { %v2596_v39 = vadd.f32 %v2595_v57, %v2475_v58  ;;  %v2665_v38 = vadd.f32 %v2664_v36, %v2634_v33  ;;  %2568 = vst [vmem:[%s4575_s15 + $0x78] sm:$0xff] %v2486_v11 }
 0x1f7   : > { %2566 = vst [vmem:[%s4575_s15 + $0x68] sm:$0xff] %v2478_v61  ;;  %v2636_v48 = vmul.f32 %v2478_v61, %v2478_v61  ;;  %v2357_v34 = vadd.f32 %v3449_v22, %v4518_v20  ;;  %v2638_v20 = vmul.f32 %v2486_v11, %v2486_v11 }
 0x1f8   : > { %v2666_v45 = vadd.f32 %v2665_v38, %v2635_v21  ;;  %v2597_v42 = vadd.f32 %v2596_v39, %v2478_v61 }
 0x1f9   : > { %v3450_v14 = vpop.f32.mrb[128].mxu1  ;;  %v3532_v47 = vpop.f32.mrb[128].mxu0 }
 0x1fa   : > { %v2598_v15 = vadd.f32 %v2597_v42, %v2483_v10  ;;  %v2667_v0 = vadd.f32 %v2666_v45, %v2636_v48  ;;  %v2499_v50 = vadd.f32 %v3532_v47, %v4599_v25  ;;  %v3451_v35 = vpop.f32.mrb[129].mxu1  ;;  %v2490_v40 = vpop.f32.mrb[129].mxu0 }
 0x1fb   : > { %v3452_v56 = vadd.f32 %v3451_v35, %v3450_v14  ;;  %v2491_v49 = vadd.f32 %v2490_v40, %v4584_v28  ;;  %v3453_v29 = vpop.f32.mrb[130].mxu1  ;;  %v3533_v3 = vpop.f32.mrb[130].mxu0 }
 0x1fc   : > { %v2668_v37 = vadd.f32 %v2667_v0, %v2637_v46  ;;  %2571 = vst [vmem:[%s4575_s15 + $0x90] sm:$0xff] %v2499_v50  ;;  %v2599_v59 = vadd.f32 %v2598_v15, %v2486_v11  ;;  %v2502_v17 = vadd.f32 %v3533_v3, %v4602_v41  ;;  %v3454_v63 = vpop.f32.mrb[131].mxu1  ;;  %v2493_v55 = vpop.f32.mrb[131].mxu0  ;;  %v2641_v10 = vmul.f32 %v2499_v50, %v2499_v50 }
 0x1fd   : > { %2569 = vst [vmem:[%s4575_s15 + $0x80] sm:$0xff] %v2491_v49  ;;  %v2639_v12 = vmul.f32 %v2491_v49, %v2491_v49  ;;  %v3455_v25 = vadd.f32 %v3454_v63, %v3453_v29  ;;  %v2494_v16 = vadd.f32 %v2493_v55, %v4589_v53  ;;  %v2362_v6 = vadd.f32 %v3452_v56, %v4524_v2 }
 0x1fe   : > { %v2600_v28 = vadd.f32 %v2599_v59, %v2491_v49  ;;  %v2669_v30 = vadd.f32 %v2668_v37, %v2638_v20  ;;  %2572 = vst [vmem:[%s4575_s15 + $0x98] sm:$0xff] %v2502_v17 }
 0x1ff   : > { %2570 = vst [vmem:[%s4575_s15 + $0x88] sm:$0xff] %v2494_v16  ;;  %v2640_v7 = vmul.f32 %v2494_v16, %v2494_v16  ;;  %v2365_v62 = vadd.f32 %v3455_v25, %v4530_v19  ;;  %v2642_v19 = vmul.f32 %v2502_v17, %v2502_v17 }
 0x200   : > { %v2670_v51 = vadd.f32 %v2669_v30, %v2639_v12  ;;  %v2601_v23 = vadd.f32 %v2600_v28, %v2494_v16 }
 0x201   : > { %v3456_v41 = vpop.f32.mrb[132].mxu1  ;;  %v3536_v8 = vpop.f32.mrb[132].mxu0 }
 0x202   : > { %v2602_v60 = vadd.f32 %v2601_v23, %v2499_v50  ;;  %v2671_v18 = vadd.f32 %v2670_v51, %v2640_v7  ;;  %v2515_v26 = vadd.f32 %v3536_v8, %v2354_v32  ;;  %v3457_v53 = vpop.f32.mrb[133].mxu1  ;;  %v2506_v58 = vpop.f32.mrb[133].mxu0 }
 0x203   : > { %v3458_v2 = vadd.f32 %v3457_v53, %v3456_v41  ;;  %v2507_v52 = vadd.f32 %v2506_v58, %v4612_v13  ;;  %v3459_v44 = vpop.f32.mrb[134].mxu1  ;;  %v3537_v33 = vpop.f32.mrb[134].mxu0 }
 0x204   : > { %v2672_v36 = vadd.f32 %v2671_v18, %v2641_v10  ;;  %2575 = vst [vmem:[%s4575_s15 + $0xb0] sm:$0xff] %v2515_v26  ;;  %v2603_v57 = vadd.f32 %v2602_v60, %v2502_v17  ;;  %v2518_v11 = vadd.f32 %v3537_v33, %v2357_v34  ;;  %v3460_v31 = vpop.f32.mrb[135].mxu1  ;;  %v2509_v9 = vpop.f32.mrb[135].mxu0  ;;  %v2645_v47 = vmul.f32 %v2515_v26, %v2515_v26 }
 0x205   : > { %2573 = vst [vmem:[%s4575_s15 + $0xa0] sm:$0xff] %v2507_v52  ;;  %v2643_v21 = vmul.f32 %v2507_v52, %v2507_v52  ;;  %v3461_v22 = vadd.f32 %v3460_v31, %v3459_v44  ;;  %v2510_v61 = vadd.f32 %v2509_v9, %v4617_v5  ;;  %v2370_v32 = vadd.f32 %v3458_v2, %v4536_v27 }
 0x206   : > { %v2604_v39 = vadd.f32 %v2603_v57, %v2507_v52  ;;  %v2673_v13 = vadd.f32 %v2672_v36, %v2642_v19  ;;  %2576 = vst [vmem:[%s4575_s15 + $0xb8] sm:$0xff] %v2518_v11  ;;  %v2646_v49 = vmul.f32 %v2518_v11, %v2518_v11 }
 0x207   : > { %2574 = vst [vmem:[%s4575_s15 + $0xa8] sm:$0xff] %v2510_v61  ;;  %v2644_v38 = vmul.f32 %v2510_v61, %v2510_v61  ;;  %v2373_v48 = vadd.f32 %v3461_v22, %v4542_v43 }
 0x208   : > { %v2674_v45 = vadd.f32 %v2673_v13, %v2643_v21  ;;  %v2605_v42 = vadd.f32 %v2604_v39, %v2510_v61 }
 0x209   : > { %v3462_v34 = vpop.f32.mrb[136].mxu1  ;;  %v3540_v14 = vpop.f32.mrb[136].mxu0 }
 0x20a   : > { %v2606_v46 = vadd.f32 %v2605_v42, %v2515_v26  ;;  %v2675_v15 = vadd.f32 %v2674_v45, %v2644_v38  ;;  %v2531_v0 = vadd.f32 %v3540_v14, %v2370_v32  ;;  %v3463_v5 = vpop.f32.mrb[137].mxu1  ;;  %v2522_v50 = vpop.f32.mrb[137].mxu0 }
 0x20b   : > { %v3464_v27 = vadd.f32 %v3463_v5, %v3462_v34  ;;  %v2523_v35 = vadd.f32 %v2522_v50, %v2362_v6  ;;  %v3465_v40 = vpop.f32.mrb[138].mxu1  ;;  %v3541_v56 = vpop.f32.mrb[138].mxu0 }
 0x20c   : > { %v2676_v43 = vadd.f32 %v2675_v15, %v2645_v47  ;;  %2579 = vst [vmem:[%s4575_s15 + $0xd0] sm:$0xff] %v2531_v0  ;;  %v2607_v29 = vadd.f32 %v2606_v46, %v2518_v11  ;;  %v2534_v3 = vadd.f32 %v3541_v56, %v2373_v48  ;;  %v3466_v20 = vpop.f32.mrb[139].mxu1  ;;  %v2525_v37 = vpop.f32.mrb[139].mxu0  ;;  %v2649_v23 = vmul.f32 %v2531_v0, %v2531_v0 }
 0x20d   : > { %2577 = vst [vmem:[%s4575_s15 + $0xc0] sm:$0xff] %v2523_v35  ;;  %v2647_v59 = vmul.f32 %v2523_v35, %v2523_v35  ;;  %v3467_v17 = vadd.f32 %v3466_v20, %v3465_v40  ;;  %v2526_v63 = vadd.f32 %v2525_v37, %v2365_v62  ;;  %v2378_v55 = vadd.f32 %v3464_v27, %v4548_v54 }
 0x20e   : > { %v2608_v12 = vadd.f32 %v2607_v29, %v2523_v35  ;;  %v2677_v25 = vadd.f32 %v2676_v43, %v2646_v49  ;;  %2580 = vst [vmem:[%s4575_s15 + $0xd8] sm:$0xff] %v2534_v3  ;;  %v2650_v53 = vmul.f32 %v2534_v3, %v2534_v3 }
 0x20f   : > { %2578 = vst [vmem:[%s4575_s15 + $0xc8] sm:$0xff] %v2526_v63  ;;  %v2648_v16 = vmul.f32 %v2526_v63, %v2526_v63  ;;  %v2381_v6 = vadd.f32 %v3467_v17, %v4554_v1 }
 0x210   : > { %v2678_v28 = vadd.f32 %v2677_v25, %v2647_v59  ;;  %v2609_v30 = vadd.f32 %v2608_v12, %v2526_v63 }
 0x211   : > { %v3468_v7 = vpop.f32.mrb[140].mxu1  ;;  %v3544_v51 = vpop.f32.mrb[140].mxu0 }
 0x212   : > { %v2610_v41 = vadd.f32 %v2609_v30, %v2531_v0  ;;  %v2679_v8 = vadd.f32 %v2678_v28, %v2648_v16  ;;  %v3469_v10 = vpop.f32.mrb[141].mxu1  ;;  %v2538_v60 = vpop.f32.mrb[141].mxu0 }
 0x213   : > { %v3470_v62 = vadd.f32 %v3469_v10, %v3468_v7  ;;  %v2539_v18 = vadd.f32 %v2538_v60, %v2378_v55  ;;  %v3471_v54 = vpop.f32.mrb[142].mxu1  ;;  %v3545_v26 = vpop.f32.mrb[142].mxu0 }
 0x214   : > { %v2680_v58 = vadd.f32 %v2679_v8, %v2649_v23  ;;  %v2611_v2 = vadd.f32 %v2610_v41, %v2534_v3  ;;  %v3472_v1 = vpop.f32.mrb[143].mxu1  ;;  %v2541_v52 = vpop.f32.mrb[143].mxu0 }
 0x215   : > { %v2386_v44 = vadd.f32 %v3470_v62, %v4560_v4  ;;  %2581 = vst [vmem:[%s4575_s15 + $0xe0] sm:$0xff] %v2539_v18  ;;  %v2651_v33 = vmul.f32 %v2539_v18, %v2539_v18  ;;  %v3473_v19 = vadd.f32 %v3472_v1, %v3471_v54  ;;  %v2542_v36 = vadd.f32 %v2541_v52, %v2381_v6 }
 0x216   : > { %v2612_v57 = vadd.f32 %v2611_v2, %v2539_v18  ;;  %v2681_v11 = vadd.f32 %v2680_v58, %v2650_v53 }
 0x217   : > { %v2547_v31 = vadd.f32 %v3544_v51, %v2386_v44  ;;  %v2389_v9 = vadd.f32 %v3473_v19, %v4567_v24  ;;  %2582 = vst [vmem:[%s4575_s15 + $0xe8] sm:$0xff] %v2542_v36  ;;  %v2652_v21 = vmul.f32 %v2542_v36, %v2542_v36 }
 0x218   : > { %v2682_v22 = vadd.f32 %v2681_v11, %v2651_v33  ;;  %v2613_v61 = vadd.f32 %v2612_v57, %v2542_v36 }
 0x219   : > { %2583 = vst [vmem:[%s4575_s15 + $0xf0] sm:$0xff] %v2547_v31  ;;  %v2653_v32 = vmul.f32 %v2547_v31, %v2547_v31  ;;  %v2550_v39 = vadd.f32 %v3545_v26, %v2389_v9 }
 0x21a   : > { %v2614_v4 = vadd.f32 %v2613_v61, %v2547_v31  ;;  %v2683_v13 = vadd.f32 %v2682_v22, %v2652_v21 }
 0x21b   : > { %2584 = vst [vmem:[%s4575_s15 + $0xf8] sm:$0xff] %v2550_v39  ;;  %v2654_v38 = vmul.f32 %v2550_v39, %v2550_v39 }
 0x21c   : > { %v2615_v48 = vadd.f32 %v2614_v4, %v2550_v39  ;;  %v2684_v45 = vadd.f32 %v2683_v13, %v2653_v32 }
 0x21e   : > { %v2616_v42 = vrot.slane %v2615_v48, 4  ;;  %v2685_v34 = vadd.f32 %v2684_v45, %v2654_v38 }
 0x220   : > { %v2617_v14 = vadd.f32 %v2616_v42, %v2615_v48  ;;  %v2686_v24 = vrot.slane %v2685_v34, 4 }
 0x222   : > { %v2618_v47 = vrot.slane %v2617_v14, 2  ;;  %v2687_v46 = vadd.f32 %v2686_v24, %v2685_v34 }
 0x224   : > { %v2619_v15 = vadd.f32 %v2618_v47, %v2617_v14  ;;  %v2688_v0 = vrot.slane %v2687_v46, 2 }
 0x226   : > { %v2620_v5 = vrot.slane %v2619_v15, 1  ;;  %v2689_v50 = vadd.f32 %v2688_v0, %v2687_v46 }
 0x228   : > { %v2621_v27 = vadd.f32 %v2620_v5, %v2619_v15  ;;  %v2690_v35 = vrot.slane %v2689_v50, 1 }
 0x22a   : > { %2622 = vst [vmem:[%s271_s17] sm:$0x1] %v2621_v27  ;;  %v2691_v40 = vadd.f32 %v2690_v35, %v2689_v50 }
 0x22c   : > { %2692 = vst [vmem:[%s274_s3] sm:$0x1] %v2691_v40 }
 0x22d PF: > { %s17_s21 = sadd.s32 1, %s3857_s21  }
 0x22e   : > { %p14_p5 = scmp.ge.s32.totalorder %s17_s21, 4  }
 0x230   :  { %16 = sbr.rel (!%p14_p5) target bundleno = 1 (0x1), region = 90 }

// kernel: bottleneck_forward.9
= control target key start
LH: loop header
LB: loop body
LE: loop exit
PB: predicated region body
PF: predicated region fallthrough
CT: control target
= control target key end

     0   :  { %s729_s21 = smov 0   ;;  %s1004_s0 = inlined_call_operand.vmem [shape: f32[512,128], index: 0, kind: input, shape index: {}]   ;;  %s1005_s1 = inlined_call_operand.vmem [shape: f32[512,128], index: 1, kind: input, shape index: {}]   ;;  %s1006_s2 = inlined_call_operand.vmem [shape: f32[1,128], index: 2, kind: input, shape index: {}]   ;;  %s1007_s3 = inlined_call_operand.vmem [shape: f32[1,128], index: 3, kind: input, shape index: {}]   ;;  %s1008_s4 = inlined_call_operand.vmem [shape: f32[1,128], index: 4, kind: input, shape index: {}]   ;;  %s1009_s5 = inlined_call_operand.vmem [shape: f32[1,128], index: 5, kind: input, shape index: {}]   ;;  %s1010_s6 = inlined_call_operand.vmem [shape: f32[512,128], index: 6, kind: output, shape index: {}]  }
   0x1 LB: > { %s661_s22 = sadd.s32 4294967295, %s692_s21   ;;  %p665_p0 = scmp.ge.s32.totalorder %s692_s21, 1  ;;  %s692_s21 = sphi %s729_s21, %s16_s21  }
   0x2   : > { %p224_p1 = scmp.lt.s32.totalorder %s692_s21, 3 }
   0x4   : > { %p225_p2 = pnand %p665_p0, %p224_p1 }
   0x5   : > { %s666_s23 = sshll.u32 (!%p225_p2), %s661_s22, 5  ;;  %v742_v0 = vld [vmem:[%s1006_s2] ss:$0 sm:$0xff] (!%p225_p2) }
   0x6   : > { %228 = sbr.rel (%p225_p2) target bundleno = 71 (0x47), region = 44  ;;  %p260_p3 = scmp.lt.s32.totalorder (!%p225_p2), %s666_s23, 63  ;;  %v747_v1 = vld [vmem:[%s1008_s4] ss:$0 sm:$0xff] (!%p225_p2) }
   0x7   : > { %v764_v2 = vld [vmem:[%s1007_s3] ss:$0 sm:$0xff] (!%p225_p2) }
   0x8   : > { %v769_v3 = vld [vmem:[%s1009_s5] ss:$0 sm:$0xff] (!%p225_p2) }
   0xd   : > { %s1012_s23 = smov (!%p260_p3, %s666_s23), 63 }
   0xe   : > { %s737_s24 = sshll.u32 %s1012_s23, 3 }
   0xf   : > { %s753_s7 = scalar_lea.vmem %s1004_s0, %s737_s24  ;;  %s759_s10 = scalar_lea.vmem %s1005_s1, %s737_s24 }
  0x10   : > { %v277_v4 = vld [vmem:[%s753_s7] sm:$0xff]  ;;  %v278_v6 = vld [vmem:[%s753_s7 + $0x8] sm:$0xff]  ;;  %v279_v11 = vld [vmem:[%s753_s7 + $0x10] sm:$0xff]  ;;  %s804_s17 = scalar_lea.vmem %s1010_s6, %s737_s24 }
  0x11   : > { %v387_v5 = vld [vmem:[%s759_s10] sm:$0xff]  ;;  %v316_v7 = vmul.f32 %v742_v0, %v277_v4  ;;  %v317_v9 = vmul.f32 %v742_v0, %v278_v6  ;;  %v388_v10 = vld [vmem:[%s759_s10 + $0x8] sm:$0xff]  ;;  %v389_v12 = vld [vmem:[%s759_s10 + $0x10] sm:$0xff]  ;;  %v318_v14 = vmul.f32 %v742_v0, %v279_v11 }
  0x12   : > { %v426_v8 = vmul.f32 %v747_v1, %v387_v5  ;;  %v427_v13 = vmul.f32 %v747_v1, %v388_v10  ;;  %v428_v15 = vmul.f32 %v747_v1, %v389_v12  ;;  %v280_v16 = vld [vmem:[%s753_s7 + $0x18] sm:$0xff]  ;;  %v281_v18 = vld [vmem:[%s753_s7 + $0x20] sm:$0xff]  ;;  %v282_v24 = vld [vmem:[%s753_s7 + $0x28] sm:$0xff] }
  0x13   : > { %v390_v17 = vld [vmem:[%s759_s10 + $0x18] sm:$0xff]  ;;  %v355_v19 = vadd.f32 %v764_v2, %v316_v7  ;;  %v356_v21 = vadd.f32 %v764_v2, %v317_v9  ;;  %v319_v22 = vmul.f32 %v742_v0, %v280_v16  ;;  %v391_v23 = vld [vmem:[%s759_s10 + $0x20] sm:$0xff]  ;;  %v357_v26 = vadd.f32 %v764_v2, %v318_v14  ;;  %v392_v29 = vld [vmem:[%s759_s10 + $0x28] sm:$0xff] }
  0x14   : > { %v465_v20 = vadd.f32 %v769_v3, %v426_v8  ;;  %v466_v25 = vadd.f32 %v769_v3, %v427_v13  ;;  %v467_v27 = vadd.f32 %v769_v3, %v428_v15  ;;  %v429_v28 = vmul.f32 %v747_v1, %v390_v17  ;;  %v283_v38 = vld [vmem:[%s753_s7 + $0x30] sm:$0xff]  ;;  %v284_v44 = vld [vmem:[%s753_s7 + $0x38] sm:$0xff]  ;;  %v285_v46 = vld [vmem:[%s753_s7 + $0x40] sm:$0xff] }
  0x15   : > { %v358_v31 = vadd.f32 %v764_v2, %v319_v22  ;;  %v320_v32 = vmul.f32 %v742_v0, %v281_v18  ;;  %v430_v33 = vmul.f32 %v747_v1, %v391_v23  ;;  %v321_v37 = vmul.f32 %v742_v0, %v282_v24  ;;  %v393_v39 = vld [vmem:[%s759_s10 + $0x30] sm:$0xff]  ;;  %v394_v45 = vld [vmem:[%s759_s10 + $0x38] sm:$0xff]  ;;  %v395_v55 = vld [vmem:[%s759_s10 + $0x40] sm:$0xff] }
  0x16   : > { %v497_v30 = vadd.f32 %v465_v20, %v355_v19  ;;  %v498_v34 = vadd.f32 %v466_v25, %v356_v21  ;;  %v499_v35 = vadd.f32 %v467_v27, %v357_v26  ;;  %v468_v36 = vadd.f32 %v769_v3, %v429_v28  ;;  %v286_v60 = vld [vmem:[%s753_s7 + $0x48] sm:$0xff]  ;;  %v287_v6 = vld [vmem:[%s753_s7 + $0x50] sm:$0xff]  ;;  %v288_v12 = vld [vmem:[%s753_s7 + $0x58] sm:$0xff] }
  0x17   : > { %v359_v41 = vadd.f32 %v764_v2, %v320_v32  ;;  %v469_v42 = vadd.f32 %v769_v3, %v430_v33  ;;  %v431_v43 = vmul.f32 %v747_v1, %v392_v29  ;;  %v360_v50 = vadd.f32 %v764_v2, %v321_v37  ;;  %v396_v61 = vld [vmem:[%s759_s10 + $0x48] sm:$0xff]  ;;  %v397_v7 = vld [vmem:[%s759_s10 + $0x50] sm:$0xff]  ;;  %v398_v21 = vld [vmem:[%s759_s10 + $0x58] sm:$0xff] }
  0x18   : > { %v529_v40 = vmax.f32 %v497_v30, 0.0  ;;  %v530_v47 = vmax.f32 %v498_v34, 0.0  ;;  %v531_v48 = vmax.f32 %v499_v35, 0.0  ;;  %v500_v49 = vadd.f32 %v468_v36, %v358_v31  ;;  %v289_v22 = vld [vmem:[%s753_s7 + $0x60] sm:$0xff]  ;;  %v290_v28 = vld [vmem:[%s753_s7 + $0x68] sm:$0xff] }
  0x19   : > { %v501_v51 = vadd.f32 %v469_v42, %v359_v41  ;;  %v470_v52 = vadd.f32 %v769_v3, %v431_v43  ;;  %v322_v53 = vmul.f32 %v742_v0, %v283_v38  ;;  %v432_v54 = vmul.f32 %v747_v1, %v393_v39  ;;  %v399_v27 = vld [vmem:[%s759_s10 + $0x60] sm:$0xff]  ;;  %v400_v33 = vld [vmem:[%s759_s10 + $0x68] sm:$0xff]  ;;  %v291_v38 = vld [vmem:[%s753_s7 + $0x70] sm:$0xff] }
  0x1a   : > { %561 = vst [vmem:[%s804_s17] sm:$0xff] %v529_v40  ;;  %562 = vst [vmem:[%s804_s17 + $0x8] sm:$0xff] %v530_v47  ;;  %v532_v56 = vmax.f32 %v500_v49, 0.0  ;;  %v323_v57 = vmul.f32 %v742_v0, %v284_v44  ;;  %v433_v58 = vmul.f32 %v747_v1, %v394_v45  ;;  %v324_v59 = vmul.f32 %v742_v0, %v285_v46  ;;  %v401_v43 = vld [vmem:[%s759_s10 + $0x70] sm:$0xff]  ;;  %v292_v44 = vld [vmem:[%s753_s7 + $0x78] sm:$0xff] }
  0x1b   : > { %563 = vst [vmem:[%s804_s17 + $0x10] sm:$0xff] %v531_v48  ;;  %v533_v62 = vmax.f32 %v501_v51, 0.0  ;;  %v502_v63 = vadd.f32 %v470_v52, %v360_v50  ;;  %v361_v4 = vadd.f32 %v764_v2, %v322_v53  ;;  %v471_v5 = vadd.f32 %v769_v3, %v432_v54  ;;  %v402_v49 = vld [vmem:[%s759_s10 + $0x78] sm:$0xff]  ;;  %v293_v50 = vld [vmem:[%s753_s7 + $0x80] sm:$0xff] }
  0x1c   : > { %564 = vst [vmem:[%s804_s17 + $0x18] sm:$0xff] %v532_v56  ;;  %v362_v8 = vadd.f32 %v764_v2, %v323_v57  ;;  %v472_v9 = vadd.f32 %v769_v3, %v433_v58  ;;  %v363_v10 = vadd.f32 %v764_v2, %v324_v59  ;;  %v434_v11 = vmul.f32 %v747_v1, %v395_v55  ;;  %v403_v59 = vld [vmem:[%s759_s10 + $0x80] sm:$0xff] }
  0x1d   : > { %565 = vst [vmem:[%s804_s17 + $0x20] sm:$0xff] %v533_v62  ;;  %v534_v13 = vmax.f32 %v502_v63, 0.0  ;;  %v503_v14 = vadd.f32 %v471_v5, %v361_v4  ;;  %v325_v15 = vmul.f32 %v742_v0, %v286_v60  ;;  %v435_v16 = vmul.f32 %v747_v1, %v396_v61  ;;  %v294_v4 = vld [vmem:[%s753_s7 + $0x88] sm:$0xff] }
  0x1e   : > { %v504_v17 = vadd.f32 %v472_v9, %v362_v8  ;;  %v473_v18 = vadd.f32 %v769_v3, %v434_v11  ;;  %v326_v19 = vmul.f32 %v742_v0, %v287_v6  ;;  %v436_v20 = vmul.f32 %v747_v1, %v397_v7  ;;  %v404_v5 = vld [vmem:[%s759_s10 + $0x88] sm:$0xff]  ;;  %v405_v11 = vld [vmem:[%s759_s10 + $0x90] sm:$0xff] }
  0x1f   : > { %566 = vst [vmem:[%s804_s17 + $0x28] sm:$0xff] %v534_v13  ;;  %v535_v23 = vmax.f32 %v503_v14, 0.0  ;;  %v364_v24 = vadd.f32 %v764_v2, %v325_v15  ;;  %v474_v25 = vadd.f32 %v769_v3, %v435_v16  ;;  %v327_v26 = vmul.f32 %v742_v0, %v288_v12  ;;  %v296_v16 = vld [vmem:[%s753_s7 + $0x98] sm:$0xff] }
  0x20   : > { %v536_v29 = vmax.f32 %v504_v17, 0.0  ;;  %v505_v30 = vadd.f32 %v473_v18, %v363_v10  ;;  %v365_v31 = vadd.f32 %v764_v2, %v326_v19  ;;  %v475_v32 = vadd.f32 %v769_v3, %v436_v20  ;;  %v295_v10 = vld [vmem:[%s753_s7 + $0x90] sm:$0xff] }
  0x21   : > { %567 = vst [vmem:[%s804_s17 + $0x30] sm:$0xff] %v535_v23  ;;  %v506_v34 = vadd.f32 %v474_v25, %v364_v24  ;;  %v366_v35 = vadd.f32 %v764_v2, %v327_v26  ;;  %v437_v36 = vmul.f32 %v747_v1, %v398_v21  ;;  %v328_v37 = vmul.f32 %v742_v0, %v289_v22  ;;  %v406_v25 = vld [vmem:[%s759_s10 + $0x98] sm:$0xff]  ;;  %v297_v26 = vld [vmem:[%s753_s7 + $0xa0] sm:$0xff] }
  0x22   : > { %568 = vst [vmem:[%s804_s17 + $0x38] sm:$0xff] %v536_v29  ;;  %v537_v39 = vmax.f32 %v505_v30, 0.0  ;;  %v507_v40 = vadd.f32 %v475_v32, %v365_v31  ;;  %v438_v41 = vmul.f32 %v747_v1, %v399_v27  ;;  %v329_v42 = vmul.f32 %v742_v0, %v290_v28  ;;  %v407_v31 = vld [vmem:[%s759_s10 + $0xa0] sm:$0xff]  ;;  %v298_v32 = vld [vmem:[%s753_s7 + $0xa8] sm:$0xff] }
  0x23   : > { %v538_v45 = vmax.f32 %v506_v34, 0.0  ;;  %v476_v46 = vadd.f32 %v769_v3, %v437_v36  ;;  %v367_v47 = vadd.f32 %v764_v2, %v328_v37  ;;  %v439_v48 = vmul.f32 %v747_v1, %v400_v33  ;;  %v408_v37 = vld [vmem:[%s759_s10 + $0xa8] sm:$0xff] }
  0x24   : > { %569 = vst [vmem:[%s804_s17 + $0x40] sm:$0xff] %v537_v39  ;;  %v539_v51 = vmax.f32 %v507_v40, 0.0  ;;  %v477_v52 = vadd.f32 %v769_v3, %v438_v41  ;;  %v368_v53 = vadd.f32 %v764_v2, %v329_v42  ;;  %v330_v54 = vmul.f32 %v742_v0, %v291_v38  ;;  %v299_v42 = vld [vmem:[%s753_s7 + $0xb0] sm:$0xff] }
  0x25   : > { %570 = vst [vmem:[%s804_s17 + $0x48] sm:$0xff] %v538_v45  ;;  %v508_v55 = vadd.f32 %v476_v46, %v366_v35  ;;  %v478_v56 = vadd.f32 %v769_v3, %v439_v48  ;;  %v440_v57 = vmul.f32 %v747_v1, %v401_v43  ;;  %v331_v58 = vmul.f32 %v742_v0, %v292_v44  ;;  %v300_v48 = vld [vmem:[%s753_s7 + $0xb8] sm:$0xff] }
  0x26   : > { %571 = vst [vmem:[%s804_s17 + $0x50] sm:$0xff] %v539_v51  ;;  %v509_v60 = vadd.f32 %v477_v52, %v367_v47  ;;  %v369_v61 = vadd.f32 %v764_v2, %v330_v54  ;;  %v441_v62 = vmul.f32 %v747_v1, %v402_v49  ;;  %v332_v63 = vmul.f32 %v742_v0, %v293_v50  ;;  %v409_v47 = vld [vmem:[%s759_s10 + $0xb0] sm:$0xff]  ;;  %v301_v54 = vld [vmem:[%s753_s7 + $0xc0] sm:$0xff] }
  0x27   : > { %v540_v6 = vmax.f32 %v508_v55, 0.0  ;;  %v510_v7 = vadd.f32 %v478_v56, %v368_v53  ;;  %v479_v8 = vadd.f32 %v769_v3, %v440_v57  ;;  %v370_v9 = vadd.f32 %v764_v2, %v331_v58  ;;  %v410_v53 = vld [vmem:[%s759_s10 + $0xb8] sm:$0xff] }
  0x28   : > { %v541_v12 = vmax.f32 %v509_v60, 0.0  ;;  %v480_v13 = vadd.f32 %v769_v3, %v441_v62  ;;  %v371_v14 = vadd.f32 %v764_v2, %v332_v63  ;;  %v442_v15 = vmul.f32 %v747_v1, %v403_v59  ;;  %v411_v63 = vld [vmem:[%s759_s10 + $0xc0] sm:$0xff] }
  0x29   : > { %572 = vst [vmem:[%s804_s17 + $0x58] sm:$0xff] %v540_v6  ;;  %v542_v17 = vmax.f32 %v510_v7, 0.0  ;;  %v511_v18 = vadd.f32 %v479_v8, %v369_v61  ;;  %v333_v19 = vmul.f32 %v742_v0, %v294_v4  ;;  %v443_v20 = vmul.f32 %v747_v1, %v404_v5  ;;  %v302_v8 = vld [vmem:[%s753_s7 + $0xc8] sm:$0xff] }
  0x2a   : > { %573 = vst [vmem:[%s804_s17 + $0x60] sm:$0xff] %v541_v12  ;;  %v512_v21 = vadd.f32 %v480_v13, %v370_v9  ;;  %v481_v22 = vadd.f32 %v769_v3, %v442_v15  ;;  %v334_v23 = vmul.f32 %v742_v0, %v295_v10  ;;  %v444_v24 = vmul.f32 %v747_v1, %v405_v11  ;;  %v412_v9 = vld [vmem:[%s759_s10 + $0xc8] sm:$0xff]  ;;  %v413_v15 = vld [vmem:[%s759_s10 + $0xd0] sm:$0xff] }
  0x2b   : > { %574 = vst [vmem:[%s804_s17 + $0x68] sm:$0xff] %v542_v17  ;;  %v543_v27 = vmax.f32 %v511_v18, 0.0  ;;  %v372_v28 = vadd.f32 %v764_v2, %v333_v19  ;;  %v482_v29 = vadd.f32 %v769_v3, %v443_v20  ;;  %v335_v30 = vmul.f32 %v742_v0, %v296_v16  ;;  %v304_v20 = vld [vmem:[%s753_s7 + $0xd8] sm:$0xff] }
  0x2c   : > { %v544_v33 = vmax.f32 %v512_v21, 0.0  ;;  %v513_v34 = vadd.f32 %v481_v22, %v371_v14  ;;  %v373_v35 = vadd.f32 %v764_v2, %v334_v23  ;;  %v483_v36 = vadd.f32 %v769_v3, %v444_v24  ;;  %v303_v14 = vld [vmem:[%s753_s7 + $0xd0] sm:$0xff] }
  0x2d   : > { %575 = vst [vmem:[%s804_s17 + $0x70] sm:$0xff] %v543_v27  ;;  %v514_v38 = vadd.f32 %v482_v29, %v372_v28  ;;  %v374_v39 = vadd.f32 %v764_v2, %v335_v30  ;;  %v445_v40 = vmul.f32 %v747_v1, %v406_v25  ;;  %v336_v41 = vmul.f32 %v742_v0, %v297_v26  ;;  %v414_v29 = vld [vmem:[%s759_s10 + $0xd8] sm:$0xff]  ;;  %v305_v30 = vld [vmem:[%s753_s7 + $0xe0] sm:$0xff] }
  0x2e   : > { %576 = vst [vmem:[%s804_s17 + $0x78] sm:$0xff] %v544_v33  ;;  %v545_v43 = vmax.f32 %v513_v34, 0.0  ;;  %v515_v44 = vadd.f32 %v483_v36, %v373_v35  ;;  %v446_v45 = vmul.f32 %v747_v1, %v407_v31  ;;  %v337_v46 = vmul.f32 %v742_v0, %v298_v32  ;;  %v415_v35 = vld [vmem:[%s759_s10 + $0xe0] sm:$0xff]  ;;  %v306_v36 = vld [vmem:[%s753_s7 + $0xe8] sm:$0xff] }
  0x2f   : > { %v546_v49 = vmax.f32 %v514_v38, 0.0  ;;  %v484_v50 = vadd.f32 %v769_v3, %v445_v40  ;;  %v375_v51 = vadd.f32 %v764_v2, %v336_v41  ;;  %v447_v52 = vmul.f32 %v747_v1, %v408_v37  ;;  %v416_v41 = vld [vmem:[%s759_s10 + $0xe8] sm:$0xff] }
  0x30   : > { %577 = vst [vmem:[%s804_s17 + $0x80] sm:$0xff] %v545_v43  ;;  %v547_v55 = vmax.f32 %v515_v44, 0.0  ;;  %v485_v56 = vadd.f32 %v769_v3, %v446_v45  ;;  %v376_v57 = vadd.f32 %v764_v2, %v337_v46  ;;  %v338_v58 = vmul.f32 %v742_v0, %v299_v42  ;;  %v307_v46 = vld [vmem:[%s753_s7 + $0xf0] sm:$0xff] }
  0x31   : > { %578 = vst [vmem:[%s804_s17 + $0x88] sm:$0xff] %v546_v49  ;;  %v516_v59 = vadd.f32 %v484_v50, %v374_v39  ;;  %v486_v60 = vadd.f32 %v769_v3, %v447_v52  ;;  %v448_v61 = vmul.f32 %v747_v1, %v409_v47  ;;  %v339_v62 = vmul.f32 %v742_v0, %v300_v48  ;;  %v308_v52 = vld [vmem:[%s753_s7 + $0xf8] sm:$0xff] }
  0x32   : > { %579 = vst [vmem:[%s804_s17 + $0x90] sm:$0xff] %v547_v55  ;;  %v517_v4 = vadd.f32 %v485_v56, %v375_v51  ;;  %v377_v5 = vadd.f32 %v764_v2, %v338_v58  ;;  %v449_v6 = vmul.f32 %v747_v1, %v410_v53  ;;  %v340_v7 = vmul.f32 %v742_v0, %v301_v54  ;;  %v417_v51 = vld [vmem:[%s759_s10 + $0xf0] sm:$0xff] }
  0x33   : > { %v548_v10 = vmax.f32 %v516_v59, 0.0  ;;  %v518_v11 = vadd.f32 %v486_v60, %v376_v57  ;;  %v487_v12 = vadd.f32 %v769_v3, %v448_v61  ;;  %v378_v13 = vadd.f32 %v764_v2, %v339_v62  ;;  %v418_v57 = vld [vmem:[%s759_s10 + $0xf8] sm:$0xff] }
  0x34   : > { %v549_v16 = vmax.f32 %v517_v4, 0.0  ;;  %v488_v17 = vadd.f32 %v769_v3, %v449_v6  ;;  %v379_v18 = vadd.f32 %v764_v2, %v340_v7  ;;  %v450_v19 = vmul.f32 %v747_v1, %v411_v63 }
  0x35   : > { %580 = vst [vmem:[%s804_s17 + $0x98] sm:$0xff] %v548_v10  ;;  %v550_v21 = vmax.f32 %v518_v11, 0.0  ;;  %v519_v22 = vadd.f32 %v487_v12, %v377_v5  ;;  %v341_v23 = vmul.f32 %v742_v0, %v302_v8  ;;  %v451_v24 = vmul.f32 %v747_v1, %v412_v9 }
  0x36   : > { %581 = vst [vmem:[%s804_s17 + $0xa0] sm:$0xff] %v549_v16  ;;  %v520_v25 = vadd.f32 %v488_v17, %v378_v13  ;;  %v489_v26 = vadd.f32 %v769_v3, %v450_v19  ;;  %v342_v27 = vmul.f32 %v742_v0, %v303_v14  ;;  %v452_v28 = vmul.f32 %v747_v1, %v413_v15 }
  0x37   : > { %582 = vst [vmem:[%s804_s17 + $0xa8] sm:$0xff] %v550_v21  ;;  %v551_v31 = vmax.f32 %v519_v22, 0.0  ;;  %v380_v32 = vadd.f32 %v764_v2, %v341_v23  ;;  %v490_v33 = vadd.f32 %v769_v3, %v451_v24  ;;  %v343_v34 = vmul.f32 %v742_v0, %v304_v20 }
  0x38   : > { %v552_v37 = vmax.f32 %v520_v25, 0.0  ;;  %v521_v38 = vadd.f32 %v489_v26, %v379_v18  ;;  %v381_v39 = vadd.f32 %v764_v2, %v342_v27  ;;  %v491_v40 = vadd.f32 %v769_v3, %v452_v28 }
  0x39   : > { %583 = vst [vmem:[%s804_s17 + $0xb0] sm:$0xff] %v551_v31  ;;  %v522_v42 = vadd.f32 %v490_v33, %v380_v32  ;;  %v382_v43 = vadd.f32 %v764_v2, %v343_v34  ;;  %v453_v44 = vmul.f32 %v747_v1, %v414_v29  ;;  %v344_v45 = vmul.f32 %v742_v0, %v305_v30 }
  0x3a   : > { %584 = vst [vmem:[%s804_s17 + $0xb8] sm:$0xff] %v552_v37  ;;  %v553_v47 = vmax.f32 %v521_v38, 0.0  ;;  %v523_v48 = vadd.f32 %v491_v40, %v381_v39  ;;  %v454_v49 = vmul.f32 %v747_v1, %v415_v35  ;;  %v345_v50 = vmul.f32 %v742_v0, %v306_v36 }
  0x3b   : > { %v554_v53 = vmax.f32 %v522_v42, 0.0  ;;  %v492_v54 = vadd.f32 %v769_v3, %v453_v44  ;;  %v383_v55 = vadd.f32 %v764_v2, %v344_v45  ;;  %v455_v56 = vmul.f32 %v747_v1, %v416_v41 }
  0x3c   : > { %585 = vst [vmem:[%s804_s17 + $0xc0] sm:$0xff] %v553_v47  ;;  %v555_v58 = vmax.f32 %v523_v48, 0.0  ;;  %v493_v59 = vadd.f32 %v769_v3, %v454_v49  ;;  %v384_v60 = vadd.f32 %v764_v2, %v345_v50  ;;  %v346_v61 = vmul.f32 %v742_v0, %v307_v46 }
  0x3d   : > { %586 = vst [vmem:[%s804_s17 + $0xc8] sm:$0xff] %v554_v53  ;;  %v524_v62 = vadd.f32 %v492_v54, %v382_v43  ;;  %v494_v63 = vadd.f32 %v769_v3, %v455_v56  ;;  %v456_v4 = vmul.f32 %v747_v1, %v417_v51  ;;  %v347_v5 = vmul.f32 %v742_v0, %v308_v52 }
  0x3e   : > { %587 = vst [vmem:[%s804_s17 + $0xd0] sm:$0xff] %v555_v58  ;;  %v525_v6 = vadd.f32 %v493_v59, %v383_v55  ;;  %v385_v7 = vadd.f32 %v764_v2, %v346_v61  ;;  %v457_v8 = vmul.f32 %v747_v1, %v418_v57 }
  0x3f   : > { %v556_v9 = vmax.f32 %v524_v62, 0.0  ;;  %v526_v10 = vadd.f32 %v494_v63, %v384_v60  ;;  %v495_v11 = vadd.f32 %v769_v3, %v456_v4  ;;  %v386_v12 = vadd.f32 %v764_v2, %v347_v5 }
  0x40   : > { %v557_v13 = vmax.f32 %v525_v6, 0.0  ;;  %v496_v14 = vadd.f32 %v769_v3, %v457_v8 }
  0x41   : > { %588 = vst [vmem:[%s804_s17 + $0xd8] sm:$0xff] %v556_v9  ;;  %v558_v0 = vmax.f32 %v526_v10, 0.0  ;;  %v527_v15 = vadd.f32 %v495_v11, %v385_v7 }
  0x42   : > { %589 = vst [vmem:[%s804_s17 + $0xe0] sm:$0xff] %v557_v13  ;;  %v528_v16 = vadd.f32 %v496_v14, %v386_v12 }
  0x43   : > { %590 = vst [vmem:[%s804_s17 + $0xe8] sm:$0xff] %v558_v0  ;;  %v559_v17 = vmax.f32 %v527_v15, 0.0 }
  0x44   : > { %v560_v18 = vmax.f32 %v528_v16, 0.0 }
  0x45   : > { %591 = vst [vmem:[%s804_s17 + $0xf0] sm:$0xff] %v559_v17 }
  0x46   : > { %592 = vst [vmem:[%s804_s17 + $0xf8] sm:$0xff] %v560_v18 }
  0x47 PF: > { %s16_s21 = sadd.s32 1, %s692_s21  }
  0x48   : > { %p13_p4 = scmp.ge.s32.totalorder %s16_s21, 4  }
  0x4a   :  { %15 = sbr.rel (!%p13_p4) target bundleno = 1 (0x1), region = 77 }

</bundles_post_ra>
